<compile_context>
chip_gen: v6e
topology: v6e:2x2x1
jax: 0.10.0
libtpu: 0.0.40
codegen_flags: <defaults>
</compile_context>

<pallas_src>
import jax
import jax.numpy as jnp
from jax.experimental import pallas as pl
from jax.experimental.pallas import tpu as pltpu


INPUT_DIM = 2048
FC_DIM = 1024
_VMEM_LIMIT = 32 * 1024 * 1024


def _round_up(x, m):
    return (x + m - 1) // m * m


def _pad_gate_cols(w, H, Hp):
    """(K, 4H) -> (K, 4Hp), zero-padding each of the 4 gate blocks to Hp."""
    if Hp == H:
        return w
    K = w.shape[0]
    return jnp.pad(w.reshape(K, 4, H), ((0, 0), (0, 0), (0, Hp - H))).reshape(K, 4 * Hp)


# ----------------------------------------------------------------------------
# Row-tiled matmul + bias kernel (used for the hoisted LSTM input projection).
# ----------------------------------------------------------------------------
def _matmul_bias_kernel(x_ref, w_ref, b_ref, o_ref):
    y = jnp.dot(x_ref[...], w_ref[...], preferred_element_type=jnp.float32) + b_ref[...]
    o_ref[...] = y.astype(o_ref.dtype)


def matmul_bias(x2d, w, b, tm=256):
    """x2d: (N, K), w: (K, G), b: (1, G) -> (N, G).  G must be lane-aligned."""
    N, K = x2d.shape
    G = w.shape[1]
    tm = min(tm, _round_up(N, 8))
    Np = _round_up(N, tm)
    if Np != N:
        x2d = jnp.pad(x2d, ((0, Np - N), (0, 0)))
    out = pl.pallas_call(
        _matmul_bias_kernel,
        out_shape=jax.ShapeDtypeStruct((Np, G), jnp.float32),
        grid=(Np // tm,),
        in_specs=[
            pl.BlockSpec((tm, K), lambda i: (i, 0)),
            pl.BlockSpec(memory_space=pltpu.MemorySpace.VMEM),   # weight: VMEM-resident
            pl.BlockSpec(memory_space=pltpu.MemorySpace.VMEM),   # bias
        ],
        out_specs=pl.BlockSpec((tm, G), lambda i: (i, 0)),
        compiler_params=pltpu.CompilerParams(
            dimension_semantics=("parallel",),
            vmem_limit_bytes=_VMEM_LIMIT),
    )(x2d, w, b)
    return out if Np == N else out[:N]


# ----------------------------------------------------------------------------
# Recurrent LSTM kernel: only the (B,Hp)@(Hp,4Hp) matmul + gate math per step.
# Consumes precomputed input-projection gates; TS timesteps per grid step.
# ----------------------------------------------------------------------------
def _lstm_recur_kernel(gates_ref, whh_ref, out_ref, h_sc, c_sc):
    @pl.when(pl.program_id(0) == 0)
    def _():
        h_sc[...] = jnp.zeros_like(h_sc)
        c_sc[...] = jnp.zeros_like(c_sc)

    B, TS, G = gates_ref.shape
    Hp = G // 4
    w_hh = whh_ref[...]
    h = h_sc[...]
    c = c_sc[...]
    for ts in range(TS):                                   # static -> fully unrolled
        g_in = gates_ref[:, ts:ts + 1, :].reshape(B, G)     # (B, 4Hp)
        g = g_in + jnp.dot(h, w_hh, preferred_element_type=jnp.float32)
        i_g = jax.nn.sigmoid(g[:, 0 * Hp:1 * Hp])           # PyTorch gate order i,f,g,o
        f_g = jax.nn.sigmoid(g[:, 1 * Hp:2 * Hp])
        g_g = jnp.tanh(g[:, 2 * Hp:3 * Hp])
        o_g = jax.nn.sigmoid(g[:, 3 * Hp:4 * Hp])
        c = f_g * c + i_g * g_g
        h = o_g * jnp.tanh(c)
        out_ref[:, ts:ts + 1, :] = h[:, None, :].astype(out_ref.dtype)
    h_sc[...] = h
    c_sc[...] = c


def lstm_recurrent(gates_bf, w_hh_p, ts_block=8):
    """gates_bf: (B, T, 4Hp) batch-first precomputed input gates.
       w_hh_p:   (Hp, 4Hp).  Returns (B, T, Hp)."""
    B, T, G = gates_bf.shape
    Hp = G // 4
    TS = ts_block
    Tp = _round_up(T, TS)
    if Tp != T:
        gates_bf = jnp.pad(gates_bf, ((0, 0), (0, Tp - T), (0, 0)))
    out = pl.pallas_call(
        _lstm_recur_kernel,
        out_shape=jax.ShapeDtypeStruct((B, Tp, Hp), jnp.float32),
        grid=(Tp // TS,),
        in_specs=[
            pl.BlockSpec((B, TS, G), lambda s: (0, s, 0)),
            pl.BlockSpec(memory_space=pltpu.MemorySpace.VMEM),   # w_hh: VMEM-resident
        ],
        out_specs=pl.BlockSpec((B, TS, Hp), lambda s: (0, s, 0)),
        scratch_shapes=[
            pltpu.VMEM((B, Hp), jnp.float32),   # h_t
            pltpu.VMEM((B, Hp), jnp.float32),   # c_t
        ],
        compiler_params=pltpu.CompilerParams(
            dimension_semantics=("arbitrary",),          # time is sequential
            vmem_limit_bytes=_VMEM_LIMIT),
    )(gates_bf, w_hh_p)
    return out if Tp == T else out[:, :T, :]


# ----------------------------------------------------------------------------
# MLP head kernel: fc2(fc(x)) fused, row-tiled, parallel grid.
# ----------------------------------------------------------------------------
def _mlp_kernel(x_ref, w1_ref, b1_ref, w2_ref, b2_ref, o_ref):
    h = jnp.dot(x_ref[...], w1_ref[...], preferred_element_type=jnp.float32) + b1_ref[...]
    y = jnp.dot(h, w2_ref[...], preferred_element_type=jnp.float32) + b2_ref[...]
    o_ref[...] = y.astype(o_ref.dtype)


def mlp_head(x2d, w1, b1, w2, b2, tm=256):
    N, H = x2d.shape
    C = w2.shape[1]
    tm = min(tm, _round_up(N, 8))
    Np = _round_up(N, tm)
    if Np != N:
        x2d = jnp.pad(x2d, ((0, Np - N), (0, 0)))
    out = pl.pallas_call(
        _mlp_kernel,
        out_shape=jax.ShapeDtypeStruct((Np, C), jnp.float32),
        grid=(Np // tm,),
        in_specs=[
            pl.BlockSpec((tm, H), lambda i: (i, 0)),
            pl.BlockSpec(memory_space=pltpu.MemorySpace.VMEM),
            pl.BlockSpec(memory_space=pltpu.MemorySpace.VMEM),
            pl.BlockSpec(memory_space=pltpu.MemorySpace.VMEM),
            pl.BlockSpec(memory_space=pltpu.MemorySpace.VMEM),
        ],
        out_specs=pl.BlockSpec((tm, C), lambda i: (i, 0)),
        compiler_params=pltpu.CompilerParams(
            dimension_semantics=("parallel",),
            vmem_limit_bytes=_VMEM_LIMIT),
    )(x2d, w1, b1, w2, b2)
    return out if Np == N else out[:N]


# ----------------------------------------------------------------------------
# Model wrapper (matches Resnet3dLstmModel.forward, inference semantics)
# ----------------------------------------------------------------------------
def init_params(key, hidden_dim, num_layers, num_classes):
    params = {"lstm": []}
    bound = 1.0 / jnp.sqrt(hidden_dim)
    for layer in range(num_layers):
        d_in = INPUT_DIM if layer == 0 else hidden_dim
        key, k1, k2, k3 = jax.random.split(key, 4)
        w_ih = jax.random.uniform(k1, (d_in, 4 * hidden_dim), jnp.float32, -bound, bound)
        w_hh = jax.random.uniform(k2, (hidden_dim, 4 * hidden_dim), jnp.float32, -bound, bound)
        b = jax.random.uniform(k3, (1, 4 * hidden_dim), jnp.float32, -bound, bound)  # b_ih+b_hh combined
        params["lstm"].append((w_ih, w_hh, b))
    key, k1, k2, k3, k4 = jax.random.split(key, 5)
    params["w_fc"] = jax.random.uniform(k1, (hidden_dim, FC_DIM), jnp.float32, -0.05, 0.05)
    params["b_fc"] = jax.random.uniform(k2, (1, FC_DIM), jnp.float32, -0.05, 0.05)
    params["w_fc2"] = jax.random.uniform(k3, (FC_DIM, num_classes), jnp.float32, -0.05, 0.05)
    params["b_fc2"] = jax.random.uniform(k4, (1, num_classes), jnp.float32, -0.05, 0.05)
    return params


def resnet3d_lstm_forward(params, x):
    """x: (B, T, 2048) batch_first, like nn.LSTM(batch_first=True)."""
    B, T, _ = x.shape
    seq = x                                              # (B, T, d_in), batch-first throughout
    for (w_ih, w_hh, b) in params["lstm"]:
        d_in = w_ih.shape[0]
        H = w_hh.shape[0]
        Hp = _round_up(H, 128)

        # Lane-align the gate dimension (zero padding is exact: padded gates = 0
        # => padded c/h stay exactly 0 and contribute nothing to real gates).
        w_ih_p = _pad_gate_cols(w_ih, H, Hp)             # (d_in, 4Hp)
        if seq.shape[-1] != d_in:                        # layer >= 1: inputs are padded h
            w_ih_p = jnp.pad(w_ih_p, ((0, seq.shape[-1] - d_in), (0, 0)))
        w_hh_p = _pad_gate_cols(jnp.pad(w_hh, ((0, Hp - H), (0, 0))), H, Hp)  # (Hp, 4Hp)
        b_p = _pad_gate_cols(b, H, Hp)                   # (1, 4Hp)

        # Hoisted input projection: one big parallel matmul over all B*T rows.
        gates = matmul_bias(seq.reshape(B * T, seq.shape[-1]), w_ih_p, b_p)   # (B*T, 4Hp)
        # Serial recurrence on the small (B,Hp)@(Hp,4Hp) part only.
        seq = lstm_recurrent(gates.reshape(B, T, 4 * Hp), w_hh_p)             # (B, T, Hp)

    Hp = seq.shape[-1]
    H = params["w_fc"].shape[0]
    C = params["w_fc2"].shape[1]
    Cp = _round_up(C, 128)
    w_fc_p = jnp.pad(params["w_fc"], ((0, Hp - H), (0, 0)))                   # (Hp, 1024)
    w_fc2_p = jnp.pad(params["w_fc2"], ((0, 0), (0, Cp - C)))                 # (1024, Cp)
    b_fc2_p = jnp.pad(params["b_fc2"], ((0, 0), (0, Cp - C)))                 # (1, Cp)

    y = mlp_head(seq.reshape(B * T, Hp), w_fc_p, params["b_fc"], w_fc2_p, b_fc2_p)  # (B*T, Cp)
    return y[:, :C].reshape(B, T, C)


# ----------------------------------------------------------------------------
# Pure-JAX reference (unpadded) for correctness checking.
# ----------------------------------------------------------------------------
def _ref_forward(params, x):
    B, T, _ = x.shape
    seq = x
    for (w_ih, w_hh, b) in params["lstm"]:
        H = w_hh.shape[0]
        h = jnp.zeros((B, H), jnp.float32)
        c = jnp.zeros((B, H), jnp.float32)
        outs = []
        for t in range(T):
            g = seq[:, t, :] @ w_ih + h @ w_hh + b
            i = jax.nn.sigmoid(g[:, 0 * H:1 * H])
            f = jax.nn.sigmoid(g[:, 1 * H:2 * H])
            gg = jnp.tanh(g[:, 2 * H:3 * H])
            o = jax.nn.sigmoid(g[:, 3 * H:4 * H])
            c = f * c + i * gg
            h = o * jnp.tanh(c)
            outs.append(h)
        seq = jnp.stack(outs, axis=1)
    y = (seq @ params["w_fc"] + params["b_fc"]) @ params["w_fc2"] + params["b_fc2"]
    return y


if __name__ == "__main__":
    hidden_dim, num_layers, num_classes = 32, 2, 16
    B, T = 2, 8

    key = jax.random.PRNGKey(0)
    kx, kp = jax.random.split(key)
    x = jax.random.normal(kx, (B, T, INPUT_DIM), jnp.float32)
    params = init_params(kp, hidden_dim, num_layers, num_classes)

    out = jax.block_until_ready(resnet3d_lstm_forward(params, x))
    ref = jax.block_until_ready(_ref_forward(params, x))

    assert out.shape == (B, T, num_classes)
    assert float(jnp.max(jnp.abs(out - ref))) < 2e-4, "mismatch vs reference"
    print("KERNEL_OK")
</pallas_src>

<mosaic_0001>
module attributes {stable_mosaic.version = 11 : i64} {
  func.func @_matmul_bias_kernel(%arg0: i32, %arg1: memref<16x2048xf32, #tpu.memory_space<vmem>>, %arg2: memref<2048x512xf32, #tpu.memory_space<vmem>>, %arg3: memref<1x512xf32, #tpu.memory_space<vmem>>, %arg4: memref<16x512xf32, #tpu.memory_space<vmem>>) attributes {dimension_semantics = [#tpu.dimension_semantics<parallel>], iteration_bounds = array<i64: 1>, scalar_prefetch = 0 : i64, scratch_operands = 0 : i64, tpu.core_type = #tpu.core_type<tc>, window_params = [{transform_indices = @transform_0, window_bounds = array<i64: 16, 2048>}, {pipeline_mode = #tpu.pipeline_mode<synchronous>, transform_indices = @transform_1, window_bounds = array<i64: 2048, 512>}, {pipeline_mode = #tpu.pipeline_mode<synchronous>, transform_indices = @transform_2, window_bounds = array<i64: 1, 512>}, {transform_indices = @transform_3, window_bounds = array<i64: 16, 512>}]} {
    %c0 = arith.constant 0 : index
    %c0_0 = arith.constant 0 : index
    %0 = vector.load %arg1[%c0, %c0_0] : memref<16x2048xf32, #tpu.memory_space<vmem>>, vector<16x2048xf32>
    %c0_1 = arith.constant 0 : index
    %c0_2 = arith.constant 0 : index
    %1 = vector.load %arg2[%c0_1, %c0_2] : memref<2048x512xf32, #tpu.memory_space<vmem>>, vector<2048x512xf32>
    %cst = arith.constant dense<0.000000e+00> : vector<16x512xf32>
    %2 = tpu.matmul %0, %1, %cst {dimension_numbers = #tpu.dot_dimension_numbers<[1], [0], [0], [1], [0, 0, 1, 1], [], []>} : vector<16x2048xf32>, vector<2048x512xf32>, vector<16x512xf32> -> vector<16x512xf32>
    %c0_3 = arith.constant 0 : index
    %c0_4 = arith.constant 0 : index
    %3 = vector.load %arg3[%c0_3, %c0_4] : memref<1x512xf32, #tpu.memory_space<vmem>>, vector<1x512xf32>
    %4 = vector.broadcast %3 : vector<1x512xf32> to vector<16x512xf32>
    %5 = arith.addf %2, %4 : vector<16x512xf32>
    %c0_5 = arith.constant 0 : index
    %c0_6 = arith.constant 0 : index
    %6 = vector.load %arg4[%c0_5, %c0_6] : memref<16x512xf32, #tpu.memory_space<vmem>>, vector<16x512xf32>
    tpu.vector_store %arg4[%c0_5, %c0_6], %5 {strides = array<i32>} : memref<16x512xf32, #tpu.memory_space<vmem>>, vector<16x512xf32>,
    return
  }
  func.func @transform_0(%arg0: i32) -> (i32, i32) {
    %c0_i32 = arith.constant 0 : i32
    %c0_i32_0 = arith.constant 0 : i32
    return %arg0, %c0_i32 : i32, i32
  }
  func.func @transform_1(%arg0: i32) -> (i32, i32) {
    %c0_i32 = arith.constant 0 : i32
    %c0_i32_0 = arith.constant 0 : i32
    %c0_i32_1 = arith.constant 0 : i32
    return %c0_i32, %c0_i32_0 : i32, i32
  }
  func.func @transform_2(%arg0: i32) -> (i32, i32) {
    %c0_i32 = arith.constant 0 : i32
    %c0_i32_0 = arith.constant 0 : i32
    %c0_i32_1 = arith.constant 0 : i32
    return %c0_i32, %c0_i32_0 : i32, i32
  }
  func.func @transform_3(%arg0: i32) -> (i32, i32) {
    %c0_i32 = arith.constant 0 : i32
    %c0_i32_0 = arith.constant 0 : i32
    return %arg0, %c0_i32 : i32, i32
  }
}

</mosaic_0001>

<bundles_post_ra>
// kernel: tpu_custom_call.1
= control target key start
LH: loop header
LB: loop body
LE: loop exit
PB: predicated region body
PF: predicated region fallthrough
CT: control target
= control target key end

     0   :  { %8 = vsyncpa [#allocation3], 0  ;;  %s2625_s0 = inlined_call_operand.hbm [shape: f32[16,2048], index: 0, kind: input, shape index: {}]   ;;  %s2626_s1 = inlined_call_operand.hbm [shape: f32[2048,512], index: 1, kind: input, shape index: {}]   ;;  %s2627_s2 = inlined_call_operand.hbm [shape: f32[1,512], index: 2, kind: input, shape index: {}]   ;;  %s2628_s3 = inlined_call_operand.hbm [shape: f32[16,512], index: 3, kind: output, shape index: {}]  }
   0x1   :  { %9 = vsyncpa [#allocation6], 0 }
   0x2   :  { %10 = vsyncpa [#allocation4], 0  ;;  %s2516_s12 = smov [#allocation5]  }
   0x3   :  { %s28_s13 = sshll.u32 %s2516_s12, 4  ;;  %s29_s13 = int_to_ptr.vmem [resolvable:$true] %s28_s13 }
   0x4   :  { %s2438_s14 = scalar_lea.vmem %s29_s13, 131072  ;;  %p2443_p1 = scmp.lt.s32.totalorder %s29_s13, %s29_s13 }
   0x5   :  { %p2439_p0 = scmp.ne.s32.totalorder %s29_s13, %s2438_s14  ;;  %p2444_p2 = scmp.lt.s32.totalorder %s2438_s14, %s2438_s14 }
   0x7   :  { %p2445_p3 = por %p2444_p2, %p2443_p1 }
   0x9   :  { %p2446_p4 = pnand %p2445_p3, %p2439_p0 }
   0xb   :  { %2449 = shalt.err (!%p2446_p4)
}
   0xc   :  { %s2517_s15 = smov 512   ;;  %s2518_s16 = smov 32  }
   0xd   :  { %34 = dma.hbm_to_vmem [thread:$0]  %s2626_s1, 131072, %s29_s13, [#allocation6], %s2517_s15, %s2517_s15, %s2518_s16  }
   0xe   :  { %s2519_s19 = smov [#allocation2]  }
   0xf   :  { %s16_s20 = sshll.u32 %s2519_s19, 4  ;;  %s17_s20 = int_to_ptr.vmem [resolvable:$true] %s16_s20 }
  0x10   :  { %s2458_s21 = scalar_lea.vmem %s17_s20, 4096  ;;  %p2463_p6 = scmp.lt.s32.totalorder %s17_s20, %s17_s20 }
  0x11   :  { %p2459_p5 = scmp.ne.s32.totalorder %s17_s20, %s2458_s21  ;;  %p2464_p7 = scmp.lt.s32.totalorder %s2458_s21, %s2458_s21 }
  0x13   :  { %p2465_p8 = por %p2464_p7, %p2463_p6 }
  0x15   :  { %p2466_p9 = pnand %p2465_p8, %p2459_p5 }
  0x17   :  { %2469 = shalt.err (!%p2466_p9)
}
  0x18   :  { %s2520_s22 = smov 2048   ;;  %s2521_s23 = smov 128  }
  0x19   :  { %22 = dma.hbm_to_vmem [thread:$0]  %s2625_s0, 4096, %s17_s20, [#allocation3], %s2520_s22, %s2520_s22, %s2521_s23  }
  0x1a   :  { %s2522_s26 = smov [#allocation7]  }
  0x1b   :  { %s41_s27 = sshll.u32 %s2522_s26, 4  ;;  %s42_s27 = int_to_ptr.vmem [resolvable:$true] %s41_s27 }
  0x1c   :  { %s2478_s1 = scalar_lea.vmem %s42_s27, 64  ;;  %p2483_p11 = scmp.lt.s32.totalorder %s42_s27, %s42_s27 }
  0x1d   :  { %p2479_p10 = scmp.ne.s32.totalorder %s42_s27, %s2478_s1  ;;  %p2484_p12 = scmp.lt.s32.totalorder %s2478_s1, %s2478_s1 }
  0x1f   :  { %p2485_p13 = por %p2484_p12, %p2483_p11 }
  0x21   :  { %p2486_p0 = pnand %p2485_p13, %p2479_p10 }
  0x23   :  { %2489 = shalt.err (!%p2486_p0)
}
  0x24   :  { %44 = dma.hbm_to_vmem [thread:$0]  %s2627_s2, 64, %s42_s27, [#allocation6]  }
  0x25   :  { %2510 = dma.done.wait [#allocation3], 4096  }
  0x26   :  { %2511 = vsyncadd [#allocation3], 4294963200 }
  0x27   :  { %2512 = dma.done.wait [#allocation6], 131136  }
  0x28   :  { %2513 = vsyncadd [#allocation6], 4294836160  ;;  %v147_v0 = vld [vmem:[#allocation5 + $0x1e8] sm:$0xff]  ;;  %v146_v2 = vld [vmem:[#allocation5 + $0x1e0] sm:$0xff]  ;;  %s2523_s0 = smov [#allocation8]  }
  0x29   :  { %v275_v1 = vld [vmem:[#allocation5 + $0x5e8] sm:$0xff]  ;;  %1132 = vmatprep.subr.mxu0 %v147_v0  ;;  %v274_v3 = vld [vmem:[#allocation5 + $0x5e0] sm:$0xff]  ;;  %s2377_s2 = sshll.u32 %s2523_s0, 4  ;;  %s2378_s2 = int_to_ptr.vmem [resolvable:$true] %s2377_s2 }
  0x2a   :  { %1209 = vmatprep.subr.mxu1 %v275_v1  ;;  %v143_v4 = vld [vmem:[#allocation5 + $0x1c8] sm:$0xff]  ;;  %1133 = vmatpush1.msra.mxu0 %v146_v2  ;;  %v142_v6 = vld [vmem:[#allocation5 + $0x1c0] sm:$0xff]  ;;  %s2490_s30 = scalar_lea.vmem %s2378_s2, 1024  ;;  %p2495_p2 = scmp.lt.s32.totalorder %s2378_s2, %s2378_s2 }
  0x2b   :  { %v271_v5 = vld [vmem:[#allocation5 + $0x5c8] sm:$0xff]  ;;  %1210 = vmatpush1.msra.mxu1 %v274_v3  ;;  %v270_v7 = vld [vmem:[#allocation5 + $0x5c0] sm:$0xff]  ;;  %1134 = vmatprep.subr.mxu0 %v143_v4  ;;  %p2491_p1 = scmp.ne.s32.totalorder %s2378_s2, %s2490_s30  ;;  %p2496_p3 = scmp.lt.s32.totalorder %s2490_s30, %s2490_s30 }
  0x2c   :  { %v139_v8 = vld [vmem:[#allocation5 + $0x1a8] sm:$0xff]  ;;  %1211 = vmatprep.subr.mxu1 %v271_v5  ;;  %v138_v10 = vld [vmem:[#allocation5 + $0x1a0] sm:$0xff]  ;;  %1135 = vmatpush1.msra.mxu0 %v142_v6 }
  0x2d   :  { %v267_v9 = vld [vmem:[#allocation5 + $0x5a8] sm:$0xff]  ;;  %v266_v11 = vld [vmem:[#allocation5 + $0x5a0] sm:$0xff]  ;;  %1212 = vmatpush1.msra.mxu1 %v270_v7  ;;  %1136 = vmatprep.subr.mxu0 %v139_v8  ;;  %p2497_p4 = por %p2496_p3, %p2495_p2 }
  0x2e   :  { %v135_v12 = vld [vmem:[#allocation5 + $0x188] sm:$0xff]  ;;  %1213 = vmatprep.subr.mxu1 %v267_v9  ;;  %v134_v14 = vld [vmem:[#allocation5 + $0x180] sm:$0xff]  ;;  %1137 = vmatpush1.msra.mxu0 %v138_v10 }
  0x2f   :  { %v263_v13 = vld [vmem:[#allocation5 + $0x588] sm:$0xff]  ;;  %v262_v15 = vld [vmem:[#allocation5 + $0x580] sm:$0xff]  ;;  %1214 = vmatpush1.msra.mxu1 %v266_v11  ;;  %1138 = vmatprep.subr.mxu0 %v135_v12  ;;  %p2498_p5 = pnand %p2497_p4, %p2491_p1 }
  0x30   :  { %v131_v16 = vld [vmem:[#allocation5 + $0x168] sm:$0xff]  ;;  %1215 = vmatprep.subr.mxu1 %v263_v13  ;;  %v130_v18 = vld [vmem:[#allocation5 + $0x160] sm:$0xff]  ;;  %1139 = vmatpush1.msra.mxu0 %v134_v14 }
  0x31   :  { %v259_v17 = vld [vmem:[#allocation5 + $0x568] sm:$0xff]  ;;  %v258_v19 = vld [vmem:[#allocation5 + $0x560] sm:$0xff]  ;;  %1216 = vmatpush1.msra.mxu1 %v262_v15  ;;  %1140 = vmatprep.subr.mxu0 %v131_v16 }
  0x32   :  { %v127_v20 = vld [vmem:[#allocation5 + $0x148] sm:$0xff]  ;;  %1217 = vmatprep.subr.mxu1 %v259_v17  ;;  %v126_v22 = vld [vmem:[#allocation5 + $0x140] sm:$0xff]  ;;  %1141 = vmatpush1.msra.mxu0 %v130_v18 }
  0x33   :  { %v255_v21 = vld [vmem:[#allocation5 + $0x548] sm:$0xff]  ;;  %v254_v23 = vld [vmem:[#allocation5 + $0x540] sm:$0xff]  ;;  %1218 = vmatpush1.msra.mxu1 %v258_v19  ;;  %1142 = vmatprep.subr.mxu0 %v127_v20 }
  0x34   :  { %v123_v24 = vld [vmem:[#allocation5 + $0x128] sm:$0xff]  ;;  %1219 = vmatprep.subr.mxu1 %v255_v21  ;;  %v122_v26 = vld [vmem:[#allocation5 + $0x120] sm:$0xff]  ;;  %1143 = vmatpush1.msra.mxu0 %v126_v22 }
  0x35   :  { %v251_v25 = vld [vmem:[#allocation5 + $0x528] sm:$0xff]  ;;  %v250_v27 = vld [vmem:[#allocation5 + $0x520] sm:$0xff]  ;;  %1220 = vmatpush1.msra.mxu1 %v254_v23  ;;  %1144 = vmatprep.subr.mxu0 %v123_v24 }
  0x36   :  { %v119_v28 = vld [vmem:[#allocation5 + $0x108] sm:$0xff]  ;;  %1221 = vmatprep.subr.mxu1 %v251_v25  ;;  %v118_v30 = vld [vmem:[#allocation5 + $0x100] sm:$0xff]  ;;  %1145 = vmatpush1.msra.mxu0 %v122_v26 }
  0x37   :  { %v247_v29 = vld [vmem:[#allocation5 + $0x508] sm:$0xff]  ;;  %v246_v31 = vld [vmem:[#allocation5 + $0x500] sm:$0xff]  ;;  %1222 = vmatpush1.msra.mxu1 %v250_v27  ;;  %1146 = vmatprep.subr.mxu0 %v119_v28 }
  0x38   :  { %v115_v32 = vld [vmem:[#allocation5 + $0xe8] sm:$0xff]  ;;  %1223 = vmatprep.subr.mxu1 %v247_v29  ;;  %v114_v34 = vld [vmem:[#allocation5 + $0xe0] sm:$0xff]  ;;  %1147 = vmatpush1.msra.mxu0 %v118_v30 }
  0x39   :  { %v243_v33 = vld [vmem:[#allocation5 + $0x4e8] sm:$0xff]  ;;  %v242_v35 = vld [vmem:[#allocation5 + $0x4e0] sm:$0xff]  ;;  %1224 = vmatpush1.msra.mxu1 %v246_v31  ;;  %1148 = vmatprep.subr.mxu0 %v115_v32 }
  0x3a   :  { %v111_v36 = vld [vmem:[#allocation5 + $0xc8] sm:$0xff]  ;;  %1225 = vmatprep.subr.mxu1 %v243_v33  ;;  %v110_v38 = vld [vmem:[#allocation5 + $0xc0] sm:$0xff]  ;;  %1149 = vmatpush1.msra.mxu0 %v114_v34 }
  0x3b   :  { %v239_v37 = vld [vmem:[#allocation5 + $0x4c8] sm:$0xff]  ;;  %v238_v39 = vld [vmem:[#allocation5 + $0x4c0] sm:$0xff]  ;;  %1226 = vmatpush1.msra.mxu1 %v242_v35  ;;  %1150 = vmatprep.subr.mxu0 %v111_v36 }
  0x3c   :  { %v107_v40 = vld [vmem:[#allocation5 + $0xa8] sm:$0xff]  ;;  %1227 = vmatprep.subr.mxu1 %v239_v37  ;;  %v106_v42 = vld [vmem:[#allocation5 + $0xa0] sm:$0xff]  ;;  %1151 = vmatpush1.msra.mxu0 %v110_v38 }
  0x3d   :  { %v235_v41 = vld [vmem:[#allocation5 + $0x4a8] sm:$0xff]  ;;  %v234_v43 = vld [vmem:[#allocation5 + $0x4a0] sm:$0xff]  ;;  %1228 = vmatpush1.msra.mxu1 %v238_v39  ;;  %1152 = vmatprep.subr.mxu0 %v107_v40 }
  0x3e   :  { %v103_v44 = vld [vmem:[#allocation5 + $0x88] sm:$0xff]  ;;  %1229 = vmatprep.subr.mxu1 %v235_v41  ;;  %v102_v46 = vld [vmem:[#allocation5 + $0x80] sm:$0xff]  ;;  %1153 = vmatpush1.msra.mxu0 %v106_v42 }
  0x3f   :  { %v231_v45 = vld [vmem:[#allocation5 + $0x488] sm:$0xff]  ;;  %v230_v47 = vld [vmem:[#allocation5 + $0x480] sm:$0xff]  ;;  %1230 = vmatpush1.msra.mxu1 %v234_v43  ;;  %1154 = vmatprep.subr.mxu0 %v103_v44 }
  0x40   :  { %v99_v48 = vld [vmem:[#allocation5 + $0x68] sm:$0xff]  ;;  %1231 = vmatprep.subr.mxu1 %v231_v45  ;;  %v98_v50 = vld [vmem:[#allocation5 + $0x60] sm:$0xff]  ;;  %1155 = vmatpush1.msra.mxu0 %v102_v46 }
  0x41   :  { %v227_v49 = vld [vmem:[#allocation5 + $0x468] sm:$0xff]  ;;  %v226_v51 = vld [vmem:[#allocation5 + $0x460] sm:$0xff]  ;;  %1232 = vmatpush1.msra.mxu1 %v230_v47  ;;  %1156 = vmatprep.subr.mxu0 %v99_v48 }
  0x42   :  { %v95_v52 = vld [vmem:[#allocation5 + $0x48] sm:$0xff]  ;;  %1233 = vmatprep.subr.mxu1 %v227_v49  ;;  %v94_v54 = vld [vmem:[#allocation5 + $0x40] sm:$0xff]  ;;  %1157 = vmatpush1.msra.mxu0 %v98_v50 }
  0x43   :  { %v223_v53 = vld [vmem:[#allocation5 + $0x448] sm:$0xff]  ;;  %v222_v55 = vld [vmem:[#allocation5 + $0x440] sm:$0xff]  ;;  %1234 = vmatpush1.msra.mxu1 %v226_v51  ;;  %1158 = vmatprep.subr.mxu0 %v95_v52 }
  0x44   :  { %v91_v56 = vld [vmem:[#allocation5 + $0x28] sm:$0xff]  ;;  %1235 = vmatprep.subr.mxu1 %v223_v53  ;;  %v90_v58 = vld [vmem:[#allocation5 + $0x20] sm:$0xff]  ;;  %1159 = vmatpush1.msra.mxu0 %v94_v54 }
  0x45   :  { %v219_v57 = vld [vmem:[#allocation5 + $0x428] sm:$0xff]  ;;  %v218_v59 = vld [vmem:[#allocation5 + $0x420] sm:$0xff]  ;;  %1236 = vmatpush1.msra.mxu1 %v222_v55  ;;  %1160 = vmatprep.subr.mxu0 %v91_v56 }
  0x46   :  { %v87_v60 = vld [vmem:[#allocation5 + $0x8] sm:$0xff]  ;;  %1237 = vmatprep.subr.mxu1 %v219_v57  ;;  %v86_v62 = vld [vmem:[#allocation5] sm:$0xff]  ;;  %1161 = vmatpush1.msra.mxu0 %v90_v58 }
  0x47   :  { %v215_v61 = vld [vmem:[#allocation5 + $0x408] sm:$0xff]  ;;  %v214_v63 = vld [vmem:[#allocation5 + $0x400] sm:$0xff]  ;;  %1238 = vmatpush1.msra.mxu1 %v218_v59  ;;  %1162 = vmatprep.subr.mxu0 %v87_v60 }
  0x48   :  { %v211_v0 = vld [vmem:[#allocation5 + $0x3e8] sm:$0xff]  ;;  %1239 = vmatprep.subr.mxu1 %v215_v61  ;;  %v210_v2 = vld [vmem:[#allocation5 + $0x3e0] sm:$0xff]  ;;  %1163 = vmatpush1.msra.mxu0 %v86_v62 }
  0x49   :  { %v339_v1 = vld [vmem:[#allocation5 + $0x7e8] sm:$0xff]  ;;  %v338_v3 = vld [vmem:[#allocation5 + $0x7e0] sm:$0xff]  ;;  %1240 = vmatpush1.msra.mxu1 %v214_v63  ;;  %1164 = vmatprep.subr.mxu0 %v211_v0 }
  0x4a   :  { %v207_v4 = vld [vmem:[#allocation5 + $0x3c8] sm:$0xff]  ;;  %1241 = vmatprep.subr.mxu1 %v339_v1  ;;  %v206_v6 = vld [vmem:[#allocation5 + $0x3c0] sm:$0xff]  ;;  %1165 = vmatpush2.msra.mxu0 %v210_v2  ;;  %v57_v2 = vld [vmem:[#allocation2 + $0x18] sm:$0xff] }
  0x4b   :  { %v335_v5 = vld [vmem:[#allocation5 + $0x7c8] sm:$0xff]  ;;  %v334_v7 = vld [vmem:[#allocation5 + $0x7c0] sm:$0xff]  ;;  %1242 = vmatpush2.msra.mxu1 %v338_v3  ;;  %1166 = vmatprep.subr.mxu0 %v207_v4 }
  0x4c   :  { %v203_v8 = vld [vmem:[#allocation5 + $0x3a8] sm:$0xff]  ;;  %1243 = vmatprep.subr.mxu1 %v335_v5  ;;  %v202_v10 = vld [vmem:[#allocation5 + $0x3a0] sm:$0xff]  ;;  %1167 = vmatpush2.msra.mxu0 %v206_v6  ;;  %v56_v5 = vld [vmem:[#allocation2 + $0x10] sm:$0xff] }
  0x4d   :  { %v331_v9 = vld [vmem:[#allocation5 + $0x7a8] sm:$0xff]  ;;  %v330_v11 = vld [vmem:[#allocation5 + $0x7a0] sm:$0xff]  ;;  %1244 = vmatpush2.msra.mxu1 %v334_v7  ;;  %1168 = vmatprep.subr.mxu0 %v203_v8 }
  0x4e   :  { %v199_v12 = vld [vmem:[#allocation5 + $0x388] sm:$0xff]  ;;  %1245 = vmatprep.subr.mxu1 %v331_v9  ;;  %v198_v14 = vld [vmem:[#allocation5 + $0x380] sm:$0xff]  ;;  %1169 = vmatpush2.msra.mxu0 %v202_v10 }
  0x4f   :  { %v327_v13 = vld [vmem:[#allocation5 + $0x788] sm:$0xff]  ;;  %v326_v15 = vld [vmem:[#allocation5 + $0x780] sm:$0xff]  ;;  %1246 = vmatpush2.msra.mxu1 %v330_v11  ;;  %1170 = vmatprep.subr.mxu0 %v199_v12 }
  0x50   :  { %v195_v16 = vld [vmem:[#allocation5 + $0x368] sm:$0xff]  ;;  %1247 = vmatprep.subr.mxu1 %v327_v13  ;;  %v194_v18 = vld [vmem:[#allocation5 + $0x360] sm:$0xff]  ;;  %1171 = vmatpush2.msra.mxu0 %v198_v14 }
  0x51   :  { %v323_v17 = vld [vmem:[#allocation5 + $0x768] sm:$0xff]  ;;  %v322_v19 = vld [vmem:[#allocation5 + $0x760] sm:$0xff]  ;;  %1248 = vmatpush2.msra.mxu1 %v326_v15  ;;  %1172 = vmatprep.subr.mxu0 %v195_v16 }
  0x52   :  { %v191_v20 = vld [vmem:[#allocation5 + $0x348] sm:$0xff]  ;;  %1249 = vmatprep.subr.mxu1 %v323_v17  ;;  %v190_v22 = vld [vmem:[#allocation5 + $0x340] sm:$0xff]  ;;  %1173 = vmatpush2.msra.mxu0 %v194_v18 }
  0x53   :  { %v319_v21 = vld [vmem:[#allocation5 + $0x748] sm:$0xff]  ;;  %v318_v23 = vld [vmem:[#allocation5 + $0x740] sm:$0xff]  ;;  %1250 = vmatpush2.msra.mxu1 %v322_v19  ;;  %1174 = vmatprep.subr.mxu0 %v191_v20 }
  0x54   :  { %v187_v24 = vld [vmem:[#allocation5 + $0x328] sm:$0xff]  ;;  %1251 = vmatprep.subr.mxu1 %v319_v21  ;;  %v186_v26 = vld [vmem:[#allocation5 + $0x320] sm:$0xff]  ;;  %1175 = vmatpush2.msra.mxu0 %v190_v22 }
  0x55   :  { %v315_v25 = vld [vmem:[#allocation5 + $0x728] sm:$0xff]  ;;  %v314_v27 = vld [vmem:[#allocation5 + $0x720] sm:$0xff]  ;;  %1252 = vmatpush2.msra.mxu1 %v318_v23  ;;  %1176 = vmatprep.subr.mxu0 %v187_v24 }
  0x56   :  { %v183_v28 = vld [vmem:[#allocation5 + $0x308] sm:$0xff]  ;;  %1253 = vmatprep.subr.mxu1 %v315_v25  ;;  %v182_v30 = vld [vmem:[#allocation5 + $0x300] sm:$0xff]  ;;  %1177 = vmatpush2.msra.mxu0 %v186_v26 }
  0x57   :  { %v311_v29 = vld [vmem:[#allocation5 + $0x708] sm:$0xff]  ;;  %v310_v31 = vld [vmem:[#allocation5 + $0x700] sm:$0xff]  ;;  %1254 = vmatpush2.msra.mxu1 %v314_v27  ;;  %1178 = vmatprep.subr.mxu0 %v183_v28 }
  0x58   :  { %v179_v32 = vld [vmem:[#allocation5 + $0x2e8] sm:$0xff]  ;;  %1255 = vmatprep.subr.mxu1 %v311_v29  ;;  %v178_v34 = vld [vmem:[#allocation5 + $0x2e0] sm:$0xff]  ;;  %1179 = vmatpush2.msra.mxu0 %v182_v30 }
  0x59   :  { %v307_v33 = vld [vmem:[#allocation5 + $0x6e8] sm:$0xff]  ;;  %v306_v35 = vld [vmem:[#allocation5 + $0x6e0] sm:$0xff]  ;;  %1256 = vmatpush2.msra.mxu1 %v310_v31  ;;  %1180 = vmatprep.subr.mxu0 %v179_v32 }
  0x5a   :  { %v175_v36 = vld [vmem:[#allocation5 + $0x2c8] sm:$0xff]  ;;  %1257 = vmatprep.subr.mxu1 %v307_v33  ;;  %v174_v38 = vld [vmem:[#allocation5 + $0x2c0] sm:$0xff]  ;;  %1181 = vmatpush2.msra.mxu0 %v178_v34 }
  0x5b   :  { %v303_v37 = vld [vmem:[#allocation5 + $0x6c8] sm:$0xff]  ;;  %v302_v39 = vld [vmem:[#allocation5 + $0x6c0] sm:$0xff]  ;;  %1258 = vmatpush2.msra.mxu1 %v306_v35  ;;  %1182 = vmatprep.subr.mxu0 %v175_v36 }
  0x5c   :  { %v171_v40 = vld [vmem:[#allocation5 + $0x2a8] sm:$0xff]  ;;  %1259 = vmatprep.subr.mxu1 %v303_v37  ;;  %v170_v42 = vld [vmem:[#allocation5 + $0x2a0] sm:$0xff]  ;;  %1183 = vmatpush2.msra.mxu0 %v174_v38 }
  0x5d   :  { %v299_v41 = vld [vmem:[#allocation5 + $0x6a8] sm:$0xff]  ;;  %v298_v43 = vld [vmem:[#allocation5 + $0x6a0] sm:$0xff]  ;;  %1260 = vmatpush2.msra.mxu1 %v302_v39  ;;  %1184 = vmatprep.subr.mxu0 %v171_v40 }
  0x5e   :  { %v167_v44 = vld [vmem:[#allocation5 + $0x288] sm:$0xff]  ;;  %1261 = vmatprep.subr.mxu1 %v299_v41  ;;  %v166_v46 = vld [vmem:[#allocation5 + $0x280] sm:$0xff]  ;;  %1185 = vmatpush2.msra.mxu0 %v170_v42 }
  0x5f   :  { %v295_v45 = vld [vmem:[#allocation5 + $0x688] sm:$0xff]  ;;  %v294_v47 = vld [vmem:[#allocation5 + $0x680] sm:$0xff]  ;;  %1262 = vmatpush2.msra.mxu1 %v298_v43  ;;  %1186 = vmatprep.subr.mxu0 %v167_v44 }
  0x60   :  { %v163_v48 = vld [vmem:[#allocation5 + $0x268] sm:$0xff]  ;;  %1263 = vmatprep.subr.mxu1 %v295_v45  ;;  %v162_v50 = vld [vmem:[#allocation5 + $0x260] sm:$0xff]  ;;  %1187 = vmatpush2.msra.mxu0 %v166_v46 }
  0x61   :  { %v291_v49 = vld [vmem:[#allocation5 + $0x668] sm:$0xff]  ;;  %v290_v51 = vld [vmem:[#allocation5 + $0x660] sm:$0xff]  ;;  %1264 = vmatpush2.msra.mxu1 %v294_v47  ;;  %1188 = vmatprep.subr.mxu0 %v163_v48 }
  0x62   :  { %v159_v52 = vld [vmem:[#allocation5 + $0x248] sm:$0xff]  ;;  %1265 = vmatprep.subr.mxu1 %v291_v49  ;;  %v158_v54 = vld [vmem:[#allocation5 + $0x240] sm:$0xff]  ;;  %1189 = vmatpush2.msra.mxu0 %v162_v50 }
  0x63   :  { %v287_v53 = vld [vmem:[#allocation5 + $0x648] sm:$0xff]  ;;  %v286_v55 = vld [vmem:[#allocation5 + $0x640] sm:$0xff]  ;;  %1266 = vmatpush2.msra.mxu1 %v290_v51  ;;  %1190 = vmatprep.subr.mxu0 %v159_v52 }
  0x64   :  { %v155_v56 = vld [vmem:[#allocation5 + $0x228] sm:$0xff]  ;;  %1267 = vmatprep.subr.mxu1 %v287_v53  ;;  %v154_v58 = vld [vmem:[#allocation5 + $0x220] sm:$0xff]  ;;  %1191 = vmatpush2.msra.mxu0 %v158_v54 }
  0x65   :  { %v283_v57 = vld [vmem:[#allocation5 + $0x628] sm:$0xff]  ;;  %v282_v59 = vld [vmem:[#allocation5 + $0x620] sm:$0xff]  ;;  %1268 = vmatpush2.msra.mxu1 %v286_v55  ;;  %1192 = vmatprep.subr.mxu0 %v155_v56 }
  0x66   :  { %v151_v60 = vld [vmem:[#allocation5 + $0x208] sm:$0xff]  ;;  %1269 = vmatprep.subr.mxu1 %v283_v57  ;;  %v150_v62 = vld [vmem:[#allocation5 + $0x200] sm:$0xff]  ;;  %1193 = vmatpush2.msra.mxu0 %v154_v58 }
  0x67   :  { %v279_v61 = vld [vmem:[#allocation5 + $0x608] sm:$0xff]  ;;  %1270 = vmatpush2.msra.mxu1 %v282_v59  ;;  %v278_v0 = vld [vmem:[#allocation5 + $0x600] sm:$0xff]  ;;  %1194 = vmatprep.subr.mxu0 %v151_v60 }
  0x68   :  { %v55_v63 = vld [vmem:[#allocation2 + $0x8] sm:$0xff]  ;;  %v54_v1 = vld [vmem:[#allocation2] sm:$0xff]  ;;  %1271 = vmatprep.subr.mxu1 %v279_v61  ;;  %1195 = vmatpush2.msra.mxu0 %v150_v62 }
  0x69   :  { %v403_v3 = vld [vmem:[#allocation5 + $0x9e8] sm:$0xff]  ;;  %1196 = vmatprep.mubr.f32.mxu0 %v55_v63  ;;  %1272 = vmatpush2.msra.mxu1 %v278_v0  ;;  %v402_v6 = vld [vmem:[#allocation5 + $0x9e0] sm:$0xff] }
  0x6a   :  { %v531_v4 = vld [vmem:[#allocation5 + $0xde8] sm:$0xff]  ;;  %1197 = vmatmul.mubr.f32.vlgmr.msra.gmra.mxu0 %v54_v1  ;;  %v530_v7 = vld [vmem:[#allocation5 + $0xde0] sm:$0xff]  ;;  %1273 = vmatprep.mubr.f32.mxu1 %v57_v2 }
  0x6b   :  { %1286 = vmatprep.subr.mxu0 %v403_v3  ;;  %v399_v8 = vld [vmem:[#allocation5 + $0x9c8] sm:$0xff]  ;;  %1363 = vmatprep.subr.mxu1 %v531_v4  ;;  %v398_v10 = vld [vmem:[#allocation5 + $0x9c0] sm:$0xff] }
  0x6c   :  { %v527_v9 = vld [vmem:[#allocation5 + $0xdc8] sm:$0xff]  ;;  %1274 = vmatmul.mubr.f32.vlgmr.msra.gmra.mxu1 %v56_v5  ;;  %v526_v11 = vld [vmem:[#allocation5 + $0xdc0] sm:$0xff]  ;;  %1287 = vmatpush1.msra.mxu0 %v402_v6 }
  0x6d   :  { %1364 = vmatpush1.msra.mxu1 %v530_v7  ;;  %v395_v12 = vld [vmem:[#allocation5 + $0x9a8] sm:$0xff]  ;;  %1288 = vmatprep.subr.mxu0 %v399_v8  ;;  %v394_v14 = vld [vmem:[#allocation5 + $0x9a0] sm:$0xff] }
  0x6e   :  { %v523_v13 = vld [vmem:[#allocation5 + $0xda8] sm:$0xff]  ;;  %1365 = vmatprep.subr.mxu1 %v527_v9  ;;  %v522_v15 = vld [vmem:[#allocation5 + $0xda0] sm:$0xff]  ;;  %1289 = vmatpush1.msra.mxu0 %v398_v10 }
  0x6f   :  { %1366 = vmatpush1.msra.mxu1 %v526_v11  ;;  %v391_v16 = vld [vmem:[#allocation5 + $0x988] sm:$0xff]  ;;  %1290 = vmatprep.subr.mxu0 %v395_v12  ;;  %v390_v18 = vld [vmem:[#allocation5 + $0x980] sm:$0xff] }
  0x70   :  { %v519_v17 = vld [vmem:[#allocation5 + $0xd88] sm:$0xff]  ;;  %1367 = vmatprep.subr.mxu1 %v523_v13  ;;  %v518_v19 = vld [vmem:[#allocation5 + $0xd80] sm:$0xff]  ;;  %1291 = vmatpush1.msra.mxu0 %v394_v14 }
  0x71   :  { %1368 = vmatpush1.msra.mxu1 %v522_v15  ;;  %v387_v20 = vld [vmem:[#allocation5 + $0x968] sm:$0xff]  ;;  %1292 = vmatprep.subr.mxu0 %v391_v16  ;;  %v386_v22 = vld [vmem:[#allocation5 + $0x960] sm:$0xff] }
  0x72   :  { %v515_v21 = vld [vmem:[#allocation5 + $0xd68] sm:$0xff]  ;;  %1369 = vmatprep.subr.mxu1 %v519_v17  ;;  %v514_v23 = vld [vmem:[#allocation5 + $0xd60] sm:$0xff]  ;;  %1293 = vmatpush1.msra.mxu0 %v390_v18 }
  0x73   :  { %1370 = vmatpush1.msra.mxu1 %v518_v19  ;;  %v383_v24 = vld [vmem:[#allocation5 + $0x948] sm:$0xff]  ;;  %1294 = vmatprep.subr.mxu0 %v387_v20  ;;  %v382_v26 = vld [vmem:[#allocation5 + $0x940] sm:$0xff] }
  0x74   :  { %v511_v25 = vld [vmem:[#allocation5 + $0xd48] sm:$0xff]  ;;  %1371 = vmatprep.subr.mxu1 %v515_v21  ;;  %v510_v27 = vld [vmem:[#allocation5 + $0xd40] sm:$0xff]  ;;  %1295 = vmatpush1.msra.mxu0 %v386_v22 }
  0x75   :  { %1372 = vmatpush1.msra.mxu1 %v514_v23  ;;  %v379_v28 = vld [vmem:[#allocation5 + $0x928] sm:$0xff]  ;;  %1296 = vmatprep.subr.mxu0 %v383_v24  ;;  %v378_v30 = vld [vmem:[#allocation5 + $0x920] sm:$0xff] }
  0x76   :  { %v507_v29 = vld [vmem:[#allocation5 + $0xd28] sm:$0xff]  ;;  %1373 = vmatprep.subr.mxu1 %v511_v25  ;;  %v506_v31 = vld [vmem:[#allocation5 + $0xd20] sm:$0xff]  ;;  %1297 = vmatpush1.msra.mxu0 %v382_v26 }
  0x77   :  { %1374 = vmatpush1.msra.mxu1 %v510_v27  ;;  %v375_v32 = vld [vmem:[#allocation5 + $0x908] sm:$0xff]  ;;  %1298 = vmatprep.subr.mxu0 %v379_v28  ;;  %v374_v34 = vld [vmem:[#allocation5 + $0x900] sm:$0xff] }
  0x78   :  { %v503_v33 = vld [vmem:[#allocation5 + $0xd08] sm:$0xff]  ;;  %1375 = vmatprep.subr.mxu1 %v507_v29  ;;  %v502_v35 = vld [vmem:[#allocation5 + $0xd00] sm:$0xff]  ;;  %1299 = vmatpush1.msra.mxu0 %v378_v30 }
  0x79   :  { %1376 = vmatpush1.msra.mxu1 %v506_v31  ;;  %v371_v36 = vld [vmem:[#allocation5 + $0x8e8] sm:$0xff]  ;;  %1300 = vmatprep.subr.mxu0 %v375_v32  ;;  %v370_v38 = vld [vmem:[#allocation5 + $0x8e0] sm:$0xff] }
  0x7a   :  { %v499_v37 = vld [vmem:[#allocation5 + $0xce8] sm:$0xff]  ;;  %1377 = vmatprep.subr.mxu1 %v503_v33  ;;  %v498_v39 = vld [vmem:[#allocation5 + $0xce0] sm:$0xff]  ;;  %1301 = vmatpush1.msra.mxu0 %v374_v34 }
  0x7b   :  { %1378 = vmatpush1.msra.mxu1 %v502_v35  ;;  %v367_v40 = vld [vmem:[#allocation5 + $0x8c8] sm:$0xff]  ;;  %1302 = vmatprep.subr.mxu0 %v371_v36  ;;  %v366_v42 = vld [vmem:[#allocation5 + $0x8c0] sm:$0xff] }
  0x7c   :  { %v495_v41 = vld [vmem:[#allocation5 + $0xcc8] sm:$0xff]  ;;  %1379 = vmatprep.subr.mxu1 %v499_v37  ;;  %v494_v43 = vld [vmem:[#allocation5 + $0xcc0] sm:$0xff]  ;;  %1303 = vmatpush1.msra.mxu0 %v370_v38 }
  0x7d   :  { %1380 = vmatpush1.msra.mxu1 %v498_v39  ;;  %v363_v44 = vld [vmem:[#allocation5 + $0x8a8] sm:$0xff]  ;;  %1304 = vmatprep.subr.mxu0 %v367_v40  ;;  %v362_v46 = vld [vmem:[#allocation5 + $0x8a0] sm:$0xff] }
  0x7e   :  { %v491_v45 = vld [vmem:[#allocation5 + $0xca8] sm:$0xff]  ;;  %1381 = vmatprep.subr.mxu1 %v495_v41  ;;  %v490_v47 = vld [vmem:[#allocation5 + $0xca0] sm:$0xff]  ;;  %1305 = vmatpush1.msra.mxu0 %v366_v42 }
  0x7f   :  { %1382 = vmatpush1.msra.mxu1 %v494_v43  ;;  %v359_v48 = vld [vmem:[#allocation5 + $0x888] sm:$0xff]  ;;  %1306 = vmatprep.subr.mxu0 %v363_v44  ;;  %v358_v50 = vld [vmem:[#allocation5 + $0x880] sm:$0xff] }
  0x80   :  { %v487_v49 = vld [vmem:[#allocation5 + $0xc88] sm:$0xff]  ;;  %1383 = vmatprep.subr.mxu1 %v491_v45  ;;  %v486_v51 = vld [vmem:[#allocation5 + $0xc80] sm:$0xff]  ;;  %1307 = vmatpush1.msra.mxu0 %v362_v46 }
  0x81   :  { %1384 = vmatpush1.msra.mxu1 %v490_v47  ;;  %v355_v52 = vld [vmem:[#allocation5 + $0x868] sm:$0xff]  ;;  %1308 = vmatprep.subr.mxu0 %v359_v48  ;;  %v354_v54 = vld [vmem:[#allocation5 + $0x860] sm:$0xff] }
  0x82   :  { %v483_v53 = vld [vmem:[#allocation5 + $0xc68] sm:$0xff]  ;;  %1385 = vmatprep.subr.mxu1 %v487_v49  ;;  %v482_v55 = vld [vmem:[#allocation5 + $0xc60] sm:$0xff]  ;;  %1309 = vmatpush1.msra.mxu0 %v358_v50 }
  0x83   :  { %1386 = vmatpush1.msra.mxu1 %v486_v51  ;;  %v351_v56 = vld [vmem:[#allocation5 + $0x848] sm:$0xff]  ;;  %1310 = vmatprep.subr.mxu0 %v355_v52  ;;  %v350_v58 = vld [vmem:[#allocation5 + $0x840] sm:$0xff] }
  0x84   :  { %v479_v57 = vld [vmem:[#allocation5 + $0xc48] sm:$0xff]  ;;  %1387 = vmatprep.subr.mxu1 %v483_v53  ;;  %v478_v59 = vld [vmem:[#allocation5 + $0xc40] sm:$0xff]  ;;  %1311 = vmatpush1.msra.mxu0 %v354_v54 }
  0x85   :  { %1388 = vmatpush1.msra.mxu1 %v482_v55  ;;  %v347_v60 = vld [vmem:[#allocation5 + $0x828] sm:$0xff]  ;;  %1312 = vmatprep.subr.mxu0 %v351_v56  ;;  %v346_v62 = vld [vmem:[#allocation5 + $0x820] sm:$0xff] }
  0x86   :  { %v475_v61 = vld [vmem:[#allocation5 + $0xc28] sm:$0xff]  ;;  %1389 = vmatprep.subr.mxu1 %v479_v57  ;;  %v474_v63 = vld [vmem:[#allocation5 + $0xc20] sm:$0xff]  ;;  %1313 = vmatpush1.msra.mxu0 %v350_v58 }
  0x87   :  { %1390 = vmatpush1.msra.mxu1 %v478_v59  ;;  %v343_v0 = vld [vmem:[#allocation5 + $0x808] sm:$0xff]  ;;  %1314 = vmatprep.subr.mxu0 %v347_v60  ;;  %v342_v2 = vld [vmem:[#allocation5 + $0x800] sm:$0xff] }
  0x88   :  { %v471_v1 = vld [vmem:[#allocation5 + $0xc08] sm:$0xff]  ;;  %1391 = vmatprep.subr.mxu1 %v475_v61  ;;  %v470_v3 = vld [vmem:[#allocation5 + $0xc00] sm:$0xff]  ;;  %1315 = vmatpush1.msra.mxu0 %v346_v62  ;;  %v73_v62 = vld [vmem:[#allocation2 + $0x98] sm:$0xff] }
  0x89   :  { %1392 = vmatpush1.msra.mxu1 %v474_v63  ;;  %v467_v4 = vld [vmem:[#allocation5 + $0xbe8] sm:$0xff]  ;;  %1316 = vmatprep.subr.mxu0 %v343_v0  ;;  %v466_v6 = vld [vmem:[#allocation5 + $0xbe0] sm:$0xff] }
  0x8a   :  { %v595_v5 = vld [vmem:[#allocation5 + $0xfe8] sm:$0xff]  ;;  %1393 = vmatprep.subr.mxu1 %v471_v1  ;;  %v594_v7 = vld [vmem:[#allocation5 + $0xfe0] sm:$0xff]  ;;  %1317 = vmatpush1.msra.mxu0 %v342_v2  ;;  %v72_v1 = vld [vmem:[#allocation2 + $0x90] sm:$0xff] }
  0x8b   :  { %1394 = vmatpush1.msra.mxu1 %v470_v3  ;;  %v463_v8 = vld [vmem:[#allocation5 + $0xbc8] sm:$0xff]  ;;  %1318 = vmatprep.subr.mxu0 %v467_v4  ;;  %v462_v10 = vld [vmem:[#allocation5 + $0xbc0] sm:$0xff] }
  0x8c   :  { %v591_v9 = vld [vmem:[#allocation5 + $0xfc8] sm:$0xff]  ;;  %1395 = vmatprep.subr.mxu1 %v595_v5  ;;  %v590_v11 = vld [vmem:[#allocation5 + $0xfc0] sm:$0xff]  ;;  %1319 = vmatpush2.msra.mxu0 %v466_v6 }
  0x8d   :  { %1396 = vmatpush2.msra.mxu1 %v594_v7  ;;  %v459_v12 = vld [vmem:[#allocation5 + $0xba8] sm:$0xff]  ;;  %1320 = vmatprep.subr.mxu0 %v463_v8  ;;  %v458_v14 = vld [vmem:[#allocation5 + $0xba0] sm:$0xff] }
  0x8e   :  { %v587_v13 = vld [vmem:[#allocation5 + $0xfa8] sm:$0xff]  ;;  %1397 = vmatprep.subr.mxu1 %v591_v9  ;;  %v586_v15 = vld [vmem:[#allocation5 + $0xfa0] sm:$0xff]  ;;  %1321 = vmatpush2.msra.mxu0 %v462_v10  ;;  %v61_v10 = vld [vmem:[#allocation2 + $0x38] sm:$0xff] }
  0x8f   :  { %1398 = vmatpush2.msra.mxu1 %v590_v11  ;;  %v455_v16 = vld [vmem:[#allocation5 + $0xb88] sm:$0xff]  ;;  %1322 = vmatprep.subr.mxu0 %v459_v12  ;;  %v454_v18 = vld [vmem:[#allocation5 + $0xb80] sm:$0xff] }
  0x90   :  { %v583_v17 = vld [vmem:[#allocation5 + $0xf88] sm:$0xff]  ;;  %1399 = vmatprep.subr.mxu1 %v587_v13  ;;  %v582_v19 = vld [vmem:[#allocation5 + $0xf80] sm:$0xff]  ;;  %1323 = vmatpush2.msra.mxu0 %v458_v14  ;;  %v60_v13 = vld [vmem:[#allocation2 + $0x30] sm:$0xff] }
  0x91   :  { %1400 = vmatpush2.msra.mxu1 %v586_v15  ;;  %v451_v20 = vld [vmem:[#allocation5 + $0xb68] sm:$0xff]  ;;  %1324 = vmatprep.subr.mxu0 %v455_v16  ;;  %v450_v22 = vld [vmem:[#allocation5 + $0xb60] sm:$0xff] }
  0x92   :  { %v579_v21 = vld [vmem:[#allocation5 + $0xf68] sm:$0xff]  ;;  %1401 = vmatprep.subr.mxu1 %v583_v17  ;;  %v578_v23 = vld [vmem:[#allocation5 + $0xf60] sm:$0xff]  ;;  %1325 = vmatpush2.msra.mxu0 %v454_v18 }
  0x93   :  { %1402 = vmatpush2.msra.mxu1 %v582_v19  ;;  %v447_v24 = vld [vmem:[#allocation5 + $0xb48] sm:$0xff]  ;;  %1326 = vmatprep.subr.mxu0 %v451_v20  ;;  %v446_v26 = vld [vmem:[#allocation5 + $0xb40] sm:$0xff] }
  0x94   :  { %v575_v25 = vld [vmem:[#allocation5 + $0xf48] sm:$0xff]  ;;  %1403 = vmatprep.subr.mxu1 %v579_v21  ;;  %v574_v27 = vld [vmem:[#allocation5 + $0xf40] sm:$0xff]  ;;  %1327 = vmatpush2.msra.mxu0 %v450_v22 }
  0x95   :  { %1404 = vmatpush2.msra.mxu1 %v578_v23  ;;  %v443_v28 = vld [vmem:[#allocation5 + $0xb28] sm:$0xff]  ;;  %1328 = vmatprep.subr.mxu0 %v447_v24  ;;  %v442_v30 = vld [vmem:[#allocation5 + $0xb20] sm:$0xff]  ;;  %v77_v24 = vld [vmem:[#allocation2 + $0xb8] sm:$0xff] }
  0x96   :  { %v571_v29 = vld [vmem:[#allocation5 + $0xf28] sm:$0xff]  ;;  %1405 = vmatprep.subr.mxu1 %v575_v25  ;;  %v570_v31 = vld [vmem:[#allocation5 + $0xf20] sm:$0xff]  ;;  %1329 = vmatpush2.msra.mxu0 %v446_v26 }
  0x97   :  { %1406 = vmatpush2.msra.mxu1 %v574_v27  ;;  %v439_v32 = vld [vmem:[#allocation5 + $0xb08] sm:$0xff]  ;;  %1330 = vmatprep.subr.mxu0 %v443_v28  ;;  %v438_v34 = vld [vmem:[#allocation5 + $0xb00] sm:$0xff]  ;;  %v76_v28 = vld [vmem:[#allocation2 + $0xb0] sm:$0xff] }
  0x98   :  { %v567_v33 = vld [vmem:[#allocation5 + $0xf08] sm:$0xff]  ;;  %1407 = vmatprep.subr.mxu1 %v571_v29  ;;  %v566_v35 = vld [vmem:[#allocation5 + $0xf00] sm:$0xff]  ;;  %1331 = vmatpush2.msra.mxu0 %v442_v30 }
  0x99   :  { %1408 = vmatpush2.msra.mxu1 %v570_v31  ;;  %v435_v36 = vld [vmem:[#allocation5 + $0xae8] sm:$0xff]  ;;  %1332 = vmatprep.subr.mxu0 %v439_v32  ;;  %v434_v38 = vld [vmem:[#allocation5 + $0xae0] sm:$0xff] }
  0x9a   :  { %v563_v37 = vld [vmem:[#allocation5 + $0xee8] sm:$0xff]  ;;  %1409 = vmatprep.subr.mxu1 %v567_v33  ;;  %v562_v39 = vld [vmem:[#allocation5 + $0xee0] sm:$0xff]  ;;  %1333 = vmatpush2.msra.mxu0 %v438_v34 }
  0x9b   :  { %1410 = vmatpush2.msra.mxu1 %v566_v35  ;;  %v431_v40 = vld [vmem:[#allocation5 + $0xac8] sm:$0xff]  ;;  %1334 = vmatprep.subr.mxu0 %v435_v36  ;;  %v430_v42 = vld [vmem:[#allocation5 + $0xac0] sm:$0xff] }
  0x9c   :  { %v559_v41 = vld [vmem:[#allocation5 + $0xec8] sm:$0xff]  ;;  %1411 = vmatprep.subr.mxu1 %v563_v37  ;;  %v558_v43 = vld [vmem:[#allocation5 + $0xec0] sm:$0xff]  ;;  %1335 = vmatpush2.msra.mxu0 %v434_v38 }
  0x9d   :  { %1412 = vmatpush2.msra.mxu1 %v562_v39  ;;  %v427_v44 = vld [vmem:[#allocation5 + $0xaa8] sm:$0xff]  ;;  %1336 = vmatprep.subr.mxu0 %v431_v40  ;;  %v426_v46 = vld [vmem:[#allocation5 + $0xaa0] sm:$0xff] }
  0x9e   :  { %v555_v45 = vld [vmem:[#allocation5 + $0xea8] sm:$0xff]  ;;  %1413 = vmatprep.subr.mxu1 %v559_v41  ;;  %v554_v47 = vld [vmem:[#allocation5 + $0xea0] sm:$0xff]  ;;  %1337 = vmatpush2.msra.mxu0 %v430_v42 }
  0x9f   :  { %1414 = vmatpush2.msra.mxu1 %v558_v43  ;;  %v423_v48 = vld [vmem:[#allocation5 + $0xa88] sm:$0xff]  ;;  %1338 = vmatprep.subr.mxu0 %v427_v44  ;;  %v422_v50 = vld [vmem:[#allocation5 + $0xa80] sm:$0xff] }
  0xa0   :  { %v551_v49 = vld [vmem:[#allocation5 + $0xe88] sm:$0xff]  ;;  %1415 = vmatprep.subr.mxu1 %v555_v45  ;;  %v550_v51 = vld [vmem:[#allocation5 + $0xe80] sm:$0xff]  ;;  %1339 = vmatpush2.msra.mxu0 %v426_v46 }
  0xa1   :  { %1416 = vmatpush2.msra.mxu1 %v554_v47  ;;  %v419_v52 = vld [vmem:[#allocation5 + $0xa68] sm:$0xff]  ;;  %1340 = vmatprep.subr.mxu0 %v423_v48  ;;  %v418_v54 = vld [vmem:[#allocation5 + $0xa60] sm:$0xff] }
  0xa2   :  { %v547_v53 = vld [vmem:[#allocation5 + $0xe68] sm:$0xff]  ;;  %1417 = vmatprep.subr.mxu1 %v551_v49  ;;  %v546_v55 = vld [vmem:[#allocation5 + $0xe60] sm:$0xff]  ;;  %1341 = vmatpush2.msra.mxu0 %v422_v50 }
  0xa3   :  { %1418 = vmatpush2.msra.mxu1 %v550_v51  ;;  %v71_v56 = vld [vmem:[#allocation2 + $0x88] sm:$0xff]  ;;  %1342 = vmatprep.subr.mxu0 %v419_v52  ;;  %v70_v59 = vld [vmem:[#allocation2 + $0x80] sm:$0xff] }
  0xa4   :  { %v415_v57 = vld [vmem:[#allocation5 + $0xa48] sm:$0xff]  ;;  %1419 = vmatprep.subr.mxu1 %v547_v53  ;;  %1343 = vmatpush2.msra.mxu0 %v418_v54  ;;  %v414_v60 = vld [vmem:[#allocation5 + $0xa40] sm:$0xff] }
  0xa5   :  { %v543_v58 = vld [vmem:[#allocation5 + $0xe48] sm:$0xff]  ;;  %1420 = vmatpush2.msra.mxu1 %v546_v55  ;;  %v542_v61 = vld [vmem:[#allocation5 + $0xe40] sm:$0xff]  ;;  %1202 = vmatprep.mubr.f32.mxu0 %v71_v56 }
  0xa6   :  { %1344 = vmatprep.subr.mxu0 %v415_v57  ;;  %v411_v63 = vld [vmem:[#allocation5 + $0xa28] sm:$0xff]  ;;  %1421 = vmatprep.subr.mxu1 %v543_v58  ;;  %v410_v2 = vld [vmem:[#allocation5 + $0xa20] sm:$0xff] }
  0xa7   :  { %1203 = vmatmul.mubr.f32.gmra.mxu0 %v70_v59  ;;  %v539_v0 = vld [vmem:[#allocation5 + $0xe28] sm:$0xff]  ;;  %1422 = vmatpush2.msra.mxu1 %v542_v61  ;;  %v538_v3 = vld [vmem:[#allocation5 + $0xe20] sm:$0xff] }
  0xa8   :  { %1345 = vmatpush2.msra.mxu0 %v414_v60  ;;  %1279 = vmatprep.mubr.f32.mxu1 %v73_v62  ;;  %v407_v4 = vld [vmem:[#allocation5 + $0xa08] sm:$0xff]  ;;  %v406_v6 = vld [vmem:[#allocation5 + $0xa00] sm:$0xff] }
  0xa9   :  { %1346 = vmatprep.subr.mxu0 %v411_v63  ;;  %v535_v5 = vld [vmem:[#allocation5 + $0xe08] sm:$0xff]  ;;  %1423 = vmatprep.subr.mxu1 %v539_v0  ;;  %v534_v8 = vld [vmem:[#allocation5 + $0xe00] sm:$0xff] }
  0xaa   :  { %1280 = vmatmul.mubr.f32.gmra.mxu1 %v72_v1  ;;  %v59_v7 = vld [vmem:[#allocation2 + $0x28] sm:$0xff]  ;;  %1347 = vmatpush2.msra.mxu0 %v410_v2  ;;  %v58_v9 = vld [vmem:[#allocation2 + $0x20] sm:$0xff] }
  0xab   :  { %1424 = vmatpush2.msra.mxu1 %v538_v3  ;;  %1348 = vmatprep.subr.mxu0 %v407_v4  ;;  %v659_v11 = vld [vmem:[#allocation5 + $0x11e8] sm:$0xff]  ;;  %v658_v14 = vld [vmem:[#allocation5 + $0x11e0] sm:$0xff] }
  0xac   :  { %1425 = vmatprep.subr.mxu1 %v535_v5  ;;  %1349 = vmatpush2.msra.mxu0 %v406_v6  ;;  %v787_v12 = vld [vmem:[#allocation5 + $0x15e8] sm:$0xff]  ;;  %v786_v15 = vld [vmem:[#allocation5 + $0x15e0] sm:$0xff] }
  0xad   :  { %1350 = vmatprep.mubr.f32.mxu0 %v59_v7  ;;  %1426 = vmatpush2.msra.mxu1 %v534_v8  ;;  %v655_v16 = vld [vmem:[#allocation5 + $0x11c8] sm:$0xff]  ;;  %v654_v19 = vld [vmem:[#allocation5 + $0x11c0] sm:$0xff] }
  0xae   :  { %1351 = vmatmul.mubr.f32.vlgmr.msra.gmra.mxu0 %v58_v9  ;;  %1427 = vmatprep.mubr.f32.mxu1 %v61_v10  ;;  %v783_v17 = vld [vmem:[#allocation5 + $0x15c8] sm:$0xff]  ;;  %v782_v20 = vld [vmem:[#allocation5 + $0x15c0] sm:$0xff] }
  0xaf   :  { %1440 = vmatprep.subr.mxu0 %v659_v11  ;;  %1517 = vmatprep.subr.mxu1 %v787_v12  ;;  %v75_v18 = vld [vmem:[#allocation2 + $0xa8] sm:$0xff]  ;;  %v74_v21 = vld [vmem:[#allocation2 + $0xa0] sm:$0xff] }
  0xb0   :  { %1428 = vmatmul.mubr.f32.vlgmr.msra.gmra.mxu1 %v60_v13  ;;  %1441 = vmatpush1.msra.mxu0 %v658_v14  ;;  %v651_v22 = vld [vmem:[#allocation5 + $0x11a8] sm:$0xff]  ;;  %v650_v25 = vld [vmem:[#allocation5 + $0x11a0] sm:$0xff] }
  0xb1   :  { %1518 = vmatpush1.msra.mxu1 %v786_v15  ;;  %1442 = vmatprep.subr.mxu0 %v655_v16  ;;  %v779_v23 = vld [vmem:[#allocation5 + $0x15a8] sm:$0xff]  ;;  %v778_v26 = vld [vmem:[#allocation5 + $0x15a0] sm:$0xff] }
  0xb2   :  { %1519 = vmatprep.subr.mxu1 %v783_v17  ;;  %1356 = vmatprep.mubr.f32.mxu0 %v75_v18  ;;  %v647_v27 = vld [vmem:[#allocation5 + $0x1188] sm:$0xff]  ;;  %v646_v30 = vld [vmem:[#allocation5 + $0x1180] sm:$0xff] }
  0xb3   :  { %1443 = vmatpush1.msra.mxu0 %v654_v19  ;;  %1520 = vmatpush1.msra.mxu1 %v782_v20  ;;  %v775_v29 = vld [vmem:[#allocation5 + $0x1588] sm:$0xff]  ;;  %v774_v31 = vld [vmem:[#allocation5 + $0x1580] sm:$0xff] }
  0xb4   :  { %1357 = vmatmul.mubr.f32.gmra.mxu0 %v74_v21  ;;  %1444 = vmatprep.subr.mxu0 %v651_v22  ;;  %v643_v32 = vld [vmem:[#allocation5 + $0x1168] sm:$0xff]  ;;  %v642_v34 = vld [vmem:[#allocation5 + $0x1160] sm:$0xff] }
  0xb5   :  { %1521 = vmatprep.subr.mxu1 %v779_v23  ;;  %1433 = vmatprep.mubr.f32.mxu1 %v77_v24  ;;  %v771_v33 = vld [vmem:[#allocation5 + $0x1568] sm:$0xff]  ;;  %v770_v35 = vld [vmem:[#allocation5 + $0x1560] sm:$0xff] }
  0xb6   :  { %1445 = vmatpush1.msra.mxu0 %v650_v25  ;;  %1522 = vmatpush1.msra.mxu1 %v778_v26  ;;  %v639_v36 = vld [vmem:[#allocation5 + $0x1148] sm:$0xff]  ;;  %v638_v38 = vld [vmem:[#allocation5 + $0x1140] sm:$0xff] }
  0xb7   :  { %1446 = vmatprep.subr.mxu0 %v647_v27  ;;  %1434 = vmatmul.mubr.f32.gmra.mxu1 %v76_v28  ;;  %v767_v37 = vld [vmem:[#allocation5 + $0x1548] sm:$0xff]  ;;  %v766_v39 = vld [vmem:[#allocation5 + $0x1540] sm:$0xff] }
  0xb8   :  { %1523 = vmatprep.subr.mxu1 %v775_v29  ;;  %1447 = vmatpush1.msra.mxu0 %v646_v30  ;;  %v635_v40 = vld [vmem:[#allocation5 + $0x1128] sm:$0xff]  ;;  %v634_v42 = vld [vmem:[#allocation5 + $0x1120] sm:$0xff] }
  0xb9   :  { %1524 = vmatpush1.msra.mxu1 %v774_v31  ;;  %1448 = vmatprep.subr.mxu0 %v643_v32  ;;  %v763_v41 = vld [vmem:[#allocation5 + $0x1528] sm:$0xff]  ;;  %v762_v43 = vld [vmem:[#allocation5 + $0x1520] sm:$0xff] }
  0xba   :  { %1525 = vmatprep.subr.mxu1 %v771_v33  ;;  %1449 = vmatpush1.msra.mxu0 %v642_v34  ;;  %v631_v44 = vld [vmem:[#allocation5 + $0x1108] sm:$0xff]  ;;  %v630_v46 = vld [vmem:[#allocation5 + $0x1100] sm:$0xff] }
  0xbb   :  { %1526 = vmatpush1.msra.mxu1 %v770_v35  ;;  %1450 = vmatprep.subr.mxu0 %v639_v36  ;;  %v759_v45 = vld [vmem:[#allocation5 + $0x1508] sm:$0xff]  ;;  %v758_v47 = vld [vmem:[#allocation5 + $0x1500] sm:$0xff] }
  0xbc   :  { %1527 = vmatprep.subr.mxu1 %v767_v37  ;;  %1451 = vmatpush1.msra.mxu0 %v638_v38  ;;  %v627_v48 = vld [vmem:[#allocation5 + $0x10e8] sm:$0xff]  ;;  %v626_v50 = vld [vmem:[#allocation5 + $0x10e0] sm:$0xff] }
  0xbd   :  { %1528 = vmatpush1.msra.mxu1 %v766_v39  ;;  %1452 = vmatprep.subr.mxu0 %v635_v40  ;;  %v755_v49 = vld [vmem:[#allocation5 + $0x14e8] sm:$0xff]  ;;  %v754_v51 = vld [vmem:[#allocation5 + $0x14e0] sm:$0xff] }
  0xbe   :  { %1529 = vmatprep.subr.mxu1 %v763_v41  ;;  %1453 = vmatpush1.msra.mxu0 %v634_v42  ;;  %v623_v52 = vld [vmem:[#allocation5 + $0x10c8] sm:$0xff]  ;;  %v622_v54 = vld [vmem:[#allocation5 + $0x10c0] sm:$0xff] }
  0xbf   :  { %1530 = vmatpush1.msra.mxu1 %v762_v43  ;;  %1454 = vmatprep.subr.mxu0 %v631_v44  ;;  %v751_v53 = vld [vmem:[#allocation5 + $0x14c8] sm:$0xff]  ;;  %v750_v55 = vld [vmem:[#allocation5 + $0x14c0] sm:$0xff] }
  0xc0   :  { %1531 = vmatprep.subr.mxu1 %v759_v45  ;;  %1455 = vmatpush1.msra.mxu0 %v630_v46  ;;  %v619_v56 = vld [vmem:[#allocation5 + $0x10a8] sm:$0xff]  ;;  %v618_v58 = vld [vmem:[#allocation5 + $0x10a0] sm:$0xff] }
  0xc1   :  { %1532 = vmatpush1.msra.mxu1 %v758_v47  ;;  %1456 = vmatprep.subr.mxu0 %v627_v48  ;;  %v747_v57 = vld [vmem:[#allocation5 + $0x14a8] sm:$0xff]  ;;  %v746_v59 = vld [vmem:[#allocation5 + $0x14a0] sm:$0xff] }
  0xc2   :  { %1533 = vmatprep.subr.mxu1 %v755_v49  ;;  %1457 = vmatpush1.msra.mxu0 %v626_v50  ;;  %v615_v60 = vld [vmem:[#allocation5 + $0x1088] sm:$0xff]  ;;  %v614_v62 = vld [vmem:[#allocation5 + $0x1080] sm:$0xff] }
  0xc3   :  { %1534 = vmatpush1.msra.mxu1 %v754_v51  ;;  %1458 = vmatprep.subr.mxu0 %v623_v52  ;;  %v743_v61 = vld [vmem:[#allocation5 + $0x1488] sm:$0xff]  ;;  %v742_v63 = vld [vmem:[#allocation5 + $0x1480] sm:$0xff] }
  0xc4   :  { %1535 = vmatprep.subr.mxu1 %v751_v53  ;;  %1459 = vmatpush1.msra.mxu0 %v622_v54  ;;  %v611_v0 = vld [vmem:[#allocation5 + $0x1068] sm:$0xff]  ;;  %v610_v2 = vld [vmem:[#allocation5 + $0x1060] sm:$0xff] }
  0xc5   :  { %1536 = vmatpush1.msra.mxu1 %v750_v55  ;;  %1460 = vmatprep.subr.mxu0 %v619_v56  ;;  %v739_v1 = vld [vmem:[#allocation5 + $0x1468] sm:$0xff]  ;;  %v738_v3 = vld [vmem:[#allocation5 + $0x1460] sm:$0xff] }
  0xc6   :  { %1537 = vmatprep.subr.mxu1 %v747_v57  ;;  %1461 = vmatpush1.msra.mxu0 %v618_v58  ;;  %v607_v4 = vld [vmem:[#allocation5 + $0x1048] sm:$0xff]  ;;  %v606_v6 = vld [vmem:[#allocation5 + $0x1040] sm:$0xff] }
  0xc7   :  { %1538 = vmatpush1.msra.mxu1 %v746_v59  ;;  %1462 = vmatprep.subr.mxu0 %v615_v60  ;;  %v735_v5 = vld [vmem:[#allocation5 + $0x1448] sm:$0xff]  ;;  %v734_v7 = vld [vmem:[#allocation5 + $0x1440] sm:$0xff] }
  0xc8   :  { %1539 = vmatprep.subr.mxu1 %v743_v61  ;;  %1463 = vmatpush1.msra.mxu0 %v614_v62  ;;  %v603_v8 = vld [vmem:[#allocation5 + $0x1028] sm:$0xff]  ;;  %v602_v10 = vld [vmem:[#allocation5 + $0x1020] sm:$0xff] }
  0xc9   :  { %1540 = vmatpush1.msra.mxu1 %v742_v63  ;;  %1464 = vmatprep.subr.mxu0 %v611_v0  ;;  %v731_v9 = vld [vmem:[#allocation5 + $0x1428] sm:$0xff]  ;;  %v730_v11 = vld [vmem:[#allocation5 + $0x1420] sm:$0xff] }
  0xca   :  { %1541 = vmatprep.subr.mxu1 %v739_v1  ;;  %1465 = vmatpush1.msra.mxu0 %v610_v2  ;;  %v599_v12 = vld [vmem:[#allocation5 + $0x1008] sm:$0xff]  ;;  %v598_v14 = vld [vmem:[#allocation5 + $0x1000] sm:$0xff] }
  0xcb   :  { %1542 = vmatpush1.msra.mxu1 %v738_v3  ;;  %1466 = vmatprep.subr.mxu0 %v607_v4  ;;  %v727_v13 = vld [vmem:[#allocation5 + $0x1408] sm:$0xff]  ;;  %v726_v15 = vld [vmem:[#allocation5 + $0x1400] sm:$0xff] }
  0xcc   :  { %1543 = vmatprep.subr.mxu1 %v735_v5  ;;  %1467 = vmatpush1.msra.mxu0 %v606_v6  ;;  %v723_v16 = vld [vmem:[#allocation5 + $0x13e8] sm:$0xff]  ;;  %v722_v18 = vld [vmem:[#allocation5 + $0x13e0] sm:$0xff] }
  0xcd   :  { %1544 = vmatpush1.msra.mxu1 %v734_v7  ;;  %1468 = vmatprep.subr.mxu0 %v603_v8  ;;  %v851_v17 = vld [vmem:[#allocation5 + $0x17e8] sm:$0xff]  ;;  %v850_v19 = vld [vmem:[#allocation5 + $0x17e0] sm:$0xff] }
  0xce   :  { %1545 = vmatprep.subr.mxu1 %v731_v9  ;;  %1469 = vmatpush1.msra.mxu0 %v602_v10  ;;  %v719_v20 = vld [vmem:[#allocation5 + $0x13c8] sm:$0xff]  ;;  %v718_v22 = vld [vmem:[#allocation5 + $0x13c0] sm:$0xff] }
  0xcf   :  { %1546 = vmatpush1.msra.mxu1 %v730_v11  ;;  %1470 = vmatprep.subr.mxu0 %v599_v12  ;;  %v847_v21 = vld [vmem:[#allocation5 + $0x17c8] sm:$0xff]  ;;  %v846_v23 = vld [vmem:[#allocation5 + $0x17c0] sm:$0xff] }
  0xd0   :  { %1547 = vmatprep.subr.mxu1 %v727_v13  ;;  %1471 = vmatpush1.msra.mxu0 %v598_v14  ;;  %v715_v24 = vld [vmem:[#allocation5 + $0x13a8] sm:$0xff]  ;;  %v714_v26 = vld [vmem:[#allocation5 + $0x13a0] sm:$0xff] }
  0xd1   :  { %1548 = vmatpush1.msra.mxu1 %v726_v15  ;;  %1472 = vmatprep.subr.mxu0 %v723_v16  ;;  %v843_v25 = vld [vmem:[#allocation5 + $0x17a8] sm:$0xff]  ;;  %v842_v27 = vld [vmem:[#allocation5 + $0x17a0] sm:$0xff] }
  0xd2   :  { %1549 = vmatprep.subr.mxu1 %v851_v17  ;;  %1473 = vmatpush2.msra.mxu0 %v722_v18  ;;  %v711_v28 = vld [vmem:[#allocation5 + $0x1388] sm:$0xff]  ;;  %v710_v30 = vld [vmem:[#allocation5 + $0x1380] sm:$0xff]  ;;  %v65_v18 = vld [vmem:[#allocation2 + $0x58] sm:$0xff] }
  0xd3   :  { %1550 = vmatpush2.msra.mxu1 %v850_v19  ;;  %1474 = vmatprep.subr.mxu0 %v719_v20  ;;  %v839_v29 = vld [vmem:[#allocation5 + $0x1788] sm:$0xff]  ;;  %v838_v31 = vld [vmem:[#allocation5 + $0x1780] sm:$0xff] }
  0xd4   :  { %1551 = vmatprep.subr.mxu1 %v847_v21  ;;  %1475 = vmatpush2.msra.mxu0 %v718_v22  ;;  %v707_v32 = vld [vmem:[#allocation5 + $0x1368] sm:$0xff]  ;;  %v706_v34 = vld [vmem:[#allocation5 + $0x1360] sm:$0xff]  ;;  %v64_v21 = vld [vmem:[#allocation2 + $0x50] sm:$0xff] }
  0xd5   :  { %1552 = vmatpush2.msra.mxu1 %v846_v23  ;;  %1476 = vmatprep.subr.mxu0 %v715_v24  ;;  %v835_v33 = vld [vmem:[#allocation5 + $0x1768] sm:$0xff]  ;;  %v834_v35 = vld [vmem:[#allocation5 + $0x1760] sm:$0xff] }
  0xd6   :  { %1553 = vmatprep.subr.mxu1 %v843_v25  ;;  %1477 = vmatpush2.msra.mxu0 %v714_v26  ;;  %v703_v36 = vld [vmem:[#allocation5 + $0x1348] sm:$0xff]  ;;  %v702_v38 = vld [vmem:[#allocation5 + $0x1340] sm:$0xff] }
  0xd7   :  { %1554 = vmatpush2.msra.mxu1 %v842_v27  ;;  %1478 = vmatprep.subr.mxu0 %v711_v28  ;;  %v831_v37 = vld [vmem:[#allocation5 + $0x1748] sm:$0xff]  ;;  %v830_v39 = vld [vmem:[#allocation5 + $0x1740] sm:$0xff] }
  0xd8   :  { %1555 = vmatprep.subr.mxu1 %v839_v29  ;;  %1479 = vmatpush2.msra.mxu0 %v710_v30  ;;  %v699_v40 = vld [vmem:[#allocation5 + $0x1328] sm:$0xff]  ;;  %v698_v42 = vld [vmem:[#allocation5 + $0x1320] sm:$0xff] }
  0xd9   :  { %1556 = vmatpush2.msra.mxu1 %v838_v31  ;;  %1480 = vmatprep.subr.mxu0 %v707_v32  ;;  %v827_v41 = vld [vmem:[#allocation5 + $0x1728] sm:$0xff]  ;;  %v826_v43 = vld [vmem:[#allocation5 + $0x1720] sm:$0xff]  ;;  %v81_v32 = vld [vmem:[#allocation2 + $0xd8] sm:$0xff] }
  0xda   :  { %1557 = vmatprep.subr.mxu1 %v835_v33  ;;  %1481 = vmatpush2.msra.mxu0 %v706_v34  ;;  %v695_v44 = vld [vmem:[#allocation5 + $0x1308] sm:$0xff]  ;;  %v694_v46 = vld [vmem:[#allocation5 + $0x1300] sm:$0xff] }
  0xdb   :  { %1558 = vmatpush2.msra.mxu1 %v834_v35  ;;  %1482 = vmatprep.subr.mxu0 %v703_v36  ;;  %v823_v45 = vld [vmem:[#allocation5 + $0x1708] sm:$0xff]  ;;  %v822_v47 = vld [vmem:[#allocation5 + $0x1700] sm:$0xff]  ;;  %v80_v36 = vld [vmem:[#allocation2 + $0xd0] sm:$0xff] }
  0xdc   :  { %1559 = vmatprep.subr.mxu1 %v831_v37  ;;  %1483 = vmatpush2.msra.mxu0 %v702_v38  ;;  %v691_v48 = vld [vmem:[#allocation5 + $0x12e8] sm:$0xff]  ;;  %v690_v50 = vld [vmem:[#allocation5 + $0x12e0] sm:$0xff] }
  0xdd   :  { %1560 = vmatpush2.msra.mxu1 %v830_v39  ;;  %1484 = vmatprep.subr.mxu0 %v699_v40  ;;  %v819_v49 = vld [vmem:[#allocation5 + $0x16e8] sm:$0xff]  ;;  %v818_v51 = vld [vmem:[#allocation5 + $0x16e0] sm:$0xff] }
  0xde   :  { %1561 = vmatprep.subr.mxu1 %v827_v41  ;;  %1485 = vmatpush2.msra.mxu0 %v698_v42  ;;  %v687_v52 = vld [vmem:[#allocation5 + $0x12c8] sm:$0xff]  ;;  %v686_v54 = vld [vmem:[#allocation5 + $0x12c0] sm:$0xff] }
  0xdf   :  { %1562 = vmatpush2.msra.mxu1 %v826_v43  ;;  %1486 = vmatprep.subr.mxu0 %v695_v44  ;;  %v815_v53 = vld [vmem:[#allocation5 + $0x16c8] sm:$0xff]  ;;  %v814_v55 = vld [vmem:[#allocation5 + $0x16c0] sm:$0xff] }
  0xe0   :  { %1563 = vmatprep.subr.mxu1 %v823_v45  ;;  %1487 = vmatpush2.msra.mxu0 %v694_v46  ;;  %v683_v56 = vld [vmem:[#allocation5 + $0x12a8] sm:$0xff]  ;;  %v682_v58 = vld [vmem:[#allocation5 + $0x12a0] sm:$0xff] }
  0xe1   :  { %1564 = vmatpush2.msra.mxu1 %v822_v47  ;;  %1488 = vmatprep.subr.mxu0 %v691_v48  ;;  %v811_v57 = vld [vmem:[#allocation5 + $0x16a8] sm:$0xff]  ;;  %v810_v59 = vld [vmem:[#allocation5 + $0x16a0] sm:$0xff] }
  0xe2   :  { %1565 = vmatprep.subr.mxu1 %v819_v49  ;;  %1489 = vmatpush2.msra.mxu0 %v690_v50  ;;  %v679_v60 = vld [vmem:[#allocation5 + $0x1288] sm:$0xff]  ;;  %v678_v62 = vld [vmem:[#allocation5 + $0x1280] sm:$0xff] }
  0xe3   :  { %1566 = vmatpush2.msra.mxu1 %v818_v51  ;;  %1490 = vmatprep.subr.mxu0 %v687_v52  ;;  %v807_v61 = vld [vmem:[#allocation5 + $0x1688] sm:$0xff]  ;;  %v806_v63 = vld [vmem:[#allocation5 + $0x1680] sm:$0xff] }
  0xe4   :  { %1567 = vmatprep.subr.mxu1 %v815_v53  ;;  %1491 = vmatpush2.msra.mxu0 %v686_v54  ;;  %v675_v0 = vld [vmem:[#allocation5 + $0x1268] sm:$0xff]  ;;  %v674_v2 = vld [vmem:[#allocation5 + $0x1260] sm:$0xff] }
  0xe5   :  { %1568 = vmatpush2.msra.mxu1 %v814_v55  ;;  %1492 = vmatprep.subr.mxu0 %v683_v56  ;;  %v803_v1 = vld [vmem:[#allocation5 + $0x1668] sm:$0xff]  ;;  %v802_v3 = vld [vmem:[#allocation5 + $0x1660] sm:$0xff] }
  0xe6   :  { %1569 = vmatprep.subr.mxu1 %v811_v57  ;;  %1493 = vmatpush2.msra.mxu0 %v682_v58  ;;  %v671_v4 = vld [vmem:[#allocation5 + $0x1248] sm:$0xff]  ;;  %v670_v6 = vld [vmem:[#allocation5 + $0x1240] sm:$0xff] }
  0xe7   :  { %1570 = vmatpush2.msra.mxu1 %v810_v59  ;;  %1494 = vmatprep.subr.mxu0 %v679_v60  ;;  %v799_v5 = vld [vmem:[#allocation5 + $0x1648] sm:$0xff]  ;;  %v798_v7 = vld [vmem:[#allocation5 + $0x1640] sm:$0xff] }
  0xe8   :  { %1571 = vmatprep.subr.mxu1 %v807_v61  ;;  %1495 = vmatpush2.msra.mxu0 %v678_v62  ;;  %v667_v8 = vld [vmem:[#allocation5 + $0x1228] sm:$0xff]  ;;  %v666_v10 = vld [vmem:[#allocation5 + $0x1220] sm:$0xff] }
  0xe9   :  { %1572 = vmatpush2.msra.mxu1 %v806_v63  ;;  %1496 = vmatprep.subr.mxu0 %v675_v0  ;;  %v795_v9 = vld [vmem:[#allocation5 + $0x1628] sm:$0xff]  ;;  %v794_v11 = vld [vmem:[#allocation5 + $0x1620] sm:$0xff] }
  0xea   :  { %1573 = vmatprep.subr.mxu1 %v803_v1  ;;  %1497 = vmatpush2.msra.mxu0 %v674_v2  ;;  %v663_v12 = vld [vmem:[#allocation5 + $0x1208] sm:$0xff]  ;;  %v662_v14 = vld [vmem:[#allocation5 + $0x1200] sm:$0xff] }
  0xeb   :  { %1574 = vmatpush2.msra.mxu1 %v802_v3  ;;  %1498 = vmatprep.subr.mxu0 %v671_v4  ;;  %v791_v13 = vld [vmem:[#allocation5 + $0x1608] sm:$0xff]  ;;  %v790_v16 = vld [vmem:[#allocation5 + $0x1600] sm:$0xff] }
  0xec   :  { %1575 = vmatprep.subr.mxu1 %v799_v5  ;;  %1499 = vmatpush2.msra.mxu0 %v670_v6  ;;  %v63_v15 = vld [vmem:[#allocation2 + $0x48] sm:$0xff]  ;;  %v62_v17 = vld [vmem:[#allocation2 + $0x40] sm:$0xff] }
  0xed   :  { %1576 = vmatpush2.msra.mxu1 %v798_v7  ;;  %1500 = vmatprep.subr.mxu0 %v667_v8  ;;  %v915_v19 = vld [vmem:[#allocation5 + $0x19e8] sm:$0xff]  ;;  %v914_v22 = vld [vmem:[#allocation5 + $0x19e0] sm:$0xff] }
  0xee   :  { %1577 = vmatprep.subr.mxu1 %v795_v9  ;;  %1501 = vmatpush2.msra.mxu0 %v666_v10  ;;  %v1043_v20 = vld [vmem:[#allocation5 + $0x1de8] sm:$0xff]  ;;  %v1042_v23 = vld [vmem:[#allocation5 + $0x1de0] sm:$0xff] }
  0xef   :  { %1578 = vmatpush2.msra.mxu1 %v794_v11  ;;  %1502 = vmatprep.subr.mxu0 %v663_v12  ;;  %v911_v24 = vld [vmem:[#allocation5 + $0x19c8] sm:$0xff]  ;;  %v910_v27 = vld [vmem:[#allocation5 + $0x19c0] sm:$0xff] }
  0xf0   :  { %1579 = vmatprep.subr.mxu1 %v791_v13  ;;  %1503 = vmatpush2.msra.mxu0 %v662_v14  ;;  %v1039_v25 = vld [vmem:[#allocation5 + $0x1dc8] sm:$0xff]  ;;  %v1038_v28 = vld [vmem:[#allocation5 + $0x1dc0] sm:$0xff] }
  0xf1   :  { %1504 = vmatprep.mubr.f32.mxu0 %v63_v15  ;;  %1580 = vmatpush2.msra.mxu1 %v790_v16  ;;  %v79_v26 = vld [vmem:[#allocation2 + $0xc8] sm:$0xff]  ;;  %v78_v29 = vld [vmem:[#allocation2 + $0xc0] sm:$0xff] }
  0xf2   :  { %1505 = vmatmul.mubr.f32.vlgmr.msra.gmra.mxu0 %v62_v17  ;;  %1581 = vmatprep.mubr.f32.mxu1 %v65_v18  ;;  %v907_v30 = vld [vmem:[#allocation5 + $0x19a8] sm:$0xff]  ;;  %v906_v33 = vld [vmem:[#allocation5 + $0x19a0] sm:$0xff] }
  0xf3   :  { %1594 = vmatprep.subr.mxu0 %v915_v19  ;;  %1671 = vmatprep.subr.mxu1 %v1043_v20  ;;  %v1035_v31 = vld [vmem:[#allocation5 + $0x1da8] sm:$0xff]  ;;  %v1034_v34 = vld [vmem:[#allocation5 + $0x1da0] sm:$0xff] }
  0xf4   :  { %1582 = vmatmul.mubr.f32.vlgmr.msra.gmra.mxu1 %v64_v21  ;;  %1595 = vmatpush1.msra.mxu0 %v914_v22  ;;  %v903_v35 = vld [vmem:[#allocation5 + $0x1988] sm:$0xff]  ;;  %v902_v38 = vld [vmem:[#allocation5 + $0x1980] sm:$0xff] }
  0xf5   :  { %1672 = vmatpush1.msra.mxu1 %v1042_v23  ;;  %1596 = vmatprep.subr.mxu0 %v911_v24  ;;  %v1031_v37 = vld [vmem:[#allocation5 + $0x1d88] sm:$0xff]  ;;  %v1030_v39 = vld [vmem:[#allocation5 + $0x1d80] sm:$0xff] }
  0xf6   :  { %1673 = vmatprep.subr.mxu1 %v1039_v25  ;;  %1510 = vmatprep.mubr.f32.mxu0 %v79_v26  ;;  %v899_v40 = vld [vmem:[#allocation5 + $0x1968] sm:$0xff]  ;;  %v898_v42 = vld [vmem:[#allocation5 + $0x1960] sm:$0xff] }
  0xf7   :  { %1597 = vmatpush1.msra.mxu0 %v910_v27  ;;  %1674 = vmatpush1.msra.mxu1 %v1038_v28  ;;  %v1027_v41 = vld [vmem:[#allocation5 + $0x1d68] sm:$0xff]  ;;  %v1026_v43 = vld [vmem:[#allocation5 + $0x1d60] sm:$0xff] }
  0xf8   :  { %1511 = vmatmul.mubr.f32.gmra.mxu0 %v78_v29  ;;  %1598 = vmatprep.subr.mxu0 %v907_v30  ;;  %v895_v44 = vld [vmem:[#allocation5 + $0x1948] sm:$0xff]  ;;  %v894_v46 = vld [vmem:[#allocation5 + $0x1940] sm:$0xff] }
  0xf9   :  { %1675 = vmatprep.subr.mxu1 %v1035_v31  ;;  %1587 = vmatprep.mubr.f32.mxu1 %v81_v32  ;;  %v1023_v45 = vld [vmem:[#allocation5 + $0x1d48] sm:$0xff]  ;;  %v1022_v47 = vld [vmem:[#allocation5 + $0x1d40] sm:$0xff] }
  0xfa   :  { %1599 = vmatpush1.msra.mxu0 %v906_v33  ;;  %1676 = vmatpush1.msra.mxu1 %v1034_v34  ;;  %v891_v48 = vld [vmem:[#allocation5 + $0x1928] sm:$0xff]  ;;  %v890_v50 = vld [vmem:[#allocation5 + $0x1920] sm:$0xff] }
  0xfb   :  { %1600 = vmatprep.subr.mxu0 %v903_v35  ;;  %1588 = vmatmul.mubr.f32.gmra.mxu1 %v80_v36  ;;  %v1019_v49 = vld [vmem:[#allocation5 + $0x1d28] sm:$0xff]  ;;  %v1018_v51 = vld [vmem:[#allocation5 + $0x1d20] sm:$0xff] }
  0xfc   :  { %1677 = vmatprep.subr.mxu1 %v1031_v37  ;;  %1601 = vmatpush1.msra.mxu0 %v902_v38  ;;  %v887_v52 = vld [vmem:[#allocation5 + $0x1908] sm:$0xff]  ;;  %v886_v54 = vld [vmem:[#allocation5 + $0x1900] sm:$0xff] }
  0xfd   :  { %1678 = vmatpush1.msra.mxu1 %v1030_v39  ;;  %1602 = vmatprep.subr.mxu0 %v899_v40  ;;  %v1015_v53 = vld [vmem:[#allocation5 + $0x1d08] sm:$0xff]  ;;  %v1014_v55 = vld [vmem:[#allocation5 + $0x1d00] sm:$0xff] }
  0xfe   :  { %1679 = vmatprep.subr.mxu1 %v1027_v41  ;;  %1603 = vmatpush1.msra.mxu0 %v898_v42  ;;  %v883_v56 = vld [vmem:[#allocation5 + $0x18e8] sm:$0xff]  ;;  %v882_v58 = vld [vmem:[#allocation5 + $0x18e0] sm:$0xff] }
  0xff   :  { %1680 = vmatpush1.msra.mxu1 %v1026_v43  ;;  %1604 = vmatprep.subr.mxu0 %v895_v44  ;;  %v1011_v57 = vld [vmem:[#allocation5 + $0x1ce8] sm:$0xff]  ;;  %v1010_v59 = vld [vmem:[#allocation5 + $0x1ce0] sm:$0xff] }
 0x100   :  { %1681 = vmatprep.subr.mxu1 %v1023_v45  ;;  %1605 = vmatpush1.msra.mxu0 %v894_v46  ;;  %v879_v60 = vld [vmem:[#allocation5 + $0x18c8] sm:$0xff]  ;;  %v878_v62 = vld [vmem:[#allocation5 + $0x18c0] sm:$0xff] }
 0x101   :  { %1682 = vmatpush1.msra.mxu1 %v1022_v47  ;;  %1606 = vmatprep.subr.mxu0 %v891_v48  ;;  %v1007_v61 = vld [vmem:[#allocation5 + $0x1cc8] sm:$0xff]  ;;  %v1006_v63 = vld [vmem:[#allocation5 + $0x1cc0] sm:$0xff] }
 0x102   :  { %1683 = vmatprep.subr.mxu1 %v1019_v49  ;;  %1607 = vmatpush1.msra.mxu0 %v890_v50  ;;  %v875_v0 = vld [vmem:[#allocation5 + $0x18a8] sm:$0xff]  ;;  %v874_v2 = vld [vmem:[#allocation5 + $0x18a0] sm:$0xff] }
 0x103   :  { %1684 = vmatpush1.msra.mxu1 %v1018_v51  ;;  %1608 = vmatprep.subr.mxu0 %v887_v52  ;;  %v1003_v1 = vld [vmem:[#allocation5 + $0x1ca8] sm:$0xff]  ;;  %v1002_v3 = vld [vmem:[#allocation5 + $0x1ca0] sm:$0xff] }
 0x104   :  { %1685 = vmatprep.subr.mxu1 %v1015_v53  ;;  %1609 = vmatpush1.msra.mxu0 %v886_v54  ;;  %v871_v4 = vld [vmem:[#allocation5 + $0x1888] sm:$0xff]  ;;  %v870_v6 = vld [vmem:[#allocation5 + $0x1880] sm:$0xff] }
 0x105   :  { %1686 = vmatpush1.msra.mxu1 %v1014_v55  ;;  %1610 = vmatprep.subr.mxu0 %v883_v56  ;;  %v999_v5 = vld [vmem:[#allocation5 + $0x1c88] sm:$0xff]  ;;  %v998_v7 = vld [vmem:[#allocation5 + $0x1c80] sm:$0xff] }
 0x106   :  { %1687 = vmatprep.subr.mxu1 %v1011_v57  ;;  %1611 = vmatpush1.msra.mxu0 %v882_v58  ;;  %v867_v8 = vld [vmem:[#allocation5 + $0x1868] sm:$0xff]  ;;  %v866_v10 = vld [vmem:[#allocation5 + $0x1860] sm:$0xff] }
 0x107   :  { %1688 = vmatpush1.msra.mxu1 %v1010_v59  ;;  %1612 = vmatprep.subr.mxu0 %v879_v60  ;;  %v995_v9 = vld [vmem:[#allocation5 + $0x1c68] sm:$0xff]  ;;  %v994_v11 = vld [vmem:[#allocation5 + $0x1c60] sm:$0xff] }
 0x108   :  { %1689 = vmatprep.subr.mxu1 %v1007_v61  ;;  %1613 = vmatpush1.msra.mxu0 %v878_v62  ;;  %v863_v12 = vld [vmem:[#allocation5 + $0x1848] sm:$0xff]  ;;  %v862_v14 = vld [vmem:[#allocation5 + $0x1840] sm:$0xff] }
 0x109   :  { %1690 = vmatpush1.msra.mxu1 %v1006_v63  ;;  %1614 = vmatprep.subr.mxu0 %v875_v0  ;;  %v991_v13 = vld [vmem:[#allocation5 + $0x1c48] sm:$0xff]  ;;  %v990_v15 = vld [vmem:[#allocation5 + $0x1c40] sm:$0xff] }
 0x10a   :  { %1691 = vmatprep.subr.mxu1 %v1003_v1  ;;  %1615 = vmatpush1.msra.mxu0 %v874_v2  ;;  %v859_v16 = vld [vmem:[#allocation5 + $0x1828] sm:$0xff]  ;;  %v858_v18 = vld [vmem:[#allocation5 + $0x1820] sm:$0xff] }
 0x10b   :  { %1692 = vmatpush1.msra.mxu1 %v1002_v3  ;;  %1616 = vmatprep.subr.mxu0 %v871_v4  ;;  %v987_v17 = vld [vmem:[#allocation5 + $0x1c28] sm:$0xff]  ;;  %v986_v19 = vld [vmem:[#allocation5 + $0x1c20] sm:$0xff] }
 0x10c   :  { %1693 = vmatprep.subr.mxu1 %v999_v5  ;;  %1617 = vmatpush1.msra.mxu0 %v870_v6  ;;  %v855_v20 = vld [vmem:[#allocation5 + $0x1808] sm:$0xff]  ;;  %v854_v22 = vld [vmem:[#allocation5 + $0x1800] sm:$0xff] }
 0x10d   :  { %1694 = vmatpush1.msra.mxu1 %v998_v7  ;;  %1618 = vmatprep.subr.mxu0 %v867_v8  ;;  %v983_v21 = vld [vmem:[#allocation5 + $0x1c08] sm:$0xff]  ;;  %v982_v23 = vld [vmem:[#allocation5 + $0x1c00] sm:$0xff] }
 0x10e   :  { %1695 = vmatprep.subr.mxu1 %v995_v9  ;;  %1619 = vmatpush1.msra.mxu0 %v866_v10  ;;  %v979_v24 = vld [vmem:[#allocation5 + $0x1be8] sm:$0xff]  ;;  %v978_v26 = vld [vmem:[#allocation5 + $0x1be0] sm:$0xff] }
 0x10f   :  { %1696 = vmatpush1.msra.mxu1 %v994_v11  ;;  %1620 = vmatprep.subr.mxu0 %v863_v12  ;;  %v1107_v25 = vld [vmem:[#allocation5 + $0x1fe8] sm:$0xff]  ;;  %v1106_v27 = vld [vmem:[#allocation5 + $0x1fe0] sm:$0xff] }
 0x110   :  { %1697 = vmatprep.subr.mxu1 %v991_v13  ;;  %1621 = vmatpush1.msra.mxu0 %v862_v14  ;;  %v975_v28 = vld [vmem:[#allocation5 + $0x1bc8] sm:$0xff]  ;;  %v974_v30 = vld [vmem:[#allocation5 + $0x1bc0] sm:$0xff] }
 0x111   :  { %1698 = vmatpush1.msra.mxu1 %v990_v15  ;;  %1622 = vmatprep.subr.mxu0 %v859_v16  ;;  %v1103_v29 = vld [vmem:[#allocation5 + $0x1fc8] sm:$0xff]  ;;  %v1102_v31 = vld [vmem:[#allocation5 + $0x1fc0] sm:$0xff] }
 0x112   :  { %1699 = vmatprep.subr.mxu1 %v987_v17  ;;  %1623 = vmatpush1.msra.mxu0 %v858_v18  ;;  %v971_v32 = vld [vmem:[#allocation5 + $0x1ba8] sm:$0xff]  ;;  %v970_v34 = vld [vmem:[#allocation5 + $0x1ba0] sm:$0xff] }
 0x113   :  { %1700 = vmatpush1.msra.mxu1 %v986_v19  ;;  %1624 = vmatprep.subr.mxu0 %v855_v20  ;;  %v1099_v33 = vld [vmem:[#allocation5 + $0x1fa8] sm:$0xff]  ;;  %v1098_v35 = vld [vmem:[#allocation5 + $0x1fa0] sm:$0xff] }
 0x114   :  { %1701 = vmatprep.subr.mxu1 %v983_v21  ;;  %1625 = vmatpush1.msra.mxu0 %v854_v22  ;;  %v967_v36 = vld [vmem:[#allocation5 + $0x1b88] sm:$0xff]  ;;  %v966_v38 = vld [vmem:[#allocation5 + $0x1b80] sm:$0xff] }
 0x115   :  { %1702 = vmatpush1.msra.mxu1 %v982_v23  ;;  %1626 = vmatprep.subr.mxu0 %v979_v24  ;;  %v1095_v37 = vld [vmem:[#allocation5 + $0x1f88] sm:$0xff]  ;;  %v1094_v39 = vld [vmem:[#allocation5 + $0x1f80] sm:$0xff] }
 0x116   :  { %1703 = vmatprep.subr.mxu1 %v1107_v25  ;;  %1627 = vmatpush2.msra.mxu0 %v978_v26  ;;  %v963_v40 = vld [vmem:[#allocation5 + $0x1b68] sm:$0xff]  ;;  %v962_v42 = vld [vmem:[#allocation5 + $0x1b60] sm:$0xff]  ;;  %v69_v26 = vld [vmem:[#allocation2 + $0x78] sm:$0xff] }
 0x117   :  { %1704 = vmatpush2.msra.mxu1 %v1106_v27  ;;  %1628 = vmatprep.subr.mxu0 %v975_v28  ;;  %v1091_v41 = vld [vmem:[#allocation5 + $0x1f68] sm:$0xff]  ;;  %v1090_v43 = vld [vmem:[#allocation5 + $0x1f60] sm:$0xff]  ;;  %v149_v27 = vld [vmem:[#allocation5 + $0x1f8] sm:$0xff] }
 0x118   :  { %1705 = vmatprep.subr.mxu1 %v1103_v29  ;;  %1629 = vmatpush2.msra.mxu0 %v974_v30  ;;  %v959_v44 = vld [vmem:[#allocation5 + $0x1b48] sm:$0xff]  ;;  %v958_v46 = vld [vmem:[#allocation5 + $0x1b40] sm:$0xff]  ;;  %v277_v28 = vld [vmem:[#allocation5 + $0x5f8] sm:$0xff] }
 0x119   :  { %1706 = vmatpush2.msra.mxu1 %v1102_v31  ;;  %1630 = vmatprep.subr.mxu0 %v971_v32  ;;  %v1087_v45 = vld [vmem:[#allocation5 + $0x1f48] sm:$0xff]  ;;  %v1086_v47 = vld [vmem:[#allocation5 + $0x1f40] sm:$0xff]  ;;  %v68_v29 = vld [vmem:[#allocation2 + $0x70] sm:$0xff] }
 0x11a   :  { %1707 = vmatprep.subr.mxu1 %v1099_v33  ;;  %1631 = vmatpush2.msra.mxu0 %v970_v34  ;;  %v955_v48 = vld [vmem:[#allocation5 + $0x1b28] sm:$0xff]  ;;  %v954_v50 = vld [vmem:[#allocation5 + $0x1b20] sm:$0xff]  ;;  %v148_v30 = vld [vmem:[#allocation5 + $0x1f0] sm:$0xff] }
 0x11b   :  { %1708 = vmatpush2.msra.mxu1 %v1098_v35  ;;  %1632 = vmatprep.subr.mxu0 %v967_v36  ;;  %v1083_v49 = vld [vmem:[#allocation5 + $0x1f28] sm:$0xff]  ;;  %v1082_v51 = vld [vmem:[#allocation5 + $0x1f20] sm:$0xff]  ;;  %v276_v31 = vld [vmem:[#allocation5 + $0x5f0] sm:$0xff] }
 0x11c   :  { %1709 = vmatprep.subr.mxu1 %v1095_v37  ;;  %1633 = vmatpush2.msra.mxu0 %v966_v38  ;;  %v951_v52 = vld [vmem:[#allocation5 + $0x1b08] sm:$0xff]  ;;  %v950_v54 = vld [vmem:[#allocation5 + $0x1b00] sm:$0xff]  ;;  %v145_v32 = vld [vmem:[#allocation5 + $0x1d8] sm:$0xff] }
 0x11d   :  { %1710 = vmatpush2.msra.mxu1 %v1094_v39  ;;  %1634 = vmatprep.subr.mxu0 %v963_v40  ;;  %v1079_v53 = vld [vmem:[#allocation5 + $0x1f08] sm:$0xff]  ;;  %v1078_v55 = vld [vmem:[#allocation5 + $0x1f00] sm:$0xff]  ;;  %v273_v33 = vld [vmem:[#allocation5 + $0x5d8] sm:$0xff] }
 0x11e   :  { %1711 = vmatprep.subr.mxu1 %v1091_v41  ;;  %1635 = vmatpush2.msra.mxu0 %v962_v42  ;;  %v947_v56 = vld [vmem:[#allocation5 + $0x1ae8] sm:$0xff]  ;;  %v946_v58 = vld [vmem:[#allocation5 + $0x1ae0] sm:$0xff]  ;;  %v144_v35 = vld [vmem:[#allocation5 + $0x1d0] sm:$0xff] }
 0x11f   :  { %1712 = vmatpush2.msra.mxu1 %v1090_v43  ;;  %1636 = vmatprep.subr.mxu0 %v959_v44  ;;  %v1075_v57 = vld [vmem:[#allocation5 + $0x1ee8] sm:$0xff]  ;;  %v1074_v59 = vld [vmem:[#allocation5 + $0x1ee0] sm:$0xff]  ;;  %v272_v36 = vld [vmem:[#allocation5 + $0x5d0] sm:$0xff] }
 0x120   :  { %1713 = vmatprep.subr.mxu1 %v1087_v45  ;;  %1637 = vmatpush2.msra.mxu0 %v958_v46  ;;  %v943_v60 = vld [vmem:[#allocation5 + $0x1ac8] sm:$0xff]  ;;  %v942_v62 = vld [vmem:[#allocation5 + $0x1ac0] sm:$0xff]  ;;  %v141_v38 = vld [vmem:[#allocation5 + $0x1b8] sm:$0xff] }
 0x121   :  { %1714 = vmatpush2.msra.mxu1 %v1086_v47  ;;  %1638 = vmatprep.subr.mxu0 %v955_v48  ;;  %v1071_v61 = vld [vmem:[#allocation5 + $0x1ec8] sm:$0xff]  ;;  %v1070_v63 = vld [vmem:[#allocation5 + $0x1ec0] sm:$0xff]  ;;  %v269_v39 = vld [vmem:[#allocation5 + $0x5b8] sm:$0xff] }
 0x122   :  { %1715 = vmatprep.subr.mxu1 %v1083_v49  ;;  %1639 = vmatpush2.msra.mxu0 %v954_v50  ;;  %v939_v0 = vld [vmem:[#allocation5 + $0x1aa8] sm:$0xff]  ;;  %v938_v2 = vld [vmem:[#allocation5 + $0x1aa0] sm:$0xff]  ;;  %v85_v40 = vld [vmem:[#allocation2 + $0xf8] sm:$0xff] }
 0x123   :  { %1716 = vmatpush2.msra.mxu1 %v1082_v51  ;;  %1640 = vmatprep.subr.mxu0 %v951_v52  ;;  %v1067_v1 = vld [vmem:[#allocation5 + $0x1ea8] sm:$0xff]  ;;  %v1066_v3 = vld [vmem:[#allocation5 + $0x1ea0] sm:$0xff]  ;;  %v140_v41 = vld [vmem:[#allocation5 + $0x1b0] sm:$0xff] }
 0x124   :  { %1717 = vmatprep.subr.mxu1 %v1079_v53  ;;  %1641 = vmatpush2.msra.mxu0 %v950_v54  ;;  %v935_v4 = vld [vmem:[#allocation5 + $0x1a88] sm:$0xff]  ;;  %v934_v6 = vld [vmem:[#allocation5 + $0x1a80] sm:$0xff]  ;;  %v268_v42 = vld [vmem:[#allocation5 + $0x5b0] sm:$0xff] }
 0x125   :  { %1718 = vmatpush2.msra.mxu1 %v1078_v55  ;;  %1642 = vmatprep.subr.mxu0 %v947_v56  ;;  %v1063_v5 = vld [vmem:[#allocation5 + $0x1e88] sm:$0xff]  ;;  %v1062_v7 = vld [vmem:[#allocation5 + $0x1e80] sm:$0xff]  ;;  %v137_v43 = vld [vmem:[#allocation5 + $0x198] sm:$0xff] }
 0x126   :  { %1719 = vmatprep.subr.mxu1 %v1075_v57  ;;  %1643 = vmatpush2.msra.mxu0 %v946_v58  ;;  %v931_v8 = vld [vmem:[#allocation5 + $0x1a68] sm:$0xff]  ;;  %v930_v10 = vld [vmem:[#allocation5 + $0x1a60] sm:$0xff]  ;;  %v84_v44 = vld [vmem:[#allocation2 + $0xf0] sm:$0xff] }
 0x127   :  { %1720 = vmatpush2.msra.mxu1 %v1074_v59  ;;  %1644 = vmatprep.subr.mxu0 %v943_v60  ;;  %v1059_v9 = vld [vmem:[#allocation5 + $0x1e68] sm:$0xff]  ;;  %v1058_v11 = vld [vmem:[#allocation5 + $0x1e60] sm:$0xff]  ;;  %v265_v45 = vld [vmem:[#allocation5 + $0x598] sm:$0xff] }
 0x128   :  { %1721 = vmatprep.subr.mxu1 %v1071_v61  ;;  %1645 = vmatpush2.msra.mxu0 %v942_v62  ;;  %v927_v12 = vld [vmem:[#allocation5 + $0x1a48] sm:$0xff]  ;;  %v926_v14 = vld [vmem:[#allocation5 + $0x1a40] sm:$0xff]  ;;  %v136_v46 = vld [vmem:[#allocation5 + $0x190] sm:$0xff] }
 0x129   :  { %1722 = vmatpush2.msra.mxu1 %v1070_v63  ;;  %1646 = vmatprep.subr.mxu0 %v939_v0  ;;  %v1055_v13 = vld [vmem:[#allocation5 + $0x1e48] sm:$0xff]  ;;  %v1054_v15 = vld [vmem:[#allocation5 + $0x1e40] sm:$0xff]  ;;  %v264_v47 = vld [vmem:[#allocation5 + $0x590] sm:$0xff] }
 0x12a   :  { %1723 = vmatprep.subr.mxu1 %v1067_v1  ;;  %1647 = vmatpush2.msra.mxu0 %v938_v2  ;;  %v923_v16 = vld [vmem:[#allocation5 + $0x1a28] sm:$0xff]  ;;  %v922_v18 = vld [vmem:[#allocation5 + $0x1a20] sm:$0xff]  ;;  %v133_v48 = vld [vmem:[#allocation5 + $0x178] sm:$0xff] }
 0x12b   :  { %1724 = vmatpush2.msra.mxu1 %v1066_v3  ;;  %1648 = vmatprep.subr.mxu0 %v935_v4  ;;  %v1051_v17 = vld [vmem:[#allocation5 + $0x1e28] sm:$0xff]  ;;  %v1050_v19 = vld [vmem:[#allocation5 + $0x1e20] sm:$0xff]  ;;  %v261_v49 = vld [vmem:[#allocation5 + $0x578] sm:$0xff] }
 0x12c   :  { %1725 = vmatprep.subr.mxu1 %v1063_v5  ;;  %1649 = vmatpush2.msra.mxu0 %v934_v6  ;;  %v919_v20 = vld [vmem:[#allocation5 + $0x1a08] sm:$0xff]  ;;  %v918_v22 = vld [vmem:[#allocation5 + $0x1a00] sm:$0xff]  ;;  %v132_v50 = vld [vmem:[#allocation5 + $0x170] sm:$0xff] }
 0x12d   :  { %1726 = vmatpush2.msra.mxu1 %v1062_v7  ;;  %1650 = vmatprep.subr.mxu0 %v931_v8  ;;  %v1047_v21 = vld [vmem:[#allocation5 + $0x1e08] sm:$0xff]  ;;  %v1046_v24 = vld [vmem:[#allocation5 + $0x1e00] sm:$0xff]  ;;  %v260_v51 = vld [vmem:[#allocation5 + $0x570] sm:$0xff] }
 0x12e   :  { %1727 = vmatprep.subr.mxu1 %v1059_v9  ;;  %1651 = vmatpush2.msra.mxu0 %v930_v10  ;;  %v67_v23 = vld [vmem:[#allocation2 + $0x68] sm:$0xff]  ;;  %v66_v25 = vld [vmem:[#allocation2 + $0x60] sm:$0xff]  ;;  %v129_v52 = vld [vmem:[#allocation5 + $0x158] sm:$0xff] }
 0x12f   :  { %1728 = vmatpush2.msra.mxu1 %v1058_v11  ;;  %1652 = vmatprep.subr.mxu0 %v927_v12  ;;  %v83_v34 = vld [vmem:[#allocation2 + $0xe8] sm:$0xff]  ;;  %v82_v37 = vld [vmem:[#allocation2 + $0xe0] sm:$0xff]  ;;  %v257_v53 = vld [vmem:[#allocation5 + $0x558] sm:$0xff] }
 0x130   :  { %1729 = vmatprep.subr.mxu1 %v1055_v13  ;;  %1653 = vmatpush2.msra.mxu0 %v926_v14  ;;  %v128_v54 = vld [vmem:[#allocation5 + $0x150] sm:$0xff]  ;;  %v125_v56 = vld [vmem:[#allocation5 + $0x138] sm:$0xff] }
 0x131   :  { %1730 = vmatpush2.msra.mxu1 %v1054_v15  ;;  %1654 = vmatprep.subr.mxu0 %v923_v16  ;;  %v256_v55 = vld [vmem:[#allocation5 + $0x550] sm:$0xff]  ;;  %v253_v57 = vld [vmem:[#allocation5 + $0x538] sm:$0xff] }
 0x132   :  { %1731 = vmatprep.subr.mxu1 %v1051_v17  ;;  %1655 = vmatpush2.msra.mxu0 %v922_v18  ;;  %v124_v58 = vld [vmem:[#allocation5 + $0x130] sm:$0xff]  ;;  %v121_v60 = vld [vmem:[#allocation5 + $0x118] sm:$0xff] }
 0x133   :  { %1732 = vmatpush2.msra.mxu1 %v1050_v19  ;;  %1656 = vmatprep.subr.mxu0 %v919_v20  ;;  %v252_v59 = vld [vmem:[#allocation5 + $0x530] sm:$0xff]  ;;  %v249_v61 = vld [vmem:[#allocation5 + $0x518] sm:$0xff] }
 0x134   :  { %1733 = vmatprep.subr.mxu1 %v1047_v21  ;;  %1657 = vmatpush2.msra.mxu0 %v918_v22  ;;  %v120_v62 = vld [vmem:[#allocation5 + $0x110] sm:$0xff]  ;;  %v117_v0 = vld [vmem:[#allocation5 + $0xf8] sm:$0xff] }
 0x135   :  { %1658 = vmatprep.mubr.f32.mxu0 %v67_v23  ;;  %1734 = vmatpush2.msra.mxu1 %v1046_v24  ;;  %v248_v63 = vld [vmem:[#allocation5 + $0x510] sm:$0xff]  ;;  %v245_v1 = vld [vmem:[#allocation5 + $0x4f8] sm:$0xff] }
 0x136   :  { %1659 = vmatmul.mubr.f32.vlgmr.msra.gmra.mxu0 %v66_v25  ;;  %1735 = vmatprep.mubr.f32.mxu1 %v69_v26  ;;  %v116_v2 = vld [vmem:[#allocation5 + $0xf0] sm:$0xff]  ;;  %v113_v4 = vld [vmem:[#allocation5 + $0xd8] sm:$0xff] }
 0x137   :  { %1748 = vmatprep.subr.mxu0 %v149_v27  ;;  %1825 = vmatprep.subr.mxu1 %v277_v28  ;;  %v244_v3 = vld [vmem:[#allocation5 + $0x4f0] sm:$0xff]  ;;  %v241_v5 = vld [vmem:[#allocation5 + $0x4d8] sm:$0xff] }
 0x138   :  { %1736 = vmatmul.mubr.f32.vlgmr.msra.gmra.mxu1 %v68_v29  ;;  %1749 = vmatpush1.msra.mxu0 %v148_v30  ;;  %v112_v6 = vld [vmem:[#allocation5 + $0xd0] sm:$0xff]  ;;  %v109_v8 = vld [vmem:[#allocation5 + $0xb8] sm:$0xff] }
 0x139   :  { %1826 = vmatpush1.msra.mxu1 %v276_v31  ;;  %1750 = vmatprep.subr.mxu0 %v145_v32  ;;  %v240_v7 = vld [vmem:[#allocation5 + $0x4d0] sm:$0xff]  ;;  %v237_v9 = vld [vmem:[#allocation5 + $0x4b8] sm:$0xff] }
 0x13a   :  { %1827 = vmatprep.subr.mxu1 %v273_v33  ;;  %1664 = vmatprep.mubr.f32.mxu0 %v83_v34  ;;  %v108_v10 = vld [vmem:[#allocation5 + $0xb0] sm:$0xff]  ;;  %v105_v12 = vld [vmem:[#allocation5 + $0x98] sm:$0xff] }
 0x13b   :  { %1751 = vmatpush1.msra.mxu0 %v144_v35  ;;  %1828 = vmatpush1.msra.mxu1 %v272_v36  ;;  %v236_v11 = vld [vmem:[#allocation5 + $0x4b0] sm:$0xff]  ;;  %v233_v13 = vld [vmem:[#allocation5 + $0x498] sm:$0xff] }
 0x13c   :  { %1665 = vmatmul.mubr.f32.gmra.mxu0 %v82_v37  ;;  %1752 = vmatprep.subr.mxu0 %v141_v38  ;;  %v104_v14 = vld [vmem:[#allocation5 + $0x90] sm:$0xff]  ;;  %v101_v16 = vld [vmem:[#allocation5 + $0x78] sm:$0xff] }
 0x13d   :  { %1829 = vmatprep.subr.mxu1 %v269_v39  ;;  %1741 = vmatprep.mubr.f32.mxu1 %v85_v40  ;;  %v232_v15 = vld [vmem:[#allocation5 + $0x490] sm:$0xff]  ;;  %v229_v17 = vld [vmem:[#allocation5 + $0x478] sm:$0xff] }
 0x13e   :  { %1753 = vmatpush1.msra.mxu0 %v140_v41  ;;  %1830 = vmatpush1.msra.mxu1 %v268_v42  ;;  %v100_v18 = vld [vmem:[#allocation5 + $0x70] sm:$0xff]  ;;  %v97_v20 = vld [vmem:[#allocation5 + $0x58] sm:$0xff] }
 0x13f   :  { %1754 = vmatprep.subr.mxu0 %v137_v43  ;;  %1742 = vmatmul.mubr.f32.gmra.mxu1 %v84_v44  ;;  %v228_v19 = vld [vmem:[#allocation5 + $0x470] sm:$0xff]  ;;  %v225_v21 = vld [vmem:[#allocation5 + $0x458] sm:$0xff] }
 0x140   :  { %1831 = vmatprep.subr.mxu1 %v265_v45  ;;  %1755 = vmatpush1.msra.mxu0 %v136_v46  ;;  %v96_v22 = vld [vmem:[#allocation5 + $0x50] sm:$0xff]  ;;  %v93_v24 = vld [vmem:[#allocation5 + $0x38] sm:$0xff] }
 0x141   :  { %1832 = vmatpush1.msra.mxu1 %v264_v47  ;;  %1756 = vmatprep.subr.mxu0 %v133_v48  ;;  %v224_v23 = vld [vmem:[#allocation5 + $0x450] sm:$0xff]  ;;  %v221_v25 = vld [vmem:[#allocation5 + $0x438] sm:$0xff] }
 0x142   :  { %1833 = vmatprep.subr.mxu1 %v261_v49  ;;  %1757 = vmatpush1.msra.mxu0 %v132_v50  ;;  %v92_v26 = vld [vmem:[#allocation5 + $0x30] sm:$0xff]  ;;  %v89_v28 = vld [vmem:[#allocation5 + $0x18] sm:$0xff] }
 0x143   :  { %1834 = vmatpush1.msra.mxu1 %v260_v51  ;;  %1758 = vmatprep.subr.mxu0 %v129_v52  ;;  %v220_v27 = vld [vmem:[#allocation5 + $0x430] sm:$0xff]  ;;  %v217_v29 = vld [vmem:[#allocation5 + $0x418] sm:$0xff] }
 0x144   :  { %1835 = vmatprep.subr.mxu1 %v257_v53  ;;  %1759 = vmatpush1.msra.mxu0 %v128_v54  ;;  %v88_v30 = vld [vmem:[#allocation5 + $0x10] sm:$0xff]  ;;  %v213_v32 = vld [vmem:[#allocation5 + $0x3f8] sm:$0xff] }
 0x145   :  { %1836 = vmatpush1.msra.mxu1 %v256_v55  ;;  %1760 = vmatprep.subr.mxu0 %v125_v56  ;;  %v216_v31 = vld [vmem:[#allocation5 + $0x410] sm:$0xff]  ;;  %v341_v33 = vld [vmem:[#allocation5 + $0x7f8] sm:$0xff] }
 0x146   :  { %1837 = vmatprep.subr.mxu1 %v253_v57  ;;  %1761 = vmatpush1.msra.mxu0 %v124_v58  ;;  %v212_v34 = vld [vmem:[#allocation5 + $0x3f0] sm:$0xff]  ;;  %v209_v36 = vld [vmem:[#allocation5 + $0x3d8] sm:$0xff] }
 0x147   :  { %1838 = vmatpush1.msra.mxu1 %v252_v59  ;;  %1762 = vmatprep.subr.mxu0 %v121_v60  ;;  %v340_v35 = vld [vmem:[#allocation5 + $0x7f0] sm:$0xff]  ;;  %v337_v37 = vld [vmem:[#allocation5 + $0x7d8] sm:$0xff] }
 0x148   :  { %1839 = vmatprep.subr.mxu1 %v249_v61  ;;  %1763 = vmatpush1.msra.mxu0 %v120_v62  ;;  %v208_v38 = vld [vmem:[#allocation5 + $0x3d0] sm:$0xff]  ;;  %v205_v40 = vld [vmem:[#allocation5 + $0x3b8] sm:$0xff] }
 0x149   :  { %1840 = vmatpush1.msra.mxu1 %v248_v63  ;;  %1764 = vmatprep.subr.mxu0 %v117_v0  ;;  %v336_v39 = vld [vmem:[#allocation5 + $0x7d0] sm:$0xff]  ;;  %v333_v41 = vld [vmem:[#allocation5 + $0x7b8] sm:$0xff] }
 0x14a   :  { %1841 = vmatprep.subr.mxu1 %v245_v1  ;;  %1765 = vmatpush1.msra.mxu0 %v116_v2  ;;  %v204_v42 = vld [vmem:[#allocation5 + $0x3b0] sm:$0xff]  ;;  %v201_v44 = vld [vmem:[#allocation5 + $0x398] sm:$0xff] }
 0x14b   :  { %1842 = vmatpush1.msra.mxu1 %v244_v3  ;;  %1766 = vmatprep.subr.mxu0 %v113_v4  ;;  %v332_v43 = vld [vmem:[#allocation5 + $0x7b0] sm:$0xff]  ;;  %v329_v45 = vld [vmem:[#allocation5 + $0x798] sm:$0xff] }
 0x14c   :  { %1843 = vmatprep.subr.mxu1 %v241_v5  ;;  %1767 = vmatpush1.msra.mxu0 %v112_v6  ;;  %v200_v46 = vld [vmem:[#allocation5 + $0x390] sm:$0xff]  ;;  %v197_v48 = vld [vmem:[#allocation5 + $0x378] sm:$0xff] }
 0x14d   :  { %1844 = vmatpush1.msra.mxu1 %v240_v7  ;;  %1768 = vmatprep.subr.mxu0 %v109_v8  ;;  %v328_v47 = vld [vmem:[#allocation5 + $0x790] sm:$0xff]  ;;  %v325_v49 = vld [vmem:[#allocation5 + $0x778] sm:$0xff] }
 0x14e   :  { %1845 = vmatprep.subr.mxu1 %v237_v9  ;;  %1769 = vmatpush1.msra.mxu0 %v108_v10  ;;  %v196_v50 = vld [vmem:[#allocation5 + $0x370] sm:$0xff]  ;;  %v193_v52 = vld [vmem:[#allocation5 + $0x358] sm:$0xff] }
 0x14f   :  { %1846 = vmatpush1.msra.mxu1 %v236_v11  ;;  %1770 = vmatprep.subr.mxu0 %v105_v12  ;;  %v324_v51 = vld [vmem:[#allocation5 + $0x770] sm:$0xff]  ;;  %v321_v53 = vld [vmem:[#allocation5 + $0x758] sm:$0xff] }
 0x150   :  { %1847 = vmatprep.subr.mxu1 %v233_v13  ;;  %1771 = vmatpush1.msra.mxu0 %v104_v14  ;;  %v192_v54 = vld [vmem:[#allocation5 + $0x350] sm:$0xff]  ;;  %v189_v56 = vld [vmem:[#allocation5 + $0x338] sm:$0xff] }
 0x151   :  { %1848 = vmatpush1.msra.mxu1 %v232_v15  ;;  %1772 = vmatprep.subr.mxu0 %v101_v16  ;;  %v320_v55 = vld [vmem:[#allocation5 + $0x750] sm:$0xff]  ;;  %v317_v57 = vld [vmem:[#allocation5 + $0x738] sm:$0xff] }
 0x152   :  { %1849 = vmatprep.subr.mxu1 %v229_v17  ;;  %1773 = vmatpush1.msra.mxu0 %v100_v18  ;;  %v188_v58 = vld [vmem:[#allocation5 + $0x330] sm:$0xff]  ;;  %v185_v60 = vld [vmem:[#allocation5 + $0x318] sm:$0xff] }
 0x153   :  { %1850 = vmatpush1.msra.mxu1 %v228_v19  ;;  %1774 = vmatprep.subr.mxu0 %v97_v20  ;;  %v316_v59 = vld [vmem:[#allocation5 + $0x730] sm:$0xff]  ;;  %v313_v61 = vld [vmem:[#allocation5 + $0x718] sm:$0xff] }
 0x154   :  { %1851 = vmatprep.subr.mxu1 %v225_v21  ;;  %1775 = vmatpush1.msra.mxu0 %v96_v22  ;;  %v184_v62 = vld [vmem:[#allocation5 + $0x310] sm:$0xff]  ;;  %v181_v0 = vld [vmem:[#allocation5 + $0x2f8] sm:$0xff] }
 0x155   :  { %1852 = vmatpush1.msra.mxu1 %v224_v23  ;;  %1776 = vmatprep.subr.mxu0 %v93_v24  ;;  %v312_v63 = vld [vmem:[#allocation5 + $0x710] sm:$0xff]  ;;  %v309_v1 = vld [vmem:[#allocation5 + $0x6f8] sm:$0xff] }
 0x156   :  { %1853 = vmatprep.subr.mxu1 %v221_v25  ;;  %1777 = vmatpush1.msra.mxu0 %v92_v26  ;;  %v180_v2 = vld [vmem:[#allocation5 + $0x2f0] sm:$0xff]  ;;  %v177_v4 = vld [vmem:[#allocation5 + $0x2d8] sm:$0xff] }
 0x157   :  { %1854 = vmatpush1.msra.mxu1 %v220_v27  ;;  %1778 = vmatprep.subr.mxu0 %v89_v28  ;;  %v308_v3 = vld [vmem:[#allocation5 + $0x6f0] sm:$0xff]  ;;  %v305_v5 = vld [vmem:[#allocation5 + $0x6d8] sm:$0xff] }
 0x158   :  { %1855 = vmatprep.subr.mxu1 %v217_v29  ;;  %1779 = vmatpush1.msra.mxu0 %v88_v30  ;;  %v176_v6 = vld [vmem:[#allocation5 + $0x2d0] sm:$0xff]  ;;  %v173_v8 = vld [vmem:[#allocation5 + $0x2b8] sm:$0xff] }
 0x159   :  { %1856 = vmatpush1.msra.mxu1 %v216_v31  ;;  %1780 = vmatprep.subr.mxu0 %v213_v32  ;;  %v304_v7 = vld [vmem:[#allocation5 + $0x6d0] sm:$0xff]  ;;  %v301_v9 = vld [vmem:[#allocation5 + $0x6b8] sm:$0xff] }
 0x15a   :  { %1857 = vmatprep.subr.mxu1 %v341_v33  ;;  %1781 = vmatpush2.msra.mxu0 %v212_v34  ;;  %v172_v10 = vld [vmem:[#allocation5 + $0x2b0] sm:$0xff]  ;;  %v169_v12 = vld [vmem:[#allocation5 + $0x298] sm:$0xff]  ;;  %v2398_v33 = vld [vmem:[#allocation2 + $0x8] sm:$0xff] }
 0x15b   :  { %1858 = vmatpush2.msra.mxu1 %v340_v35  ;;  %1782 = vmatprep.subr.mxu0 %v209_v36  ;;  %v300_v11 = vld [vmem:[#allocation5 + $0x6b0] sm:$0xff]  ;;  %v297_v13 = vld [vmem:[#allocation5 + $0x698] sm:$0xff]  ;;  %v2399_v35 = vld [vmem:[#allocation2] sm:$0xff] }
 0x15c   :  { %1859 = vmatprep.subr.mxu1 %v337_v37  ;;  %1783 = vmatpush2.msra.mxu0 %v208_v38  ;;  %v168_v14 = vld [vmem:[#allocation5 + $0x290] sm:$0xff]  ;;  %v165_v16 = vld [vmem:[#allocation5 + $0x278] sm:$0xff] }
 0x15d   :  { %1860 = vmatpush2.msra.mxu1 %v336_v39  ;;  %1784 = vmatprep.subr.mxu0 %v205_v40  ;;  %v296_v15 = vld [vmem:[#allocation5 + $0x690] sm:$0xff]  ;;  %v293_v17 = vld [vmem:[#allocation5 + $0x678] sm:$0xff] }
 0x15e   :  { %1861 = vmatprep.subr.mxu1 %v333_v41  ;;  %1785 = vmatpush2.msra.mxu0 %v204_v42  ;;  %v164_v18 = vld [vmem:[#allocation5 + $0x270] sm:$0xff]  ;;  %v161_v20 = vld [vmem:[#allocation5 + $0x258] sm:$0xff] }
 0x15f   :  { %1862 = vmatpush2.msra.mxu1 %v332_v43  ;;  %1786 = vmatprep.subr.mxu0 %v201_v44  ;;  %v292_v19 = vld [vmem:[#allocation5 + $0x670] sm:$0xff]  ;;  %v289_v21 = vld [vmem:[#allocation5 + $0x658] sm:$0xff] }
 0x160   :  { %1863 = vmatprep.subr.mxu1 %v329_v45  ;;  %1787 = vmatpush2.msra.mxu0 %v200_v46  ;;  %v160_v22 = vld [vmem:[#allocation5 + $0x250] sm:$0xff]  ;;  %v157_v24 = vld [vmem:[#allocation5 + $0x238] sm:$0xff] }
 0x161   :  { %1864 = vmatpush2.msra.mxu1 %v328_v47  ;;  %1788 = vmatprep.subr.mxu0 %v197_v48  ;;  %v288_v23 = vld [vmem:[#allocation5 + $0x650] sm:$0xff]  ;;  %v285_v25 = vld [vmem:[#allocation5 + $0x638] sm:$0xff] }
 0x162   :  { %1865 = vmatprep.subr.mxu1 %v325_v49  ;;  %1789 = vmatpush2.msra.mxu0 %v196_v50  ;;  %v156_v26 = vld [vmem:[#allocation5 + $0x230] sm:$0xff]  ;;  %v153_v28 = vld [vmem:[#allocation5 + $0x218] sm:$0xff] }
 0x163   :  { %1866 = vmatpush2.msra.mxu1 %v324_v51  ;;  %1790 = vmatprep.subr.mxu0 %v193_v52  ;;  %v284_v27 = vld [vmem:[#allocation5 + $0x630] sm:$0xff]  ;;  %v281_v29 = vld [vmem:[#allocation5 + $0x618] sm:$0xff] }
 0x164   :  { %1867 = vmatprep.subr.mxu1 %v321_v53  ;;  %1791 = vmatpush2.msra.mxu0 %v192_v54  ;;  %v152_v30 = vld [vmem:[#allocation5 + $0x210] sm:$0xff]  ;;  %v405_v32 = vld [vmem:[#allocation5 + $0x9f8] sm:$0xff] }
 0x165   :  { %1868 = vmatpush2.msra.mxu1 %v320_v55  ;;  %1792 = vmatprep.subr.mxu0 %v189_v56  ;;  %v280_v31 = vld [vmem:[#allocation5 + $0x610] sm:$0xff]  ;;  %v533_v34 = vld [vmem:[#allocation5 + $0xdf8] sm:$0xff] }
 0x166   :  { %1869 = vmatprep.subr.mxu1 %v317_v57  ;;  %1793 = vmatpush2.msra.mxu0 %v188_v58  ;;  %v404_v36 = vld [vmem:[#allocation5 + $0x9f0] sm:$0xff]  ;;  %v2400_v38 = vld [vmem:[#allocation2 + $0x18] sm:$0xff] }
 0x167   :  { %1870 = vmatpush2.msra.mxu1 %v316_v59  ;;  %1794 = vmatprep.subr.mxu0 %v185_v60  ;;  %v532_v37 = vld [vmem:[#allocation5 + $0xdf0] sm:$0xff]  ;;  %v401_v39 = vld [vmem:[#allocation5 + $0x9d8] sm:$0xff] }
 0x168   :  { %1871 = vmatprep.subr.mxu1 %v313_v61  ;;  %1795 = vmatpush2.msra.mxu0 %v184_v62  ;;  %v529_v40 = vld [vmem:[#allocation5 + $0xdd8] sm:$0xff]  ;;  %v2401_v41 = vld [vmem:[#allocation2 + $0x10] sm:$0xff] }
 0x169   :  { %1872 = vmatpush2.msra.mxu1 %v312_v63  ;;  %1796 = vmatprep.subr.mxu0 %v181_v0  ;;  %v400_v42 = vld [vmem:[#allocation5 + $0x9d0] sm:$0xff]  ;;  %v397_v44 = vld [vmem:[#allocation5 + $0x9b8] sm:$0xff] }
 0x16a   :  { %1873 = vmatprep.subr.mxu1 %v309_v1  ;;  %1797 = vmatpush2.msra.mxu0 %v180_v2  ;;  %v528_v43 = vld [vmem:[#allocation5 + $0xdd0] sm:$0xff]  ;;  %v525_v45 = vld [vmem:[#allocation5 + $0xdb8] sm:$0xff] }
 0x16b   :  { %1874 = vmatpush2.msra.mxu1 %v308_v3  ;;  %1798 = vmatprep.subr.mxu0 %v177_v4  ;;  %v396_v46 = vld [vmem:[#allocation5 + $0x9b0] sm:$0xff]  ;;  %v393_v48 = vld [vmem:[#allocation5 + $0x998] sm:$0xff] }
 0x16c   :  { %1875 = vmatprep.subr.mxu1 %v305_v5  ;;  %1799 = vmatpush2.msra.mxu0 %v176_v6  ;;  %v524_v47 = vld [vmem:[#allocation5 + $0xdb0] sm:$0xff]  ;;  %v521_v49 = vld [vmem:[#allocation5 + $0xd98] sm:$0xff] }
 0x16d   :  { %1876 = vmatpush2.msra.mxu1 %v304_v7  ;;  %1800 = vmatprep.subr.mxu0 %v173_v8  ;;  %v392_v50 = vld [vmem:[#allocation5 + $0x990] sm:$0xff]  ;;  %v389_v52 = vld [vmem:[#allocation5 + $0x978] sm:$0xff] }
 0x16e   :  { %1877 = vmatprep.subr.mxu1 %v301_v9  ;;  %1801 = vmatpush2.msra.mxu0 %v172_v10  ;;  %v520_v51 = vld [vmem:[#allocation5 + $0xd90] sm:$0xff]  ;;  %v517_v53 = vld [vmem:[#allocation5 + $0xd78] sm:$0xff] }
 0x16f   :  { %1878 = vmatpush2.msra.mxu1 %v300_v11  ;;  %1802 = vmatprep.subr.mxu0 %v169_v12  ;;  %v388_v54 = vld [vmem:[#allocation5 + $0x970] sm:$0xff]  ;;  %v385_v56 = vld [vmem:[#allocation5 + $0x958] sm:$0xff] }
 0x170   :  { %1879 = vmatprep.subr.mxu1 %v297_v13  ;;  %1803 = vmatpush2.msra.mxu0 %v168_v14  ;;  %v516_v55 = vld [vmem:[#allocation5 + $0xd70] sm:$0xff]  ;;  %v513_v57 = vld [vmem:[#allocation5 + $0xd58] sm:$0xff] }
 0x171   :  { %1880 = vmatpush2.msra.mxu1 %v296_v15  ;;  %1804 = vmatprep.subr.mxu0 %v165_v16  ;;  %v384_v58 = vld [vmem:[#allocation5 + $0x950] sm:$0xff]  ;;  %v381_v60 = vld [vmem:[#allocation5 + $0x938] sm:$0xff] }
 0x172   :  { %1881 = vmatprep.subr.mxu1 %v293_v17  ;;  %1805 = vmatpush2.msra.mxu0 %v164_v18  ;;  %v512_v59 = vld [vmem:[#allocation5 + $0xd50] sm:$0xff]  ;;  %v509_v61 = vld [vmem:[#allocation5 + $0xd38] sm:$0xff] }
 0x173   :  { %1882 = vmatpush2.msra.mxu1 %v292_v19  ;;  %1806 = vmatprep.subr.mxu0 %v161_v20  ;;  %v380_v62 = vld [vmem:[#allocation5 + $0x930] sm:$0xff]  ;;  %v377_v0 = vld [vmem:[#allocation5 + $0x918] sm:$0xff] }
 0x174   :  { %1883 = vmatprep.subr.mxu1 %v289_v21  ;;  %1807 = vmatpush2.msra.mxu0 %v160_v22  ;;  %v508_v63 = vld [vmem:[#allocation5 + $0xd30] sm:$0xff]  ;;  %v505_v1 = vld [vmem:[#allocation5 + $0xd18] sm:$0xff] }
 0x175   :  { %1884 = vmatpush2.msra.mxu1 %v288_v23  ;;  %1808 = vmatprep.subr.mxu0 %v157_v24  ;;  %v376_v2 = vld [vmem:[#allocation5 + $0x910] sm:$0xff]  ;;  %v373_v4 = vld [vmem:[#allocation5 + $0x8f8] sm:$0xff] }
 0x176   :  { %1885 = vmatprep.subr.mxu1 %v285_v25  ;;  %1809 = vmatpush2.msra.mxu0 %v156_v26  ;;  %v504_v3 = vld [vmem:[#allocation5 + $0xd10] sm:$0xff]  ;;  %v501_v5 = vld [vmem:[#allocation5 + $0xcf8] sm:$0xff] }
 0x177   :  { %1886 = vmatpush2.msra.mxu1 %v284_v27  ;;  %1810 = vmatprep.subr.mxu0 %v153_v28  ;;  %v372_v6 = vld [vmem:[#allocation5 + $0x8f0] sm:$0xff]  ;;  %v369_v8 = vld [vmem:[#allocation5 + $0x8d8] sm:$0xff] }
 0x178   :  { %1887 = vmatprep.subr.mxu1 %v281_v29  ;;  %1811 = vmatpush2.msra.mxu0 %v152_v30  ;;  %v500_v7 = vld [vmem:[#allocation5 + $0xcf0] sm:$0xff]  ;;  %v497_v9 = vld [vmem:[#allocation5 + $0xcd8] sm:$0xff] }
 0x179   :  { %1812 = vmatprep.mubr.f32.mxu0 %v2398_v33  ;;  %1888 = vmatpush2.msra.mxu1 %v280_v31  ;;  %v368_v10 = vld [vmem:[#allocation5 + $0x8d0] sm:$0xff]  ;;  %v365_v12 = vld [vmem:[#allocation5 + $0x8b8] sm:$0xff] }
 0x17a   :  { %1813 = vmatmul.mubr.f32.vlgmr.msra.gmra.mxu0 %v2399_v35  ;;  %1889 = vmatprep.mubr.f32.mxu1 %v2400_v38  ;;  %v496_v11 = vld [vmem:[#allocation5 + $0xcd0] sm:$0xff]  ;;  %v493_v13 = vld [vmem:[#allocation5 + $0xcb8] sm:$0xff] }
 0x17b   :  { %1902 = vmatprep.subr.mxu0 %v405_v32  ;;  %1979 = vmatprep.subr.mxu1 %v533_v34  ;;  %v364_v14 = vld [vmem:[#allocation5 + $0x8b0] sm:$0xff]  ;;  %v361_v16 = vld [vmem:[#allocation5 + $0x898] sm:$0xff] }
 0x17c   :  { %1890 = vmatmul.mubr.f32.vlgmr.msra.gmra.mxu1 %v2401_v41  ;;  %1903 = vmatpush1.msra.mxu0 %v404_v36  ;;  %v492_v15 = vld [vmem:[#allocation5 + $0xcb0] sm:$0xff]  ;;  %v489_v17 = vld [vmem:[#allocation5 + $0xc98] sm:$0xff] }
 0x17d   :  { %1980 = vmatpush1.msra.mxu1 %v532_v37  ;;  %1904 = vmatprep.subr.mxu0 %v401_v39  ;;  %v360_v18 = vld [vmem:[#allocation5 + $0x890] sm:$0xff]  ;;  %v357_v20 = vld [vmem:[#allocation5 + $0x878] sm:$0xff] }
 0x17e   :  { %1981 = vmatprep.subr.mxu1 %v529_v40  ;;  %1905 = vmatpush1.msra.mxu0 %v400_v42  ;;  %v488_v19 = vld [vmem:[#allocation5 + $0xc90] sm:$0xff]  ;;  %v485_v21 = vld [vmem:[#allocation5 + $0xc78] sm:$0xff] }
 0x17f   :  { %1982 = vmatpush1.msra.mxu1 %v528_v43  ;;  %1906 = vmatprep.subr.mxu0 %v397_v44  ;;  %v356_v22 = vld [vmem:[#allocation5 + $0x870] sm:$0xff]  ;;  %v353_v24 = vld [vmem:[#allocation5 + $0x858] sm:$0xff] }
 0x180   :  { %1983 = vmatprep.subr.mxu1 %v525_v45  ;;  %1907 = vmatpush1.msra.mxu0 %v396_v46  ;;  %v484_v23 = vld [vmem:[#allocation5 + $0xc70] sm:$0xff]  ;;  %v481_v25 = vld [vmem:[#allocation5 + $0xc58] sm:$0xff] }
 0x181   :  { %1984 = vmatpush1.msra.mxu1 %v524_v47  ;;  %1908 = vmatprep.subr.mxu0 %v393_v48  ;;  %v352_v26 = vld [vmem:[#allocation5 + $0x850] sm:$0xff]  ;;  %v349_v28 = vld [vmem:[#allocation5 + $0x838] sm:$0xff] }
 0x182   :  { %1985 = vmatprep.subr.mxu1 %v521_v49  ;;  %1909 = vmatpush1.msra.mxu0 %v392_v50  ;;  %v480_v27 = vld [vmem:[#allocation5 + $0xc50] sm:$0xff]  ;;  %v477_v29 = vld [vmem:[#allocation5 + $0xc38] sm:$0xff] }
 0x183   :  { %1986 = vmatpush1.msra.mxu1 %v520_v51  ;;  %1910 = vmatprep.subr.mxu0 %v389_v52  ;;  %v348_v30 = vld [vmem:[#allocation5 + $0x830] sm:$0xff]  ;;  %v345_v32 = vld [vmem:[#allocation5 + $0x818] sm:$0xff] }
 0x184   :  { %1987 = vmatprep.subr.mxu1 %v517_v53  ;;  %1911 = vmatpush1.msra.mxu0 %v388_v54  ;;  %v476_v31 = vld [vmem:[#allocation5 + $0xc30] sm:$0xff]  ;;  %v473_v33 = vld [vmem:[#allocation5 + $0xc18] sm:$0xff] }
 0x185   :  { %1988 = vmatpush1.msra.mxu1 %v516_v55  ;;  %1912 = vmatprep.subr.mxu0 %v385_v56  ;;  %v344_v34 = vld [vmem:[#allocation5 + $0x810] sm:$0xff]  ;;  %v469_v36 = vld [vmem:[#allocation5 + $0xbf8] sm:$0xff] }
 0x186   :  { %1989 = vmatprep.subr.mxu1 %v513_v57  ;;  %1913 = vmatpush1.msra.mxu0 %v384_v58  ;;  %v472_v35 = vld [vmem:[#allocation5 + $0xc10] sm:$0xff]  ;;  %v597_v37 = vld [vmem:[#allocation5 + $0xff8] sm:$0xff] }
 0x187   :  { %1990 = vmatpush1.msra.mxu1 %v512_v59  ;;  %1914 = vmatprep.subr.mxu0 %v381_v60  ;;  %v468_v38 = vld [vmem:[#allocation5 + $0xbf0] sm:$0xff]  ;;  %v465_v40 = vld [vmem:[#allocation5 + $0xbd8] sm:$0xff] }
 0x188   :  { %1991 = vmatprep.subr.mxu1 %v509_v61  ;;  %1915 = vmatpush1.msra.mxu0 %v380_v62  ;;  %v596_v39 = vld [vmem:[#allocation5 + $0xff0] sm:$0xff]  ;;  %v593_v41 = vld [vmem:[#allocation5 + $0xfd8] sm:$0xff] }
 0x189   :  { %1992 = vmatpush1.msra.mxu1 %v508_v63  ;;  %1916 = vmatprep.subr.mxu0 %v377_v0  ;;  %v464_v42 = vld [vmem:[#allocation5 + $0xbd0] sm:$0xff]  ;;  %v461_v44 = vld [vmem:[#allocation5 + $0xbb8] sm:$0xff] }
 0x18a   :  { %1993 = vmatprep.subr.mxu1 %v505_v1  ;;  %1917 = vmatpush1.msra.mxu0 %v376_v2  ;;  %v592_v43 = vld [vmem:[#allocation5 + $0xfd0] sm:$0xff]  ;;  %v589_v45 = vld [vmem:[#allocation5 + $0xfb8] sm:$0xff] }
 0x18b   :  { %1994 = vmatpush1.msra.mxu1 %v504_v3  ;;  %1918 = vmatprep.subr.mxu0 %v373_v4  ;;  %v460_v46 = vld [vmem:[#allocation5 + $0xbb0] sm:$0xff]  ;;  %v457_v48 = vld [vmem:[#allocation5 + $0xb98] sm:$0xff] }
 0x18c   :  { %1995 = vmatprep.subr.mxu1 %v501_v5  ;;  %1919 = vmatpush1.msra.mxu0 %v372_v6  ;;  %v588_v47 = vld [vmem:[#allocation5 + $0xfb0] sm:$0xff]  ;;  %v585_v49 = vld [vmem:[#allocation5 + $0xf98] sm:$0xff] }
 0x18d   :  { %1996 = vmatpush1.msra.mxu1 %v500_v7  ;;  %1920 = vmatprep.subr.mxu0 %v369_v8  ;;  %v456_v50 = vld [vmem:[#allocation5 + $0xb90] sm:$0xff]  ;;  %v453_v52 = vld [vmem:[#allocation5 + $0xb78] sm:$0xff] }
 0x18e   :  { %1997 = vmatprep.subr.mxu1 %v497_v9  ;;  %1921 = vmatpush1.msra.mxu0 %v368_v10  ;;  %v584_v51 = vld [vmem:[#allocation5 + $0xf90] sm:$0xff]  ;;  %v581_v53 = vld [vmem:[#allocation5 + $0xf78] sm:$0xff] }
 0x18f   :  { %1998 = vmatpush1.msra.mxu1 %v496_v11  ;;  %1922 = vmatprep.subr.mxu0 %v365_v12  ;;  %v452_v54 = vld [vmem:[#allocation5 + $0xb70] sm:$0xff]  ;;  %v449_v56 = vld [vmem:[#allocation5 + $0xb58] sm:$0xff] }
 0x190   :  { %1999 = vmatprep.subr.mxu1 %v493_v13  ;;  %1923 = vmatpush1.msra.mxu0 %v364_v14  ;;  %v580_v55 = vld [vmem:[#allocation5 + $0xf70] sm:$0xff]  ;;  %v577_v57 = vld [vmem:[#allocation5 + $0xf58] sm:$0xff] }
 0x191   :  { %2000 = vmatpush1.msra.mxu1 %v492_v15  ;;  %1924 = vmatprep.subr.mxu0 %v361_v16  ;;  %v448_v58 = vld [vmem:[#allocation5 + $0xb50] sm:$0xff]  ;;  %v445_v60 = vld [vmem:[#allocation5 + $0xb38] sm:$0xff] }
 0x192   :  { %2001 = vmatprep.subr.mxu1 %v489_v17  ;;  %1925 = vmatpush1.msra.mxu0 %v360_v18  ;;  %v576_v59 = vld [vmem:[#allocation5 + $0xf50] sm:$0xff]  ;;  %v573_v61 = vld [vmem:[#allocation5 + $0xf38] sm:$0xff] }
 0x193   :  { %2002 = vmatpush1.msra.mxu1 %v488_v19  ;;  %1926 = vmatprep.subr.mxu0 %v357_v20  ;;  %v444_v62 = vld [vmem:[#allocation5 + $0xb30] sm:$0xff]  ;;  %v441_v0 = vld [vmem:[#allocation5 + $0xb18] sm:$0xff] }
 0x194   :  { %2003 = vmatprep.subr.mxu1 %v485_v21  ;;  %1927 = vmatpush1.msra.mxu0 %v356_v22  ;;  %v572_v63 = vld [vmem:[#allocation5 + $0xf30] sm:$0xff]  ;;  %v569_v1 = vld [vmem:[#allocation5 + $0xf18] sm:$0xff] }
 0x195   :  { %2004 = vmatpush1.msra.mxu1 %v484_v23  ;;  %1928 = vmatprep.subr.mxu0 %v353_v24  ;;  %v440_v2 = vld [vmem:[#allocation5 + $0xb10] sm:$0xff]  ;;  %v437_v4 = vld [vmem:[#allocation5 + $0xaf8] sm:$0xff] }
 0x196   :  { %2005 = vmatprep.subr.mxu1 %v481_v25  ;;  %1929 = vmatpush1.msra.mxu0 %v352_v26  ;;  %v568_v3 = vld [vmem:[#allocation5 + $0xf10] sm:$0xff]  ;;  %v565_v5 = vld [vmem:[#allocation5 + $0xef8] sm:$0xff] }
 0x197   :  { %2006 = vmatpush1.msra.mxu1 %v480_v27  ;;  %1930 = vmatprep.subr.mxu0 %v349_v28  ;;  %v436_v6 = vld [vmem:[#allocation5 + $0xaf0] sm:$0xff]  ;;  %v433_v8 = vld [vmem:[#allocation5 + $0xad8] sm:$0xff]  ;;  %v2402_v28 = vld [vmem:[#allocation2 + $0x88] sm:$0xff] }
 0x198   :  { %2007 = vmatprep.subr.mxu1 %v477_v29  ;;  %1931 = vmatpush1.msra.mxu0 %v348_v30  ;;  %v564_v7 = vld [vmem:[#allocation5 + $0xef0] sm:$0xff]  ;;  %v561_v9 = vld [vmem:[#allocation5 + $0xed8] sm:$0xff]  ;;  %v2403_v30 = vld [vmem:[#allocation2 + $0x80] sm:$0xff] }
 0x199   :  { %2008 = vmatpush1.msra.mxu1 %v476_v31  ;;  %1932 = vmatprep.subr.mxu0 %v345_v32  ;;  %v432_v10 = vld [vmem:[#allocation5 + $0xad0] sm:$0xff]  ;;  %v429_v12 = vld [vmem:[#allocation5 + $0xab8] sm:$0xff] }
 0x19a   :  { %2009 = vmatprep.subr.mxu1 %v473_v33  ;;  %1933 = vmatpush1.msra.mxu0 %v344_v34  ;;  %v560_v11 = vld [vmem:[#allocation5 + $0xed0] sm:$0xff]  ;;  %v557_v13 = vld [vmem:[#allocation5 + $0xeb8] sm:$0xff] }
 0x19b   :  { %2010 = vmatpush1.msra.mxu1 %v472_v35  ;;  %1934 = vmatprep.subr.mxu0 %v469_v36  ;;  %v428_v14 = vld [vmem:[#allocation5 + $0xab0] sm:$0xff]  ;;  %v425_v16 = vld [vmem:[#allocation5 + $0xa98] sm:$0xff] }
 0x19c   :  { %2011 = vmatprep.subr.mxu1 %v597_v37  ;;  %1935 = vmatpush2.msra.mxu0 %v468_v38  ;;  %v556_v15 = vld [vmem:[#allocation5 + $0xeb0] sm:$0xff]  ;;  %v553_v17 = vld [vmem:[#allocation5 + $0xe98] sm:$0xff] }
 0x19d   :  { %2012 = vmatpush2.msra.mxu1 %v596_v39  ;;  %1936 = vmatprep.subr.mxu0 %v465_v40  ;;  %v424_v18 = vld [vmem:[#allocation5 + $0xa90] sm:$0xff]  ;;  %v421_v20 = vld [vmem:[#allocation5 + $0xa78] sm:$0xff] }
 0x19e   :  { %2013 = vmatprep.subr.mxu1 %v593_v41  ;;  %1937 = vmatpush2.msra.mxu0 %v464_v42  ;;  %v552_v19 = vld [vmem:[#allocation5 + $0xe90] sm:$0xff]  ;;  %v549_v21 = vld [vmem:[#allocation5 + $0xe78] sm:$0xff]  ;;  %v2406_v41 = vld [vmem:[#allocation2 + $0x28] sm:$0xff] }
 0x19f   :  { %2014 = vmatpush2.msra.mxu1 %v592_v43  ;;  %1938 = vmatprep.subr.mxu0 %v461_v44  ;;  %v420_v22 = vld [vmem:[#allocation5 + $0xa70] sm:$0xff]  ;;  %v417_v24 = vld [vmem:[#allocation5 + $0xa58] sm:$0xff]  ;;  %v2407_v43 = vld [vmem:[#allocation2 + $0x20] sm:$0xff] }
 0x1a0   :  { %2015 = vmatprep.subr.mxu1 %v589_v45  ;;  %1939 = vmatpush2.msra.mxu0 %v460_v46  ;;  %v548_v23 = vld [vmem:[#allocation5 + $0xe70] sm:$0xff]  ;;  %v545_v25 = vld [vmem:[#allocation5 + $0xe58] sm:$0xff] }
 0x1a1   :  { %2016 = vmatpush2.msra.mxu1 %v588_v47  ;;  %1940 = vmatprep.subr.mxu0 %v457_v48  ;;  %v416_v26 = vld [vmem:[#allocation5 + $0xa50] sm:$0xff]  ;;  %v413_v29 = vld [vmem:[#allocation5 + $0xa38] sm:$0xff] }
 0x1a2   :  { %2017 = vmatprep.subr.mxu1 %v585_v49  ;;  %1941 = vmatpush2.msra.mxu0 %v456_v50  ;;  %v544_v27 = vld [vmem:[#allocation5 + $0xe50] sm:$0xff]  ;;  %v541_v31 = vld [vmem:[#allocation5 + $0xe38] sm:$0xff] }
 0x1a3   :  { %2018 = vmatpush2.msra.mxu1 %v584_v51  ;;  %1942 = vmatprep.subr.mxu0 %v453_v52  ;;  %v412_v32 = vld [vmem:[#allocation5 + $0xa30] sm:$0xff]  ;;  %v2404_v34 = vld [vmem:[#allocation2 + $0x98] sm:$0xff] }
 0x1a4   :  { %2019 = vmatprep.subr.mxu1 %v581_v53  ;;  %1943 = vmatpush2.msra.mxu0 %v452_v54  ;;  %v540_v33 = vld [vmem:[#allocation5 + $0xe30] sm:$0xff]  ;;  %v409_v35 = vld [vmem:[#allocation5 + $0xa18] sm:$0xff]  ;;  %v2410_v54 = vld [vmem:[#allocation2 + $0xa8] sm:$0xff] }
 0x1a5   :  { %2020 = vmatpush2.msra.mxu1 %v580_v55  ;;  %1944 = vmatprep.subr.mxu0 %v449_v56  ;;  %v537_v36 = vld [vmem:[#allocation5 + $0xe18] sm:$0xff]  ;;  %v2405_v37 = vld [vmem:[#allocation2 + $0x90] sm:$0xff]  ;;  %v2411_v56 = vld [vmem:[#allocation2 + $0xa0] sm:$0xff] }
 0x1a6   :  { %2021 = vmatprep.subr.mxu1 %v577_v57  ;;  %1945 = vmatpush2.msra.mxu0 %v448_v58  ;;  %v408_v38 = vld [vmem:[#allocation5 + $0xa10] sm:$0xff]  ;;  %v661_v40 = vld [vmem:[#allocation5 + $0x11f8] sm:$0xff] }
 0x1a7   :  { %2022 = vmatpush2.msra.mxu1 %v576_v59  ;;  %1946 = vmatprep.subr.mxu0 %v445_v60  ;;  %v536_v39 = vld [vmem:[#allocation5 + $0xe10] sm:$0xff]  ;;  %v789_v42 = vld [vmem:[#allocation5 + $0x15f8] sm:$0xff] }
 0x1a8   :  { %2023 = vmatprep.subr.mxu1 %v573_v61  ;;  %1947 = vmatpush2.msra.mxu0 %v444_v62  ;;  %v660_v44 = vld [vmem:[#allocation5 + $0x11f0] sm:$0xff]  ;;  %v2408_v46 = vld [vmem:[#allocation2 + $0x38] sm:$0xff] }
 0x1a9   :  { %2024 = vmatpush2.msra.mxu1 %v572_v63  ;;  %1948 = vmatprep.subr.mxu0 %v441_v0  ;;  %v788_v45 = vld [vmem:[#allocation5 + $0x15f0] sm:$0xff]  ;;  %v657_v47 = vld [vmem:[#allocation5 + $0x11d8] sm:$0xff] }
 0x1aa   :  { %2025 = vmatprep.subr.mxu1 %v569_v1  ;;  %1949 = vmatpush2.msra.mxu0 %v440_v2  ;;  %v785_v48 = vld [vmem:[#allocation5 + $0x15d8] sm:$0xff]  ;;  %v2409_v49 = vld [vmem:[#allocation2 + $0x30] sm:$0xff] }
 0x1ab   :  { %2026 = vmatpush2.msra.mxu1 %v568_v3  ;;  %1950 = vmatprep.subr.mxu0 %v437_v4  ;;  %v656_v50 = vld [vmem:[#allocation5 + $0x11d0] sm:$0xff]  ;;  %v653_v52 = vld [vmem:[#allocation5 + $0x11b8] sm:$0xff] }
 0x1ac   :  { %2027 = vmatprep.subr.mxu1 %v565_v5  ;;  %1951 = vmatpush2.msra.mxu0 %v436_v6  ;;  %v784_v51 = vld [vmem:[#allocation5 + $0x15d0] sm:$0xff]  ;;  %v781_v53 = vld [vmem:[#allocation5 + $0x15b8] sm:$0xff] }
 0x1ad   :  { %2028 = vmatpush2.msra.mxu1 %v564_v7  ;;  %1952 = vmatprep.subr.mxu0 %v433_v8  ;;  %v652_v55 = vld [vmem:[#allocation5 + $0x11b0] sm:$0xff]  ;;  %v649_v58 = vld [vmem:[#allocation5 + $0x1198] sm:$0xff] }
 0x1ae   :  { %2029 = vmatprep.subr.mxu1 %v561_v9  ;;  %1953 = vmatpush2.msra.mxu0 %v432_v10  ;;  %v780_v57 = vld [vmem:[#allocation5 + $0x15b0] sm:$0xff]  ;;  %v777_v59 = vld [vmem:[#allocation5 + $0x1598] sm:$0xff]  ;;  %v2556_v10 = vpop.f32.mrf.mxu0 }
 0x1af   :  { %2030 = vmatpush2.msra.mxu1 %v560_v11  ;;  %1954 = vmatprep.subr.mxu0 %v429_v12  ;;  %v2412_v60 = vld [vmem:[#allocation2 + $0xb8] sm:$0xff]  ;;  %v648_v61 = vld [vmem:[#allocation5 + $0x1190] sm:$0xff] }
 0x1b0   :  { %2031 = vmatprep.subr.mxu1 %v557_v13  ;;  %1955 = vmatpush2.msra.mxu0 %v428_v14  ;;  %v776_v62 = vld [vmem:[#allocation5 + $0x1590] sm:$0xff]  ;;  %v645_v63 = vld [vmem:[#allocation5 + $0x1178] sm:$0xff] }
 0x1b1   :  { %2032 = vmatpush2.msra.mxu1 %v556_v15  ;;  %1956 = vmatprep.subr.mxu0 %v425_v16  ;;  %v773_v0 = vld [vmem:[#allocation5 + $0x1578] sm:$0xff]  ;;  %v2413_v1 = vld [vmem:[#allocation2 + $0xb0] sm:$0xff]  ;;  %v2558_v15 = vpop.f32.mrf.mxu1 }
 0x1b2   :  { %2033 = vmatprep.subr.mxu1 %v553_v17  ;;  %1957 = vmatpush2.msra.mxu0 %v424_v18  ;;  %v644_v2 = vld [vmem:[#allocation5 + $0x1170] sm:$0xff]  ;;  %v641_v4 = vld [vmem:[#allocation5 + $0x1158] sm:$0xff] }
 0x1b3   :  { %2034 = vmatpush2.msra.mxu1 %v552_v19  ;;  %1958 = vmatprep.subr.mxu0 %v421_v20  ;;  %v772_v3 = vld [vmem:[#allocation5 + $0x1570] sm:$0xff]  ;;  %v769_v5 = vld [vmem:[#allocation5 + $0x1558] sm:$0xff]  ;;  %v2560_v20 = vpop.f32.mrf.mxu0 }
 0x1b4   :  { %2035 = vmatprep.subr.mxu1 %v549_v21  ;;  %1959 = vmatpush2.msra.mxu0 %v420_v22  ;;  %v640_v6 = vld [vmem:[#allocation5 + $0x1150] sm:$0xff]  ;;  %v637_v8 = vld [vmem:[#allocation5 + $0x1138] sm:$0xff] }
 0x1b5   :  { %2036 = vmatpush2.msra.mxu1 %v548_v23  ;;  %1818 = vmatprep.mubr.f32.mxu0 %v2402_v28  ;;  %v768_v7 = vld [vmem:[#allocation5 + $0x1550] sm:$0xff]  ;;  %v765_v9 = vld [vmem:[#allocation5 + $0x1538] sm:$0xff] }
 0x1b6   :  { %1960 = vmatprep.subr.mxu0 %v417_v24  ;;  %2037 = vmatprep.subr.mxu1 %v545_v25  ;;  %v636_v11 = vld [vmem:[#allocation5 + $0x1130] sm:$0xff]  ;;  %v633_v13 = vld [vmem:[#allocation5 + $0x1118] sm:$0xff]  ;;  %v2562_v25 = vpop.f32.mrf.mxu1 }
 0x1b7   :  { %1819 = vmatmul.mubr.f32.gmra.mxu0 %v2403_v30  ;;  %2038 = vmatpush2.msra.mxu1 %v544_v27  ;;  %v764_v12 = vld [vmem:[#allocation5 + $0x1530] sm:$0xff]  ;;  %v761_v14 = vld [vmem:[#allocation5 + $0x1518] sm:$0xff] }
 0x1b8   :  { %1961 = vmatpush2.msra.mxu0 %v416_v26  ;;  %1895 = vmatprep.mubr.f32.mxu1 %v2404_v34  ;;  %v632_v16 = vld [vmem:[#allocation5 + $0x1110] sm:$0xff]  ;;  %v629_v18 = vld [vmem:[#allocation5 + $0x10f8] sm:$0xff]  ;;  %v2564_v26 = vpop.f32.mrf.mxu0  ;;  %v1112_v34 = vlaneseq }
 0x1b9   :  { %1962 = vmatprep.subr.mxu0 %v413_v29  ;;  %2039 = vmatprep.subr.mxu1 %v541_v31  ;;  %v760_v17 = vld [vmem:[#allocation5 + $0x1510] sm:$0xff]  ;;  %v757_v19 = vld [vmem:[#allocation5 + $0x14f8] sm:$0xff]  ;;  %v2566_v31 = vpop.f32.mrf.mxu1 }
 0x1ba   :  { %1896 = vmatmul.mubr.f32.gmra.mxu1 %v2405_v37  ;;  %1963 = vmatpush2.msra.mxu0 %v412_v32  ;;  %v628_v21 = vld [vmem:[#allocation5 + $0x10f0] sm:$0xff]  ;;  %v625_v23 = vld [vmem:[#allocation5 + $0x10d8] sm:$0xff]  ;;  %v2568_v37 = vpop.f32.mrf.mxu0 }
 0x1bb   :  { %2040 = vmatpush2.msra.mxu1 %v540_v33  ;;  %1964 = vmatprep.subr.mxu0 %v409_v35  ;;  %v756_v22 = vld [vmem:[#allocation5 + $0x14f0] sm:$0xff]  ;;  %v753_v24 = vld [vmem:[#allocation5 + $0x14d8] sm:$0xff] }
 0x1bc   :  { %2041 = vmatprep.subr.mxu1 %v537_v36  ;;  %1965 = vmatpush2.msra.mxu0 %v408_v38  ;;  %v624_v27 = vld [vmem:[#allocation5 + $0x10d0] sm:$0xff]  ;;  %v621_v29 = vld [vmem:[#allocation5 + $0x10b8] sm:$0xff] }
 0x1bd   :  { %1966 = vmatprep.mubr.f32.mxu0 %v2406_v41  ;;  %2042 = vmatpush2.msra.mxu1 %v536_v39  ;;  %v752_v28 = vld [vmem:[#allocation5 + $0x14d0] sm:$0xff]  ;;  %v749_v30 = vld [vmem:[#allocation5 + $0x14b8] sm:$0xff] }
 0x1be   :  { %1967 = vmatmul.mubr.f32.vlgmr.msra.gmra.mxu0 %v2407_v43  ;;  %2043 = vmatprep.mubr.f32.mxu1 %v2408_v46  ;;  %v620_v32 = vld [vmem:[#allocation5 + $0x10b0] sm:$0xff]  ;;  %v617_v35 = vld [vmem:[#allocation5 + $0x1098] sm:$0xff] }
 0x1bf   :  { %2056 = vmatprep.subr.mxu0 %v661_v40  ;;  %2133 = vmatprep.subr.mxu1 %v789_v42  ;;  %v748_v33 = vld [vmem:[#allocation5 + $0x14b0] sm:$0xff]  ;;  %v745_v36 = vld [vmem:[#allocation5 + $0x1498] sm:$0xff]  ;;  %v2570_v42 = vpop.f32.mrf.mxu1 }
 0x1c0   :  { %2044 = vmatmul.mubr.f32.vlgmr.msra.gmra.mxu1 %v2409_v49  ;;  %2057 = vmatpush1.msra.mxu0 %v660_v44  ;;  %v616_v38 = vld [vmem:[#allocation5 + $0x1090] sm:$0xff]  ;;  %v613_v40 = vld [vmem:[#allocation5 + $0x1078] sm:$0xff] }
 0x1c1   :  { %2134 = vmatpush1.msra.mxu1 %v788_v45  ;;  %2058 = vmatprep.subr.mxu0 %v657_v47  ;;  %v744_v39 = vld [vmem:[#allocation5 + $0x1490] sm:$0xff]  ;;  %v741_v41 = vld [vmem:[#allocation5 + $0x1478] sm:$0xff]  ;;  %v2572_v45 = vshrl.u32 %v1112_v34, 7 }
 0x1c2   :  { %2135 = vmatprep.subr.mxu1 %v785_v48  ;;  %1972 = vmatprep.mubr.f32.mxu0 %v2410_v54  ;;  %v612_v43 = vld [vmem:[#allocation5 + $0x1070] sm:$0xff]  ;;  %v609_v46 = vld [vmem:[#allocation5 + $0x1058] sm:$0xff]  ;;  %v2574_v48 = vpop.f32.mrf.mxu0 }
 0x1c3   :  { %2059 = vmatpush1.msra.mxu0 %v656_v50  ;;  %2136 = vmatpush1.msra.mxu1 %v784_v51  ;;  %v740_v44 = vld [vmem:[#allocation5 + $0x1470] sm:$0xff]  ;;  %v737_v47 = vld [vmem:[#allocation5 + $0x1458] sm:$0xff] }
 0x1c4   :  { %1973 = vmatmul.mubr.f32.gmra.mxu0 %v2411_v56  ;;  %2060 = vmatprep.subr.mxu0 %v653_v52  ;;  %v608_v49 = vld [vmem:[#allocation5 + $0x1050] sm:$0xff]  ;;  %v605_v51 = vld [vmem:[#allocation5 + $0x1038] sm:$0xff]  ;;  %v1114_v56 = vsub.s32 0, %v2572_v45 }
 0x1c5   :  { %2137 = vmatprep.subr.mxu1 %v781_v53  ;;  %2049 = vmatprep.mubr.f32.mxu1 %v2412_v60  ;;  %v736_v50 = vld [vmem:[#allocation5 + $0x1450] sm:$0xff]  ;;  %v733_v52 = vld [vmem:[#allocation5 + $0x1438] sm:$0xff]  ;;  %v2576_v53 = vpop.f32.mrf.mxu1  ;;  %v2581_v60 = vpop.f32.mrf.mxu0 }
 0x1c6   :  { %2061 = vmatpush1.msra.mxu0 %v652_v55  ;;  %2138 = vmatpush1.msra.mxu1 %v780_v57  ;;  %v604_v54 = vld [vmem:[#allocation5 + $0x1030] sm:$0xff]  ;;  %v601_v57 = vld [vmem:[#allocation5 + $0x1018] sm:$0xff] }
 0x1c7   :  { %2062 = vmatprep.subr.mxu0 %v649_v58  ;;  %2050 = vmatmul.mubr.f32.gmra.mxu1 %v2413_v1  ;;  %v732_v55 = vld [vmem:[#allocation5 + $0x1430] sm:$0xff]  ;;  %v729_v58 = vld [vmem:[#allocation5 + $0x1418] sm:$0xff] }
 0x1c8   :  { %2139 = vmatprep.subr.mxu1 %v777_v59  ;;  %2063 = vmatpush1.msra.mxu0 %v648_v61  ;;  %v2579_v59 = vld [vmem:[#allocation7] sm:$0xf]  ;;  %v600_v61 = vld [vmem:[#allocation5 + $0x1010] sm:$0xff]  ;;  %v853_v1 = vld [vmem:[#allocation5 + $0x17f8] sm:$0xff] }
 0x1c9   :  { %2140 = vmatpush1.msra.mxu1 %v776_v62  ;;  %2064 = vmatprep.subr.mxu0 %v645_v63  ;;  %v728_v62 = vld [vmem:[#allocation5 + $0x1410] sm:$0xff]  ;;  %v1118_v63 = vsub.s32 1, %v2572_v45 }
 0x1ca   :  { %2141 = vmatprep.subr.mxu1 %v773_v0  ;;  %2065 = vmatpush1.msra.mxu0 %v644_v2  ;;  %v725_v0 = vld [vmem:[#allocation5 + $0x13f8] sm:$0xff]  ;;  %v2584_v2 = vpop.f32.mrf.mxu1  ;;  %v836_v34 = vld [vmem:[#allocation5 + $0x1770] sm:$0xff] }
 0x1cb   :  { %2142 = vmatpush1.msra.mxu1 %v772_v3  ;;  %2066 = vmatprep.subr.mxu0 %v641_v4  ;;  %v724_v3 = vld [vmem:[#allocation5 + $0x13f0] sm:$0xff] }
 0x1cc   :  { %2143 = vmatprep.subr.mxu1 %v769_v5  ;;  %2067 = vmatpush1.msra.mxu0 %v640_v6  ;;  %v852_v4 = vld [vmem:[#allocation5 + $0x17f0] sm:$0xff]  ;;  %v1115_v5 = vrot.slane %v2579_v59, %v1114_v56  ;;  %v721_v6 = vld [vmem:[#allocation5 + $0x13d8] sm:$0xff] }
 0x1cd   :  { %2144 = vmatpush1.msra.mxu1 %v768_v7  ;;  %2068 = vmatprep.subr.mxu0 %v637_v8  ;;  %v849_v7 = vld [vmem:[#allocation5 + $0x17d8] sm:$0xff]  ;;  %v2587_v8 = vpop.f32.mrf.mxu0 }
 0x1ce   :  { %2145 = vmatprep.subr.mxu1 %v765_v9  ;;  %2069 = vmatpush1.msra.mxu0 %v636_v11  ;;  %v720_v9 = vld [vmem:[#allocation5 + $0x13d0] sm:$0xff] }
 0x1cf   :  { %2146 = vmatpush1.msra.mxu1 %v764_v12  ;;  %2070 = vmatprep.subr.mxu0 %v633_v13  ;;  %v848_v11 = vld [vmem:[#allocation5 + $0x17d0] sm:$0xff]  ;;  %v1119_v12 = vrot.slane %v2579_v59, %v1118_v63  ;;  %v717_v13 = vld [vmem:[#allocation5 + $0x13b8] sm:$0xff] }
 0x1d0   :  { %2147 = vmatprep.subr.mxu1 %v761_v14  ;;  %2071 = vmatpush1.msra.mxu0 %v632_v16  ;;  %v845_v14 = vld [vmem:[#allocation5 + $0x17b8] sm:$0xff]  ;;  %v2590_v16 = vpop.f32.mrf.mxu1  ;;  %v820_v63 = vld [vmem:[#allocation5 + $0x16f0] sm:$0xff] }
 0x1d1   :  { %2148 = vmatpush1.msra.mxu1 %v760_v17  ;;  %2072 = vmatprep.subr.mxu0 %v629_v18  ;;  %v716_v17 = vld [vmem:[#allocation5 + $0x13b0] sm:$0xff] }
 0x1d2   :  { %2149 = vmatprep.subr.mxu1 %v757_v19  ;;  %2073 = vmatpush1.msra.mxu0 %v628_v21  ;;  %v844_v18 = vld [vmem:[#allocation5 + $0x17b0] sm:$0xff]  ;;  %v1199_v19 = vadd.f32 %v2556_v10, %v1115_v5  ;;  %v713_v21 = vld [vmem:[#allocation5 + $0x1398] sm:$0xff] }
 0x1d3   :  { %2150 = vmatpush1.msra.mxu1 %v756_v22  ;;  %2074 = vmatprep.subr.mxu0 %v625_v23  ;;  %v841_v22 = vld [vmem:[#allocation5 + $0x1798] sm:$0xff]  ;;  %v2593_v23 = vpop.f32.mrf.mxu0  ;;  %v708_v10 = vld [vmem:[#allocation5 + $0x1370] sm:$0xff] }
 0x1d4   :  { %2151 = vmatprep.subr.mxu1 %v753_v24  ;;  %2075 = vmatpush1.msra.mxu0 %v624_v27  ;;  %v712_v24 = vld [vmem:[#allocation5 + $0x1390] sm:$0xff] }
 0x1d5   :  { %2152 = vmatpush1.msra.mxu1 %v752_v28  ;;  %2076 = vmatprep.subr.mxu0 %v621_v29  ;;  %v840_v27 = vld [vmem:[#allocation5 + $0x1790] sm:$0xff]  ;;  %v1201_v28 = vadd.f32 %v2560_v20, %v1119_v12  ;;  %v709_v29 = vld [vmem:[#allocation5 + $0x1378] sm:$0xff] }
 0x1d6   :  { %2153 = vmatprep.subr.mxu1 %v749_v30  ;;  %2077 = vmatpush1.msra.mxu0 %v620_v32  ;;  %v837_v30 = vld [vmem:[#allocation5 + $0x1778] sm:$0xff]  ;;  %v2596_v32 = vpop.f32.mrf.mxu1  ;;  %v704_v20 = vld [vmem:[#allocation5 + $0x1350] sm:$0xff] }
 0x1d7   :  { %2154 = vmatpush1.msra.mxu1 %v748_v33  ;;  %2078 = vmatprep.subr.mxu0 %v617_v35  ;;  %v1506_v33 = vpop.f32.mrf.mxu0  ;;  %v1276_v35 = vadd.f32 %v2558_v15, %v1199_v19  ;;  %v829_v15 = vld [vmem:[#allocation5 + $0x1738] sm:$0xff] }
 0x1d8   :  { %2155 = vmatprep.subr.mxu1 %v745_v36  ;;  %2079 = vmatpush1.msra.mxu0 %v616_v38  ;;  %v705_v36 = vld [vmem:[#allocation5 + $0x1358] sm:$0xff] }
 0x1d9   :  { %2156 = vmatpush1.msra.mxu1 %v744_v39  ;;  %2080 = vmatprep.subr.mxu0 %v613_v40  ;;  %v833_v38 = vld [vmem:[#allocation5 + $0x1758] sm:$0xff]  ;;  %v2599_v39 = vpop.f32.mrf.mxu1  ;;  %v832_v40 = vld [vmem:[#allocation5 + $0x1750] sm:$0xff] }
 0x1da   :  { %2157 = vmatprep.subr.mxu1 %v741_v41  ;;  %2081 = vmatpush1.msra.mxu0 %v612_v43  ;;  %v1278_v41 = vadd.f32 %v2562_v25, %v1201_v28  ;;  %v1205_v43 = vadd.f32 %v2564_v26, %v1115_v5  ;;  %v697_v25 = vld [vmem:[#allocation5 + $0x1318] sm:$0xff] }
 0x1db   :  { %2158 = vmatpush1.msra.mxu1 %v740_v44  ;;  %2082 = vmatprep.subr.mxu0 %v609_v46  ;;  %v1353_v44 = vadd.f32 %v2574_v48, %v1276_v35  ;;  %v701_v46 = vld [vmem:[#allocation5 + $0x1338] sm:$0xff]  ;;  %v1585_v26 = vpop.f32.mrf.mxu1  ;;  %v696_v48 = vld [vmem:[#allocation5 + $0x1310] sm:$0xff] }
 0x1dc   :  { %2159 = vmatprep.subr.mxu1 %v737_v47  ;;  %2083 = vmatpush1.msra.mxu0 %v608_v49  ;;  %v1207_v47 = vadd.f32 %v2568_v37, %v1119_v12  ;;  %v1508_v49 = vpop.f32.mrf.mxu0  ;;  %v1282_v56 = vadd.f32 %v2566_v31, %v1205_v43  ;;  %v689_v31 = vld [vmem:[#allocation5 + $0x12d8] sm:$0xff]  ;;  %v812_v12 = vld [vmem:[#allocation5 + $0x16b0] sm:$0xff] }
 0x1dd   :  { %2160 = vmatpush1.msra.mxu1 %v736_v50  ;;  %2084 = vmatprep.subr.mxu0 %v605_v51  ;;  %v700_v50 = vld [vmem:[#allocation5 + $0x1330] sm:$0xff]  ;;  %v1430_v37 = vadd.f32 %v2576_v53, %v1353_v44  ;;  %v817_v53 = vld [vmem:[#allocation5 + $0x16d8] sm:$0xff]  ;;  %v1589_v5 = vpop.f32.mrf.mxu1 }
 0x1de   :  { %2161 = vmatprep.subr.mxu1 %v733_v52  ;;  %2085 = vmatpush1.msra.mxu0 %v604_v54  ;;  %v828_v51 = vld [vmem:[#allocation5 + $0x1730] sm:$0xff]  ;;  %v1355_v52 = vadd.f32 %v2581_v60, %v1278_v41  ;;  %v825_v54 = vld [vmem:[#allocation5 + $0x1718] sm:$0xff]  ;;  %v1512_v60 = vpop.f32.mrf.mxu0 }
 0x1df   :  { %2162 = vmatpush1.msra.mxu1 %v732_v55  ;;  %2086 = vmatprep.subr.mxu0 %v601_v57  ;;  %v824_v55 = vld [vmem:[#allocation5 + $0x1710] sm:$0xff]  ;;  %v693_v57 = vld [vmem:[#allocation5 + $0x12f8] sm:$0xff] }
 0x1e0   :  { %2163 = vmatprep.subr.mxu1 %v729_v58  ;;  %2087 = vmatpush1.msra.mxu0 %v600_v61  ;;  %v821_v58 = vld [vmem:[#allocation5 + $0x16f8] sm:$0xff]  ;;  %v1284_v61 = vadd.f32 %v2570_v42, %v1207_v47  ;;  %v688_v42 = vld [vmem:[#allocation5 + $0x12d0] sm:$0xff] }
 0x1e1   :  { %2164 = vmatpush1.msra.mxu1 %v728_v62  ;;  %2088 = vmatprep.subr.mxu0 %v725_v0  ;;  %v692_v62 = vld [vmem:[#allocation5 + $0x12f0] sm:$0xff]  ;;  %v1432_v0 = vadd.f32 %v2584_v2, %v1355_v52  ;;  %v1514_v2 = vpop.f32.mrf.mxu0 }
 0x1e2   :  { %2165 = vmatprep.subr.mxu1 %v853_v1  ;;  %2089 = vmatpush2.msra.mxu0 %v724_v3  ;;  %v1359_v1 = vadd.f32 %v2587_v8, %v1282_v56  ;;  %v1507_v3 = vadd.f32 %v1506_v33, %v1430_v37  ;;  %v684_v8 = vld [vmem:[#allocation5 + $0x12b0] sm:$0xff] }
 0x1e3   :  { %2166 = vmatpush2.msra.mxu1 %v852_v4  ;;  %2090 = vmatprep.subr.mxu0 %v721_v6  ;;  %v1361_v4 = vadd.f32 %v2593_v23, %v1284_v61  ;;  %v816_v6 = vld [vmem:[#allocation5 + $0x16d0] sm:$0xff]  ;;  %v2414_v61 = vld [vmem:[#allocation2 + $0x48] sm:$0xff] }
 0x1e4   :  { %2167 = vmatprep.subr.mxu1 %v849_v7  ;;  %2091 = vmatpush2.msra.mxu0 %v720_v9  ;;  %v1509_v7 = vadd.f32 %v1508_v49, %v1432_v0  ;;  %v685_v9 = vld [vmem:[#allocation5 + $0x12b8] sm:$0xff]  ;;  %v808_v23 = vld [vmem:[#allocation5 + $0x1690] sm:$0xff] }
 0x1e5   :  { %2168 = vmatpush2.msra.mxu1 %v848_v11  ;;  %2092 = vmatprep.subr.mxu0 %v717_v13  ;;  %v813_v11 = vld [vmem:[#allocation5 + $0x16b8] sm:$0xff]  ;;  %v1436_v13 = vadd.f32 %v2590_v16, %v1359_v1  ;;  %v1438_v19 = vadd.f32 %v2596_v32, %v1361_v4  ;;  %v676_v33 = vld [vmem:[#allocation5 + $0x1270] sm:$0xff] }
 0x1e6   :  { %2169 = vmatprep.subr.mxu1 %v845_v14  ;;  %2093 = vmatpush2.msra.mxu0 %v716_v17  ;;  %v1584_v14 = vadd.f32 %v2599_v39, %v1507_v3  ;;  %v681_v17 = vld [vmem:[#allocation5 + $0x1298] sm:$0xff]  ;;  %v800_v41 = vld [vmem:[#allocation5 + $0x1650] sm:$0xff] }
 0x1e7   :  { %2170 = vmatpush2.msra.mxu1 %v844_v18  ;;  %2094 = vmatprep.subr.mxu0 %v713_v21  ;;  %v809_v18 = vld [vmem:[#allocation5 + $0x1698] sm:$0xff]  ;;  %v1591_v21 = vpop.f32.mrf.mxu1  ;;  %v1513_v28 = vadd.f32 %v1512_v60, %v1436_v13  ;;  %v1515_v32 = vadd.f32 %v1514_v2, %v1438_v19  ;;  %v668_v49 = vld [vmem:[#allocation5 + $0x1230] sm:$0xff]  ;;  %v2418_v2 = vld [vmem:[#allocation2 + $0xc8] sm:$0xff] }
 0x1e8   :  { %2171 = vmatprep.subr.mxu1 %v841_v22  ;;  %2095 = vmatpush2.msra.mxu0 %v712_v24  ;;  %v680_v22 = vld [vmem:[#allocation5 + $0x1290] sm:$0xff]  ;;  %v805_v16 = vld [vmem:[#allocation5 + $0x1678] sm:$0xff] }
 0x1e9   :  { %2172 = vmatpush2.msra.mxu1 %v840_v27  ;;  %2096 = vmatprep.subr.mxu0 %v709_v29  ;;  %v1586_v27 = vadd.f32 %v1585_v26, %v1509_v7  ;;  %v677_v29 = vld [vmem:[#allocation5 + $0x1278] sm:$0xff]  ;;  %v1590_v44 = vadd.f32 %v1589_v5, %v1513_v28  ;;  %v1592_v52 = vadd.f32 %v1591_v21, %v1515_v32  ;;  %v792_v56 = vld [vmem:[#allocation5 + $0x1610] sm:$0xff] }
 0x1ea   :  { %2173 = vmatprep.subr.mxu1 %v837_v30  ;;  %2097 = vmatpush2.msra.mxu0 %v708_v10  ;;  %v804_v10 = vld [vmem:[#allocation5 + $0x1670] sm:$0xff]  ;;  %v1045_v60 = vld [vmem:[#allocation5 + $0x1df8] sm:$0xff] }
 0x1eb   :  { %2174 = vmatpush2.msra.mxu1 %v836_v34  ;;  %2098 = vmatprep.subr.mxu0 %v705_v36  ;;  %v673_v36 = vld [vmem:[#allocation5 + $0x1258] sm:$0xff]  ;;  %v916_v0 = vld [vmem:[#allocation5 + $0x19f0] sm:$0xff] }
 0x1ec   :  { %2175 = vmatprep.subr.mxu1 %v833_v38  ;;  %2099 = vmatpush2.msra.mxu0 %v704_v20  ;;  %v801_v38 = vld [vmem:[#allocation5 + $0x1658] sm:$0xff]  ;;  %v1044_v1 = vld [vmem:[#allocation5 + $0x1df0] sm:$0xff] }
 0x1ed   :  { %2176 = vmatpush2.msra.mxu1 %v832_v40  ;;  %2100 = vmatprep.subr.mxu0 %v701_v46  ;;  %v672_v40 = vld [vmem:[#allocation5 + $0x1250] sm:$0xff]  ;;  %v669_v46 = vld [vmem:[#allocation5 + $0x1238] sm:$0xff] }
 0x1ee   :  { %2177 = vmatprep.subr.mxu1 %v829_v15  ;;  %2101 = vmatpush2.msra.mxu0 %v700_v50  ;;  %v797_v15 = vld [vmem:[#allocation5 + $0x1638] sm:$0xff]  ;;  %v796_v50 = vld [vmem:[#allocation5 + $0x1630] sm:$0xff] }
 0x1ef   :  { %2178 = vmatpush2.msra.mxu1 %v828_v51  ;;  %2102 = vmatprep.subr.mxu0 %v697_v25  ;;  %v665_v25 = vld [vmem:[#allocation5 + $0x1218] sm:$0xff]  ;;  %v1040_v7 = vld [vmem:[#allocation5 + $0x1dd0] sm:$0xff] }
 0x1f0   :  { %2179 = vmatprep.subr.mxu1 %v825_v54  ;;  %2103 = vmatpush2.msra.mxu0 %v696_v48  ;;  %v793_v54 = vld [vmem:[#allocation5 + $0x1618] sm:$0xff]  ;;  %v664_v48 = vld [vmem:[#allocation5 + $0x1210] sm:$0xff] }
 0x1f1   :  { %2180 = vmatpush2.msra.mxu1 %v824_v55  ;;  %2104 = vmatprep.subr.mxu0 %v693_v57  ;;  %v917_v57 = vld [vmem:[#allocation5 + $0x19f8] sm:$0xff]  ;;  %v1036_v13 = vld [vmem:[#allocation5 + $0x1db0] sm:$0xff] }
 0x1f2   :  { %2181 = vmatprep.subr.mxu1 %v821_v58  ;;  %2105 = vmatpush2.msra.mxu0 %v692_v62  ;;  %v1041_v4 = vld [vmem:[#allocation5 + $0x1dd8] sm:$0xff]  ;;  %v904_v19 = vld [vmem:[#allocation5 + $0x1990] sm:$0xff] }
 0x1f3   :  { %2182 = vmatpush2.msra.mxu1 %v820_v63  ;;  %2106 = vmatprep.subr.mxu0 %v689_v31  ;;  %v2415_v63 = vld [vmem:[#allocation2 + $0x40] sm:$0xff]  ;;  %v2416_v31 = vld [vmem:[#allocation2 + $0x58] sm:$0xff]  ;;  %v1032_v21 = vld [vmem:[#allocation5 + $0x1d90] sm:$0xff] }
 0x1f4   :  { %2183 = vmatprep.subr.mxu1 %v817_v53  ;;  %2107 = vmatpush2.msra.mxu0 %v688_v42  ;;  %v913_v53 = vld [vmem:[#allocation5 + $0x19d8] sm:$0xff]  ;;  %v2417_v42 = vld [vmem:[#allocation2 + $0x50] sm:$0xff] }
 0x1f5   :  { %2184 = vmatpush2.msra.mxu1 %v816_v6  ;;  %2108 = vmatprep.subr.mxu0 %v685_v9  ;;  %v912_v6 = vld [vmem:[#allocation5 + $0x19d0] sm:$0xff]  ;;  %v909_v9 = vld [vmem:[#allocation5 + $0x19b8] sm:$0xff] }
 0x1f6   :  { %2185 = vmatprep.subr.mxu1 %v813_v11  ;;  %v1660_v24 = vpop.f32.mrf.mxu0  ;;  %2109 = vmatpush2.msra.mxu0 %v684_v8  ;;  %v1037_v11 = vld [vmem:[#allocation5 + $0x1db8] sm:$0xff]  ;;  %v908_v8 = vld [vmem:[#allocation5 + $0x19b0] sm:$0xff] }
 0x1f7   :  { %2186 = vmatpush2.msra.mxu1 %v812_v12  ;;  %v1661_v30 = vadd.f32 %v1660_v24, %v1584_v14  ;;  %2110 = vmatprep.subr.mxu0 %v681_v17  ;;  %v2419_v12 = vld [vmem:[#allocation2 + $0xc0] sm:$0xff]  ;;  %v905_v14 = vld [vmem:[#allocation5 + $0x1998] sm:$0xff]  ;;  %v2421_v24 = vld [vmem:[#allocation2 + $0xd0] sm:$0xff] }
 0x1f8   :  { %2187 = vmatprep.subr.mxu1 %v809_v18  ;;  %v1737_v34 = vpop.f32.mrf.mxu1  ;;  %v1662_v35 = vpop.f32.mrf.mxu0  ;;  %2111 = vmatpush2.msra.mxu0 %v680_v22  ;;  %v1033_v17 = vld [vmem:[#allocation5 + $0x1d98] sm:$0xff]  ;;  %v1028_v28 = vld [vmem:[#allocation5 + $0x1d70] sm:$0xff] }
 0x1f9   :  { %2188 = vmatpush2.msra.mxu1 %v808_v23  ;;  %v1738_v39 = vadd.f32 %v1737_v34, %v1661_v30  ;;  %v1663_v20 = vadd.f32 %v1662_v35, %v1586_v27  ;;  %2112 = vmatprep.subr.mxu0 %v677_v29  ;;  %v2420_v18 = vld [vmem:[#allocation2 + $0xd8] sm:$0xff]  ;;  %v900_v27 = vld [vmem:[#allocation5 + $0x1970] sm:$0xff] }
 0x1fa   :  { %2189 = vmatprep.subr.mxu1 %v805_v16  ;;  %v1739_v43 = vpop.f32.mrf.mxu1  ;;  %2113 = vmatpush2.msra.mxu0 %v676_v33  ;;  %v901_v22 = vld [vmem:[#allocation5 + $0x1978] sm:$0xff]  ;;  %v896_v30 = vld [vmem:[#allocation5 + $0x1950] sm:$0xff] }
 0x1fb   :  { %2190 = vmatpush2.msra.mxu1 %v804_v10  ;;  %2364 = vst [vmem:[#allocation8] sm:$0xff] %v1738_v39  ;;  %v1740_v47 = vadd.f32 %v1739_v43, %v1663_v20  ;;  %2114 = vmatprep.subr.mxu0 %v673_v36  ;;  %v1029_v23 = vld [vmem:[#allocation5 + $0x1d78] sm:$0xff]  ;;  %v1024_v33 = vld [vmem:[#allocation5 + $0x1d50] sm:$0xff] }
 0x1fc   :  { %2191 = vmatprep.subr.mxu1 %v801_v38  ;;  %v1666_v51 = vpop.f32.mrf.mxu0  ;;  %2115 = vmatpush2.msra.mxu0 %v672_v40  ;;  %v897_v29 = vld [vmem:[#allocation5 + $0x1958] sm:$0xff]  ;;  %v892_v35 = vld [vmem:[#allocation5 + $0x1930] sm:$0xff] }
 0x1fd   :  { %2192 = vmatpush2.msra.mxu1 %v800_v41  ;;  %2365 = vst [vmem:[#allocation8 + $0x8] sm:$0xff] %v1740_v47  ;;  %v1667_v26 = vadd.f32 %v1666_v51, %v1590_v44  ;;  %2116 = vmatprep.subr.mxu0 %v669_v46  ;;  %v1025_v16 = vld [vmem:[#allocation5 + $0x1d58] sm:$0xff]  ;;  %v1020_v32 = vld [vmem:[#allocation5 + $0x1d30] sm:$0xff] }
 0x1fe   :  { %2193 = vmatprep.subr.mxu1 %v797_v15  ;;  %v1668_v55 = vpop.f32.mrf.mxu0  ;;  %2117 = vmatpush2.msra.mxu0 %v668_v49  ;;  %v893_v10 = vld [vmem:[#allocation5 + $0x1938] sm:$0xff]  ;;  %v888_v39 = vld [vmem:[#allocation5 + $0x1910] sm:$0xff] }
 0x1ff   :  { %2194 = vmatpush2.msra.mxu1 %v796_v50  ;;  %v1669_v37 = vadd.f32 %v1668_v55, %v1592_v52  ;;  %2118 = vmatprep.subr.mxu0 %v665_v25  ;;  %v1743_v58 = vpop.f32.mrf.mxu1  ;;  %v1021_v34 = vld [vmem:[#allocation5 + $0x1d38] sm:$0xff]  ;;  %v1016_v20 = vld [vmem:[#allocation5 + $0x1d10] sm:$0xff] }
 0x200   :  { %2195 = vmatprep.subr.mxu1 %v793_v54  ;;  %2119 = vmatpush2.msra.mxu0 %v664_v48  ;;  %v1744_v62 = vadd.f32 %v1743_v58, %v1667_v26  ;;  %v889_v36 = vld [vmem:[#allocation5 + $0x1918] sm:$0xff]  ;;  %v884_v43 = vld [vmem:[#allocation5 + $0x18f0] sm:$0xff] }
 0x201   :  { %2120 = vmatprep.mubr.f32.mxu0 %v2414_v61  ;;  %2196 = vmatpush2.msra.mxu1 %v792_v56  ;;  %v1745_v3 = vpop.f32.mrf.mxu1  ;;  %v1017_v38 = vld [vmem:[#allocation5 + $0x1d18] sm:$0xff]  ;;  %v1012_v44 = vld [vmem:[#allocation5 + $0x1cf0] sm:$0xff] }
 0x202   :  { %2121 = vmatmul.mubr.f32.vlgmr.msra.gmra.mxu0 %v2415_v63  ;;  %2197 = vmatprep.mubr.f32.mxu1 %v2416_v31  ;;  %2368 = vst [vmem:[#allocation8 + $0x20] sm:$0xff] %v1744_v62  ;;  %v1746_v5 = vadd.f32 %v1745_v3, %v1669_v37  ;;  %v885_v40 = vld [vmem:[#allocation5 + $0x18f8] sm:$0xff]  ;;  %v880_v47 = vld [vmem:[#allocation5 + $0x18d0] sm:$0xff] }
 0x203   :  { %2210 = vmatprep.subr.mxu0 %v917_v57  ;;  %2287 = vmatprep.subr.mxu1 %v1045_v60  ;;  %v1013_v41 = vld [vmem:[#allocation5 + $0x1cf8] sm:$0xff]  ;;  %v1008_v49 = vld [vmem:[#allocation5 + $0x1cd0] sm:$0xff] }
 0x204   :  { %2198 = vmatmul.mubr.f32.vlgmr.msra.gmra.mxu1 %v2417_v42  ;;  %2211 = vmatpush1.msra.mxu0 %v916_v0  ;;  %2369 = vst [vmem:[#allocation8 + $0x28] sm:$0xff] %v1746_v5  ;;  %v881_v46 = vld [vmem:[#allocation5 + $0x18d8] sm:$0xff]  ;;  %v876_v52 = vld [vmem:[#allocation5 + $0x18b0] sm:$0xff] }
 0x205   :  { %2288 = vmatpush1.msra.mxu1 %v1044_v1  ;;  %2212 = vmatprep.subr.mxu0 %v913_v53  ;;  %v1009_v15 = vld [vmem:[#allocation5 + $0x1cd8] sm:$0xff]  ;;  %v1004_v25 = vld [vmem:[#allocation5 + $0x1cb0] sm:$0xff] }
 0x206   :  { %2289 = vmatprep.subr.mxu1 %v1041_v4  ;;  %2126 = vmatprep.mubr.f32.mxu0 %v2418_v2  ;;  %v877_v50 = vld [vmem:[#allocation5 + $0x18b8] sm:$0xff]  ;;  %v872_v48 = vld [vmem:[#allocation5 + $0x1890] sm:$0xff] }
 0x207   :  { %2213 = vmatpush1.msra.mxu0 %v912_v6  ;;  %2290 = vmatpush1.msra.mxu1 %v1040_v7  ;;  %v1005_v51 = vld [vmem:[#allocation5 + $0x1cb8] sm:$0xff]  ;;  %v1000_v55 = vld [vmem:[#allocation5 + $0x1c90] sm:$0xff] }
 0x208   :  { %2127 = vmatmul.mubr.f32.gmra.mxu0 %v2419_v12  ;;  %2214 = vmatprep.subr.mxu0 %v909_v9  ;;  %v873_v54 = vld [vmem:[#allocation5 + $0x1898] sm:$0xff]  ;;  %v868_v57 = vld [vmem:[#allocation5 + $0x1870] sm:$0xff] }
 0x209   :  { %2291 = vmatprep.subr.mxu1 %v1037_v11  ;;  %2203 = vmatprep.mubr.f32.mxu1 %v2420_v18  ;;  %v1001_v26 = vld [vmem:[#allocation5 + $0x1c98] sm:$0xff]  ;;  %v996_v58 = vld [vmem:[#allocation5 + $0x1c70] sm:$0xff] }
 0x20a   :  { %2215 = vmatpush1.msra.mxu0 %v908_v8  ;;  %2292 = vmatpush1.msra.mxu1 %v1036_v13  ;;  %v869_v56 = vld [vmem:[#allocation5 + $0x1878] sm:$0xff]  ;;  %v864_v62 = vld [vmem:[#allocation5 + $0x1850] sm:$0xff] }
 0x20b   :  { %2216 = vmatprep.subr.mxu0 %v905_v14  ;;  %2204 = vmatmul.mubr.f32.gmra.mxu1 %v2421_v24  ;;  %v997_v37 = vld [vmem:[#allocation5 + $0x1c78] sm:$0xff]  ;;  %v992_v63 = vld [vmem:[#allocation5 + $0x1c50] sm:$0xff] }
 0x20c   :  { %2293 = vmatprep.subr.mxu1 %v1033_v17  ;;  %2217 = vmatpush1.msra.mxu0 %v904_v19  ;;  %v865_v61 = vld [vmem:[#allocation5 + $0x1858] sm:$0xff]  ;;  %v860_v3 = vld [vmem:[#allocation5 + $0x1830] sm:$0xff] }
 0x20d   :  { %2294 = vmatpush1.msra.mxu1 %v1032_v21  ;;  %2218 = vmatprep.subr.mxu0 %v901_v22  ;;  %v993_v60 = vld [vmem:[#allocation5 + $0x1c58] sm:$0xff]  ;;  %v988_v31 = vld [vmem:[#allocation5 + $0x1c30] sm:$0xff] }
 0x20e   :  { %2295 = vmatprep.subr.mxu1 %v1029_v23  ;;  %2219 = vmatpush1.msra.mxu0 %v900_v27  ;;  %v861_v0 = vld [vmem:[#allocation5 + $0x1838] sm:$0xff]  ;;  %v856_v5 = vld [vmem:[#allocation5 + $0x1810] sm:$0xff] }
 0x20f   :  { %2296 = vmatpush1.msra.mxu1 %v1028_v28  ;;  %2220 = vmatprep.subr.mxu0 %v897_v29  ;;  %v989_v1 = vld [vmem:[#allocation5 + $0x1c38] sm:$0xff]  ;;  %v984_v42 = vld [vmem:[#allocation5 + $0x1c10] sm:$0xff] }
 0x210   :  { %2297 = vmatprep.subr.mxu1 %v1025_v16  ;;  %2221 = vmatpush1.msra.mxu0 %v896_v30  ;;  %v857_v53 = vld [vmem:[#allocation5 + $0x1818] sm:$0xff]  ;;  %v980_v9 = vld [vmem:[#allocation5 + $0x1bf0] sm:$0xff] }
 0x211   :  { %2298 = vmatpush1.msra.mxu1 %v1024_v33  ;;  %2222 = vmatprep.subr.mxu0 %v893_v10  ;;  %v985_v4 = vld [vmem:[#allocation5 + $0x1c18] sm:$0xff]  ;;  %v1108_v11 = vld [vmem:[#allocation5 + $0x1ff0] sm:$0xff] }
 0x212   :  { %2299 = vmatprep.subr.mxu1 %v1021_v34  ;;  %2223 = vmatpush1.msra.mxu0 %v892_v35  ;;  %v981_v6 = vld [vmem:[#allocation5 + $0x1bf8] sm:$0xff]  ;;  %v976_v12 = vld [vmem:[#allocation5 + $0x1bd0] sm:$0xff] }
 0x213   :  { %2300 = vmatpush1.msra.mxu1 %v1020_v32  ;;  %2224 = vmatprep.subr.mxu0 %v889_v36  ;;  %v1109_v7 = vld [vmem:[#allocation5 + $0x1ff8] sm:$0xff]  ;;  %v1104_v13 = vld [vmem:[#allocation5 + $0x1fd0] sm:$0xff] }
 0x214   :  { %2301 = vmatprep.subr.mxu1 %v1017_v38  ;;  %2225 = vmatpush1.msra.mxu0 %v888_v39  ;;  %v977_v2 = vld [vmem:[#allocation5 + $0x1bd8] sm:$0xff]  ;;  %v972_v18 = vld [vmem:[#allocation5 + $0x1bb0] sm:$0xff] }
 0x215   :  { %2302 = vmatpush1.msra.mxu1 %v1016_v20  ;;  %2226 = vmatprep.subr.mxu0 %v885_v40  ;;  %v1105_v8 = vld [vmem:[#allocation5 + $0x1fd8] sm:$0xff]  ;;  %v1100_v19 = vld [vmem:[#allocation5 + $0x1fb0] sm:$0xff] }
 0x216   :  { %2303 = vmatprep.subr.mxu1 %v1013_v41  ;;  %2227 = vmatpush1.msra.mxu0 %v884_v43  ;;  %v973_v14 = vld [vmem:[#allocation5 + $0x1bb8] sm:$0xff]  ;;  %v968_v23 = vld [vmem:[#allocation5 + $0x1b90] sm:$0xff] }
 0x217   :  { %2304 = vmatpush1.msra.mxu1 %v1012_v44  ;;  %2228 = vmatprep.subr.mxu0 %v881_v46  ;;  %v1101_v17 = vld [vmem:[#allocation5 + $0x1fb8] sm:$0xff]  ;;  %v1096_v24 = vld [vmem:[#allocation5 + $0x1f90] sm:$0xff] }
 0x218   :  { %2305 = vmatprep.subr.mxu1 %v1009_v15  ;;  %2229 = vmatpush1.msra.mxu0 %v880_v47  ;;  %v969_v21 = vld [vmem:[#allocation5 + $0x1b98] sm:$0xff]  ;;  %v964_v29 = vld [vmem:[#allocation5 + $0x1b70] sm:$0xff] }
 0x219   :  { %2306 = vmatpush1.msra.mxu1 %v1008_v49  ;;  %2230 = vmatprep.subr.mxu0 %v877_v50  ;;  %v1097_v22 = vld [vmem:[#allocation5 + $0x1f98] sm:$0xff]  ;;  %v1092_v16 = vld [vmem:[#allocation5 + $0x1f70] sm:$0xff] }
 0x21a   :  { %2307 = vmatprep.subr.mxu1 %v1005_v51  ;;  %2231 = vmatpush1.msra.mxu0 %v876_v52  ;;  %v965_v27 = vld [vmem:[#allocation5 + $0x1b78] sm:$0xff]  ;;  %v960_v10 = vld [vmem:[#allocation5 + $0x1b50] sm:$0xff] }
 0x21b   :  { %2308 = vmatpush1.msra.mxu1 %v1004_v25  ;;  %2232 = vmatprep.subr.mxu0 %v873_v54  ;;  %v1093_v28 = vld [vmem:[#allocation5 + $0x1f78] sm:$0xff]  ;;  %v1088_v34 = vld [vmem:[#allocation5 + $0x1f50] sm:$0xff] }
 0x21c   :  { %2309 = vmatprep.subr.mxu1 %v1001_v26  ;;  %2233 = vmatpush1.msra.mxu0 %v872_v48  ;;  %v961_v30 = vld [vmem:[#allocation5 + $0x1b58] sm:$0xff]  ;;  %v956_v36 = vld [vmem:[#allocation5 + $0x1b30] sm:$0xff] }
 0x21d   :  { %2310 = vmatpush1.msra.mxu1 %v1000_v55  ;;  %2234 = vmatprep.subr.mxu0 %v869_v56  ;;  %v1089_v33 = vld [vmem:[#allocation5 + $0x1f58] sm:$0xff]  ;;  %v1084_v38 = vld [vmem:[#allocation5 + $0x1f30] sm:$0xff] }
 0x21e   :  { %2311 = vmatprep.subr.mxu1 %v997_v37  ;;  %2235 = vmatpush1.msra.mxu0 %v868_v57  ;;  %v957_v35 = vld [vmem:[#allocation5 + $0x1b38] sm:$0xff]  ;;  %v952_v40 = vld [vmem:[#allocation5 + $0x1b10] sm:$0xff] }
 0x21f   :  { %2312 = vmatpush1.msra.mxu1 %v996_v58  ;;  %2236 = vmatprep.subr.mxu0 %v865_v61  ;;  %v1085_v32 = vld [vmem:[#allocation5 + $0x1f38] sm:$0xff]  ;;  %v1080_v41 = vld [vmem:[#allocation5 + $0x1f10] sm:$0xff] }
 0x220   :  { %2313 = vmatprep.subr.mxu1 %v993_v60  ;;  %2237 = vmatpush1.msra.mxu0 %v864_v62  ;;  %v953_v39 = vld [vmem:[#allocation5 + $0x1b18] sm:$0xff]  ;;  %v948_v46 = vld [vmem:[#allocation5 + $0x1af0] sm:$0xff] }
 0x221   :  { %2314 = vmatpush1.msra.mxu1 %v992_v63  ;;  %2238 = vmatprep.subr.mxu0 %v861_v0  ;;  %v1081_v20 = vld [vmem:[#allocation5 + $0x1f18] sm:$0xff]  ;;  %v1076_v15 = vld [vmem:[#allocation5 + $0x1ef0] sm:$0xff] }
 0x222   :  { %2315 = vmatprep.subr.mxu1 %v989_v1  ;;  %2239 = vmatpush1.msra.mxu0 %v860_v3  ;;  %v949_v43 = vld [vmem:[#allocation5 + $0x1af8] sm:$0xff]  ;;  %v944_v50 = vld [vmem:[#allocation5 + $0x1ad0] sm:$0xff] }
 0x223   :  { %2316 = vmatpush1.msra.mxu1 %v988_v31  ;;  %2240 = vmatprep.subr.mxu0 %v857_v53  ;;  %v1077_v44 = vld [vmem:[#allocation5 + $0x1ef8] sm:$0xff]  ;;  %v1072_v51 = vld [vmem:[#allocation5 + $0x1ed0] sm:$0xff] }
 0x224   :  { %2317 = vmatprep.subr.mxu1 %v985_v4  ;;  %2241 = vmatpush1.msra.mxu0 %v856_v5  ;;  %v945_v47 = vld [vmem:[#allocation5 + $0x1ad8] sm:$0xff]  ;;  %v940_v54 = vld [vmem:[#allocation5 + $0x1ab0] sm:$0xff] }
 0x225   :  { %2318 = vmatpush1.msra.mxu1 %v984_v42  ;;  %2242 = vmatprep.subr.mxu0 %v981_v6  ;;  %v1073_v49 = vld [vmem:[#allocation5 + $0x1ed8] sm:$0xff]  ;;  %v1068_v26 = vld [vmem:[#allocation5 + $0x1eb0] sm:$0xff] }
 0x226   :  { %2319 = vmatprep.subr.mxu1 %v1109_v7  ;;  %2243 = vmatpush2.msra.mxu0 %v980_v9  ;;  %v941_v52 = vld [vmem:[#allocation5 + $0x1ab8] sm:$0xff]  ;;  %v936_v56 = vld [vmem:[#allocation5 + $0x1a90] sm:$0xff]  ;;  %v2422_v9 = vld [vmem:[#allocation2 + $0x68] sm:$0xff] }
 0x227   :  { %2320 = vmatpush2.msra.mxu1 %v1108_v11  ;;  %2244 = vmatprep.subr.mxu0 %v977_v2  ;;  %v1069_v25 = vld [vmem:[#allocation5 + $0x1eb8] sm:$0xff]  ;;  %v1064_v37 = vld [vmem:[#allocation5 + $0x1e90] sm:$0xff]  ;;  %v2424_v2 = vld [vmem:[#allocation2 + $0x60] sm:$0xff] }
 0x228   :  { %2321 = vmatprep.subr.mxu1 %v1105_v8  ;;  %2245 = vmatpush2.msra.mxu0 %v976_v12  ;;  %v937_v48 = vld [vmem:[#allocation5 + $0x1a98] sm:$0xff]  ;;  %v932_v61 = vld [vmem:[#allocation5 + $0x1a70] sm:$0xff]  ;;  %v2426_v12 = vld [vmem:[#allocation2 + $0xe8] sm:$0xff] }
 0x229   :  { %2322 = vmatpush2.msra.mxu1 %v1104_v13  ;;  %2246 = vmatprep.subr.mxu0 %v973_v14  ;;  %v1065_v55 = vld [vmem:[#allocation5 + $0x1e98] sm:$0xff]  ;;  %v1060_v60 = vld [vmem:[#allocation5 + $0x1e70] sm:$0xff]  ;;  %v2428_v14 = vld [vmem:[#allocation2 + $0xe0] sm:$0xff] }
 0x22a   :  { %2323 = vmatprep.subr.mxu1 %v1101_v17  ;;  %2247 = vmatpush2.msra.mxu0 %v972_v18  ;;  %v933_v57 = vld [vmem:[#allocation5 + $0x1a78] sm:$0xff]  ;;  %v928_v0 = vld [vmem:[#allocation5 + $0x1a50] sm:$0xff] }
 0x22b   :  { %2324 = vmatpush2.msra.mxu1 %v1100_v19  ;;  %2248 = vmatprep.subr.mxu0 %v969_v21  ;;  %v1061_v58 = vld [vmem:[#allocation5 + $0x1e78] sm:$0xff]  ;;  %v1056_v1 = vld [vmem:[#allocation5 + $0x1e50] sm:$0xff] }
 0x22c   :  { %2325 = vmatprep.subr.mxu1 %v1097_v22  ;;  %2249 = vmatpush2.msra.mxu0 %v968_v23  ;;  %v929_v62 = vld [vmem:[#allocation5 + $0x1a58] sm:$0xff]  ;;  %v924_v53 = vld [vmem:[#allocation5 + $0x1a30] sm:$0xff] }
 0x22d   :  { %2326 = vmatpush2.msra.mxu1 %v1096_v24  ;;  %2250 = vmatprep.subr.mxu0 %v965_v27  ;;  %v1057_v63 = vld [vmem:[#allocation5 + $0x1e58] sm:$0xff]  ;;  %v1052_v4 = vld [vmem:[#allocation5 + $0x1e30] sm:$0xff] }
 0x22e   :  { %2327 = vmatprep.subr.mxu1 %v1093_v28  ;;  %2251 = vmatpush2.msra.mxu0 %v964_v29  ;;  %v925_v3 = vld [vmem:[#allocation5 + $0x1a38] sm:$0xff]  ;;  %v920_v6 = vld [vmem:[#allocation5 + $0x1a10] sm:$0xff] }
 0x22f   :  { %2328 = vmatpush2.msra.mxu1 %v1092_v16  ;;  %2252 = vmatprep.subr.mxu0 %v961_v30  ;;  %v1053_v31 = vld [vmem:[#allocation5 + $0x1e38] sm:$0xff]  ;;  %v1048_v7 = vld [vmem:[#allocation5 + $0x1e10] sm:$0xff]  ;;  %v1122_v30 = vsub.s32 2, %v2572_v45 }
 0x230   :  { %2329 = vmatprep.subr.mxu1 %v1089_v33  ;;  %2253 = vmatpush2.msra.mxu0 %v960_v10  ;;  %v921_v5 = vld [vmem:[#allocation5 + $0x1a18] sm:$0xff]  ;;  %v2425_v8 = vld [vmem:[#allocation2 + $0x70] sm:$0xff] }
 0x231   :  { %2330 = vmatpush2.msra.mxu1 %v1088_v34  ;;  %2254 = vmatprep.subr.mxu0 %v957_v35  ;;  %v1049_v42 = vld [vmem:[#allocation5 + $0x1e18] sm:$0xff]  ;;  %v2429_v17 = vld [vmem:[#allocation2 + $0xf0] sm:$0xff]  ;;  %v1126_v34 = vsub.s32 3, %v2572_v45  ;;  %v1123_v35 = vrot.slane %v2579_v59, %v1122_v30 }
 0x232   :  { %2331 = vmatprep.subr.mxu1 %v1085_v32  ;;  %2255 = vmatpush2.msra.mxu0 %v956_v36  ;;  %v2423_v11 = vld [vmem:[#allocation2 + $0x78] sm:$0xff] }
 0x233   :  { %2332 = vmatpush2.msra.mxu1 %v1084_v38  ;;  %2256 = vmatprep.subr.mxu0 %v953_v39  ;;  %v2427_v13 = vld [vmem:[#allocation2 + $0xf8] sm:$0xff]  ;;  %v1127_v38 = vrot.slane %v2579_v59, %v1126_v34 }
 0x234   :  { %2333 = vmatprep.subr.mxu1 %v1081_v20  ;;  %2257 = vmatpush2.msra.mxu0 %v952_v40 }
 0x235   :  { %2334 = vmatpush2.msra.mxu1 %v1080_v41  ;;  %2258 = vmatprep.subr.mxu0 %v949_v43 }
 0x236   :  { %2335 = vmatprep.subr.mxu1 %v1077_v44  ;;  %2259 = vmatpush2.msra.mxu0 %v948_v46 }
 0x237   :  { %2336 = vmatpush2.msra.mxu1 %v1076_v15  ;;  %2260 = vmatprep.subr.mxu0 %v945_v47 }
 0x238   :  { %2337 = vmatprep.subr.mxu1 %v1073_v49  ;;  %2261 = vmatpush2.msra.mxu0 %v944_v50 }
 0x239   :  { %2338 = vmatpush2.msra.mxu1 %v1072_v51  ;;  %2262 = vmatprep.subr.mxu0 %v941_v52 }
 0x23a   :  { %2339 = vmatprep.subr.mxu1 %v1069_v25  ;;  %2263 = vmatpush2.msra.mxu0 %v940_v54  ;;  %v1814_v18 = vpop.f32.mrf.mxu0 }
 0x23b   :  { %2340 = vmatpush2.msra.mxu1 %v1068_v26  ;;  %2264 = vmatprep.subr.mxu0 %v937_v48  ;;  %v1815_v39 = vadd.f32 %v1814_v18, %v1123_v35 }
 0x23c   :  { %2341 = vmatprep.subr.mxu1 %v1065_v55  ;;  %2265 = vmatpush2.msra.mxu0 %v936_v56  ;;  %v1891_v19 = vpop.f32.mrf.mxu1  ;;  %v1816_v21 = vpop.f32.mrf.mxu0 }
 0x23d   :  { %2342 = vmatpush2.msra.mxu1 %v1064_v37  ;;  %2266 = vmatprep.subr.mxu0 %v933_v57  ;;  %v1817_v41 = vadd.f32 %v1816_v21, %v1127_v38  ;;  %v1892_v46 = vadd.f32 %v1891_v19, %v1815_v39 }
 0x23e   :  { %2343 = vmatprep.subr.mxu1 %v1061_v58  ;;  %2267 = vmatpush2.msra.mxu0 %v932_v61  ;;  %v1893_v22 = vpop.f32.mrf.mxu1 }
 0x23f   :  { %2344 = vmatpush2.msra.mxu1 %v1060_v60  ;;  %2268 = vmatprep.subr.mxu0 %v929_v62  ;;  %v1894_v47 = vadd.f32 %v1893_v22, %v1817_v41 }
 0x240   :  { %2345 = vmatprep.subr.mxu1 %v1057_v63  ;;  %2269 = vmatpush2.msra.mxu0 %v928_v0 }
 0x241   :  { %2346 = vmatpush2.msra.mxu1 %v1056_v1  ;;  %2270 = vmatprep.subr.mxu0 %v925_v3 }
 0x242   :  { %2347 = vmatprep.subr.mxu1 %v1053_v31  ;;  %2271 = vmatpush2.msra.mxu0 %v924_v53 }
 0x243   :  { %2348 = vmatpush2.msra.mxu1 %v1052_v4  ;;  %2272 = vmatprep.subr.mxu0 %v921_v5 }
 0x244   :  { %2349 = vmatprep.subr.mxu1 %v1049_v42  ;;  %2273 = vmatpush2.msra.mxu0 %v920_v6 }
 0x245   :  { %2274 = vmatprep.mubr.f32.mxu0 %v2422_v9  ;;  %2350 = vmatpush2.msra.mxu1 %v1048_v7 }
 0x246   :  { %2351 = vmatprep.mubr.f32.mxu1 %v2423_v11  ;;  %2275 = vmatmul.mubr.f32.vlgmr.msra.gmra.mxu0 %v2424_v2 }
 0x247   :  { %2352 = vmatmul.mubr.f32.vlgmr.msra.gmra.mxu1 %v2425_v8  ;;  %2280 = vmatprep.mubr.f32.mxu0 %v2426_v12 }
 0x248   :  { %2357 = vmatprep.mubr.f32.mxu1 %v2427_v13 }
 0x24a   :  { %2281 = vmatmul.mubr.f32.gmra.mxu0 %v2428_v14 }
 0x24b   :  { %2358 = vmatmul.mubr.f32.gmra.mxu1 %v2429_v17 }
 0x277   :  { %v1820_v23 = vpop.f32.mrf.mxu0 }
 0x278   :  { %v1821_v15 = vadd.f32 %v1820_v23, %v1123_v35 }
 0x279   :  { %v1822_v27 = vpop.f32.mrf.mxu0 }
 0x27a   :  { %v1897_v24 = vpop.f32.mrf.mxu1  ;;  %v1823_v49 = vadd.f32 %v1822_v27, %v1127_v38 }
 0x27b   :  { %v1898_v45 = vadd.f32 %v1897_v24, %v1821_v15 }
 0x27c   :  { %v1899_v28 = vpop.f32.mrf.mxu1 }
 0x27d   :  { %v1900_v54 = vadd.f32 %v1899_v28, %v1823_v49 }
 0x27e   :  { %v1968_v29 = vpop.f32.mrf.mxu0 }
 0x27f   :  { %v1969_v50 = vadd.f32 %v1968_v29, %v1892_v46 }
 0x280   :  { %v2045_v16 = vpop.f32.mrf.mxu1  ;;  %v1970_v33 = vpop.f32.mrf.mxu0 }
 0x281   :  { %v1971_v25 = vadd.f32 %v1970_v33, %v1894_v47  ;;  %v2046_v26 = vadd.f32 %v2045_v16, %v1969_v50 }
 0x282   :  { %v2047_v10 = vpop.f32.mrf.mxu1 }
 0x283   :  { %v2048_v56 = vadd.f32 %v2047_v10, %v1971_v25 }
 0x284   :  { %v1974_v32 = vpop.f32.mrf.mxu0 }
 0x285   :  { %v1975_v48 = vadd.f32 %v1974_v32, %v1898_v45 }
 0x286   :  { %v1976_v20 = vpop.f32.mrf.mxu0 }
 0x287   :  { %v2051_v36 = vpop.f32.mrf.mxu1  ;;  %v1977_v37 = vadd.f32 %v1976_v20, %v1900_v54 }
 0x288   :  { %v2052_v58 = vadd.f32 %v2051_v36, %v1975_v48 }
 0x289   :  { %v2053_v40 = vpop.f32.mrf.mxu1 }
 0x28a   :  { %v2054_v63 = vadd.f32 %v2053_v40, %v1977_v37 }
 0x2c2   :  { %v2122_v43 = vpop.f32.mrf.mxu0 }
 0x2c3   :  { %v2123_v57 = vadd.f32 %v2122_v43, %v2046_v26 }
 0x2c4   :  { %v2199_v44 = vpop.f32.mrf.mxu1  ;;  %v2124_v51 = vpop.f32.mrf.mxu0 }
 0x2c5   :  { %v2125_v61 = vadd.f32 %v2124_v51, %v2048_v56  ;;  %v2200_v0 = vadd.f32 %v2199_v44, %v2123_v57 }
 0x2c6   :  { %v2201_v52 = vpop.f32.mrf.mxu1 }
 0x2c7   :  { %v2202_v53 = vadd.f32 %v2201_v52, %v2125_v61 }
 0x2c8   :  { %v2128_v55 = vpop.f32.mrf.mxu0 }
 0x2c9   :  { %v2129_v1 = vadd.f32 %v2128_v55, %v2052_v58 }
 0x2ca   :  { %v2130_v60 = vpop.f32.mrf.mxu0 }
 0x2cb   :  { %v2205_v59 = vpop.f32.mrf.mxu1  ;;  %v2131_v4 = vadd.f32 %v2130_v60, %v2054_v63 }
 0x2cc   :  { %v2206_v7 = vadd.f32 %v2205_v59, %v2129_v1 }
 0x2cd   :  { %v2207_v62 = vpop.f32.mrf.mxu1 }
 0x2ce   :  { %v2208_v12 = vadd.f32 %v2207_v62, %v2131_v4 }
 0x306   :  { %v2276_v3 = vpop.f32.mrf.mxu0 }
 0x307   :  { %v2353_v31 = vpop.f32.mrf.mxu1  ;;  %v2277_v5 = vadd.f32 %v2276_v3, %v2200_v0 }
 0x308   :  { %v2278_v42 = vpop.f32.mrf.mxu0 }
 0x309   :  { %v2355_v6 = vpop.f32.mrf.mxu1  ;;  %v2354_v9 = vadd.f32 %v2353_v31, %v2277_v5  ;;  %v2279_v11 = vadd.f32 %v2278_v42, %v2202_v53 }
 0x30a   :  { %v2282_v2 = vpop.f32.mrf.mxu0 }
 0x30b   :  { %v2359_v8 = vpop.f32.mrf.mxu1  ;;  %2366 = vst [vmem:[#allocation8 + $0x10] sm:$0xff] %v2354_v9  ;;  %v2356_v13 = vadd.f32 %v2355_v6, %v2279_v11  ;;  %v2283_v14 = vadd.f32 %v2282_v2, %v2206_v7 }
 0x30c   :  { %v2284_v17 = vpop.f32.mrf.mxu0 }
 0x30d   :  { %2367 = vst [vmem:[#allocation8 + $0x18] sm:$0xff] %v2356_v13  ;;  %v2360_v18 = vadd.f32 %v2359_v8, %v2283_v14  ;;  %v2285_v19 = vadd.f32 %v2284_v17, %v2208_v12  ;;  %v2361_v21 = vpop.f32.mrf.mxu1 }
 0x30f   :  { %2370 = vst [vmem:[#allocation8 + $0x30] sm:$0xff] %v2360_v18  ;;  %v2362_v22 = vadd.f32 %v2361_v21, %v2285_v19 }
 0x311   :  { %2371 = vst [vmem:[#allocation8 + $0x38] sm:$0xff] %v2362_v22 }
 0x312   :  { %2501 = shalt.err (!%p2498_p5)
}
 0x313   :  { %2383 = dma.vmem_to_hbm [thread:$0]  %s2378_s2, 1024, %s2628_s3, [#allocation4], %s2517_s15, %s2517_s15, %s2518_s16  }
 0x314   :  { %2514 = dma.done.wait [#allocation4], 1024  }
 0x315   :  { %2515 = vsyncadd [#allocation4], 4294966272 }
 0x316   :  { %2387 = vsyncpa [#allocation3], 1 }
 0x317   :  { %2388 = vsyncpa [#allocation6], 1 }
 0x318   :  { %2389 = vsyncpa [#allocation4], 1 }

</bundles_post_ra>
